<compile_context>
chip_gen: v5e
topology: v5e:2x2
jax: 0.10.0
libtpu: 0.0.40
codegen_flags: <defaults>
</compile_context>

<pallas_src>
import jax
import jax.numpy as jnp
from jax.experimental import pallas as pl
from jax.experimental.pallas import tpu as pltpu

INPUT_DIM = 28 * 28      # 784
HIDDEN_DIM = 400         # logical hidden width (torch model)
HIDDEN_PAD = 512         # lane-aligned hidden width (4 * 128)
LATENT_DIM = 20
HEAD_PAD = 128           # fused mu|logvar head, padded to one dense lane group
TILE_B = 128             # batch rows per grid step (fills MXU M dim on v5e)


def encoder_kernel(x_ref, w1_ref, b1_ref, wh_ref, bh_ref, out_ref):
    # x: (TILE_B, 784) bf16 ; w1: (784, 512) bf16 ; b1: (1, 512) f32
    h = jnp.dot(x_ref[...], w1_ref[...], preferred_element_type=jnp.float32)
    h = jnp.maximum(h + b1_ref[...], 0.0)            # (TILE_B, 512) f32
    h = h.astype(jnp.bfloat16)                       # bf16 MXU feed for the head
    # fused mu|logvar head: (TILE_B, 512) @ (512, 128) -> (TILE_B, 128)
    y = jnp.dot(h, wh_ref[...], preferred_element_type=jnp.float32)
    out_ref[...] = y + bh_ref[...]                   # single lane-dense store


def encoder_forward(x, params):
    """x: (B, 784) float32 -> (mu, logvar), each (B, 20) float32."""
    w1, b1, wh, bh = params
    B = x.shape[0]
    b_pad = ((B + TILE_B - 1) // TILE_B) * TILE_B

    x_bf = x.astype(jnp.bfloat16)
    if b_pad != B:
        x_bf = jnp.pad(x_bf, ((0, b_pad - B), (0, 0)))

    out = pl.pallas_call(
        encoder_kernel,
        out_shape=jax.ShapeDtypeStruct((b_pad, HEAD_PAD), jnp.float32),
        grid=(b_pad // TILE_B,),
        in_specs=[
            pl.BlockSpec((TILE_B, INPUT_DIM), lambda i: (i, 0)),      # x tile
            pl.BlockSpec((INPUT_DIM, HIDDEN_PAD), lambda i: (0, 0)),  # w1 (resident)
            pl.BlockSpec((1, HIDDEN_PAD), lambda i: (0, 0)),          # b1 (resident)
            pl.BlockSpec((HIDDEN_PAD, HEAD_PAD), lambda i: (0, 0)),   # fused head W
            pl.BlockSpec((1, HEAD_PAD), lambda i: (0, 0)),            # fused head b
        ],
        out_specs=pl.BlockSpec((TILE_B, HEAD_PAD), lambda i: (i, 0)),
        compiler_params=pltpu.CompilerParams(
            dimension_semantics=("parallel",)),
    )(x_bf, w1, b1, wh, bh)

    mu = out[:B, :LATENT_DIM]
    logvar = out[:B, LATENT_DIM:2 * LATENT_DIM]
    return mu, logvar


def init_params(key):
    """PyTorch-style uniform(-1/sqrt(fan_in), 1/sqrt(fan_in)) init, then:
      - weights transposed to (in, out),
      - hidden padded 400 -> 512 with zeros,
      - mu/logvar heads fused into one (512, 128) weight / (1, 128) bias,
      - weights cast to bf16 (biases stay f32).
    """
    k1, k2, k3, k4, k5, k6 = jax.random.split(key, 6)

    def unif(k, shape, fan_in):
        bound = 1.0 / jnp.sqrt(jnp.float32(fan_in))
        return jax.random.uniform(k, shape, jnp.float32, -bound, bound)

    w1 = unif(k1, (INPUT_DIM, HIDDEN_DIM), INPUT_DIM)
    b1 = unif(k2, (HIDDEN_DIM,), INPUT_DIM)
    wmu = unif(k3, (HIDDEN_DIM, LATENT_DIM), HIDDEN_DIM)
    bmu = unif(k4, (LATENT_DIM,), HIDDEN_DIM)
    wlv = unif(k5, (HIDDEN_DIM, LATENT_DIM), HIDDEN_DIM)
    blv = unif(k6, (LATENT_DIM,), HIDDEN_DIM)

    w1_p = jnp.zeros((INPUT_DIM, HIDDEN_PAD), jnp.float32).at[:, :HIDDEN_DIM].set(w1)
    b1_p = jnp.zeros((1, HIDDEN_PAD), jnp.float32).at[0, :HIDDEN_DIM].set(b1)

    wh = jnp.zeros((HIDDEN_PAD, HEAD_PAD), jnp.float32)
    wh = wh.at[:HIDDEN_DIM, :LATENT_DIM].set(wmu)
    wh = wh.at[:HIDDEN_DIM, LATENT_DIM:2 * LATENT_DIM].set(wlv)
    bh = jnp.zeros((1, HEAD_PAD), jnp.float32)
    bh = bh.at[0, :LATENT_DIM].set(bmu)
    bh = bh.at[0, LATENT_DIM:2 * LATENT_DIM].set(blv)

    return (w1_p.astype(jnp.bfloat16), b1_p,
            wh.astype(jnp.bfloat16), bh)


def reference_forward(x, params):
    """Pure-JAX reference mirroring the kernel's bf16 quantization with f32 accum."""
    w1, b1, wh, bh = params
    xb = x.astype(jnp.bfloat16).astype(jnp.float32)
    h = jnp.maximum(xb @ w1.astype(jnp.float32) + b1, 0.0)
    hb = h.astype(jnp.bfloat16).astype(jnp.float32)
    y = hb @ wh.astype(jnp.float32) + bh
    return y[:, :LATENT_DIM], y[:, LATENT_DIM:2 * LATENT_DIM]


if __name__ == "__main__":
    key = jax.random.PRNGKey(0)
    kx, kp = jax.random.split(key)

    B = 8
    x = jax.random.normal(kx, (B, INPUT_DIM), jnp.float32)
    params = init_params(kp)

    mu, logvar = jax.block_until_ready(encoder_forward(x, params))

    mu_ref, logvar_ref = reference_forward(x, params)
    assert mu.shape == (B, LATENT_DIM) and logvar.shape == (B, LATENT_DIM)
    assert jnp.allclose(mu, mu_ref, atol=1e-2, rtol=1e-2)
    assert jnp.allclose(logvar, logvar_ref, atol=1e-2, rtol=1e-2)

    print("KERNEL_OK")
</pallas_src>

<mosaic_0001>
module attributes {stable_mosaic.version = 11 : i64} {
  func.func @encoder_kernel(%arg0: i32, %arg1: memref<128x784xbf16, #tpu.memory_space<vmem>>, %arg2: memref<784x512xbf16, #tpu.memory_space<vmem>>, %arg3: memref<1x512xf32, #tpu.memory_space<vmem>>, %arg4: memref<512x128xbf16, #tpu.memory_space<vmem>>, %arg5: memref<1x128xf32, #tpu.memory_space<vmem>>, %arg6: memref<128x128xf32, #tpu.memory_space<vmem>>) attributes {dimension_semantics = [#tpu.dimension_semantics<parallel>], iteration_bounds = array<i64: 1>, scalar_prefetch = 0 : i64, scratch_operands = 0 : i64, tpu.core_type = #tpu.core_type<tc>, window_params = [{transform_indices = @transform_0, window_bounds = array<i64: 128, 784>}, {pipeline_mode = #tpu.pipeline_mode<synchronous>, transform_indices = @transform_1, window_bounds = array<i64: 784, 512>}, {pipeline_mode = #tpu.pipeline_mode<synchronous>, transform_indices = @transform_2, window_bounds = array<i64: 1, 512>}, {pipeline_mode = #tpu.pipeline_mode<synchronous>, transform_indices = @transform_3, window_bounds = array<i64: 512, 128>}, {pipeline_mode = #tpu.pipeline_mode<synchronous>, transform_indices = @transform_4, window_bounds = array<i64: 1, 128>}, {transform_indices = @transform_5, window_bounds = array<i64: 128, 128>}]} {
    %c0 = arith.constant 0 : index
    %c0_0 = arith.constant 0 : index
    %0 = vector.load %arg1[%c0, %c0_0] : memref<128x784xbf16, #tpu.memory_space<vmem>>, vector<128x784xbf16>
    %c0_1 = arith.constant 0 : index
    %c0_2 = arith.constant 0 : index
    %1 = vector.load %arg2[%c0_1, %c0_2] : memref<784x512xbf16, #tpu.memory_space<vmem>>, vector<784x512xbf16>
    %cst = arith.constant dense<0.000000e+00> : vector<128x512xf32>
    %2 = tpu.matmul %0, %1, %cst {dimension_numbers = #tpu.dot_dimension_numbers<[1], [0], [0], [1], [0, 0, 1, 1], [], []>} : vector<128x784xbf16>, vector<784x512xbf16>, vector<128x512xf32> -> vector<128x512xf32>
    %c0_3 = arith.constant 0 : index
    %c0_4 = arith.constant 0 : index
    %3 = vector.load %arg3[%c0_3, %c0_4] : memref<1x512xf32, #tpu.memory_space<vmem>>, vector<1x512xf32>
    %4 = vector.broadcast %3 : vector<1x512xf32> to vector<128x512xf32>
    %5 = arith.addf %2, %4 : vector<128x512xf32>
    %cst_5 = arith.constant 0.000000e+00 : f32
    %6 = vector.broadcast %cst_5 : f32 to vector<128x512xf32>
    %7 = arith.maximumf %5, %6 : vector<128x512xf32>
    %8 = arith.truncf %7 : vector<128x512xf32> to vector<128x512xbf16>
    %c0_6 = arith.constant 0 : index
    %c0_7 = arith.constant 0 : index
    %9 = vector.load %arg4[%c0_6, %c0_7] : memref<512x128xbf16, #tpu.memory_space<vmem>>, vector<512x128xbf16>
    %cst_8 = arith.constant dense<0.000000e+00> : vector<128x128xf32>
    %10 = tpu.matmul %8, %9, %cst_8 {dimension_numbers = #tpu.dot_dimension_numbers<[1], [0], [0], [1], [0, 0, 1, 1], [], []>} : vector<128x512xbf16>, vector<512x128xbf16>, vector<128x128xf32> -> vector<128x128xf32>
    %c0_9 = arith.constant 0 : index
    %c0_10 = arith.constant 0 : index
    %11 = vector.load %arg5[%c0_9, %c0_10] : memref<1x128xf32, #tpu.memory_space<vmem>>, vector<1x128xf32>
    %12 = vector.broadcast %11 : vector<1x128xf32> to vector<128x128xf32>
    %13 = arith.addf %10, %12 : vector<128x128xf32>
    %c0_11 = arith.constant 0 : index
    %c0_12 = arith.constant 0 : index
    %14 = vector.load %arg6[%c0_11, %c0_12] : memref<128x128xf32, #tpu.memory_space<vmem>>, vector<128x128xf32>
    tpu.vector_store %arg6[%c0_11, %c0_12], %13 {strides = array<i32>} : memref<128x128xf32, #tpu.memory_space<vmem>>, vector<128x128xf32>,
    return
  }
  func.func @transform_0(%arg0: i32) -> (i32, i32) {
    %c0_i32 = arith.constant 0 : i32
    %c0_i32_0 = arith.constant 0 : i32
    return %arg0, %c0_i32 : i32, i32
  }
  func.func @transform_1(%arg0: i32) -> (i32, i32) {
    %c0_i32 = arith.constant 0 : i32
    %c0_i32_0 = arith.constant 0 : i32
    %c0_i32_1 = arith.constant 0 : i32
    return %c0_i32, %c0_i32_0 : i32, i32
  }
  func.func @transform_2(%arg0: i32) -> (i32, i32) {
    %c0_i32 = arith.constant 0 : i32
    %c0_i32_0 = arith.constant 0 : i32
    %c0_i32_1 = arith.constant 0 : i32
    return %c0_i32, %c0_i32_0 : i32, i32
  }
  func.func @transform_3(%arg0: i32) -> (i32, i32) {
    %c0_i32 = arith.constant 0 : i32
    %c0_i32_0 = arith.constant 0 : i32
    %c0_i32_1 = arith.constant 0 : i32
    return %c0_i32, %c0_i32_0 : i32, i32
  }
  func.func @transform_4(%arg0: i32) -> (i32, i32) {
    %c0_i32 = arith.constant 0 : i32
    %c0_i32_0 = arith.constant 0 : i32
    %c0_i32_1 = arith.constant 0 : i32
    return %c0_i32, %c0_i32_0 : i32, i32
  }
  func.func @transform_5(%arg0: i32) -> (i32, i32) {
    %c0_i32 = arith.constant 0 : i32
    %c0_i32_0 = arith.constant 0 : i32
    return %arg0, %c0_i32 : i32, i32
  }
}

</mosaic_0001>

<bundles_post_ra>
// kernel: tpu_custom_call.1
= control target key start
LH: loop header
LB: loop body
LE: loop exit
PB: predicated region body
PF: predicated region fallthrough
CT: control target
= control target key end

     0   :  { %10 = vsyncpa [#allocation3], 0  ;;  %s6385_s0 = inlined_call_operand.vmem [shape: bf16[128,784], index: 0, kind: input, shape index: {}]   ;;  %s6386_s1 = inlined_call_operand.hbm [shape: bf16[784,512], index: 1, kind: input, shape index: {}]   ;;  %s6387_s2 = inlined_call_operand.vmem [shape: f32[1,512], index: 2, kind: input, shape index: {}]   ;;  %s6388_s3 = inlined_call_operand.vmem [shape: bf16[512,128], index: 3, kind: input, shape index: {}]   ;;  %s6389_s4 = inlined_call_operand.vmem [shape: f32[1,128], index: 4, kind: input, shape index: {}]   ;;  %s6390_s5 = inlined_call_operand.hbm [shape: f32[128,128], index: 5, kind: output, shape index: {}]  }
   0x1   :  { %11 = vsyncpa [#allocation4], 0  ;;  %s18_s20 = sshll.u32 %s6386_s1, 4  ;;  %s5065_s21 = smov [#allocation2]   ;;  %s19_s20 = int_to_ptr.hbm [resolvable:$true] %s18_s20 }
   0x2   :  { %s20_s22 = sshll.u32 %s5065_s21, 4  ;;  %s5066_s23 = smov 256   ;;  %s21_s22 = int_to_ptr.vmem [resolvable:$true] %s20_s22 }
   0x3   :  { %s5067_s24 = smov 16  }
   0x4   :  { %26 = dma.hbm_to_vmem [thread:$0]  %s19_s20, 25088, %s21_s22, [#allocation3], %s5066_s23, %s5066_s23, %s5067_s24  }
   0x5   :  { %5061 = dma.done.wait [#allocation3], 25088  }
   0x6   :  { %5062 = vsyncadd [#allocation3], 4294942208  ;;  %v3890_v0 = vld [vmem:[#allocation2 + $0xe0] sm:$0xf]  ;;  %v4806_v1 = vld [vmem:[#allocation2 + $0xec] sm:$0xf0] }
   0x7   :  { %v4018_v2 = vld [vmem:[#allocation2 + $0x1e0] sm:$0xf]  ;;  %v3891_v3 = vor.u32 %v4806_v1, %v3890_v0  ;;  %v4838_v4 = vld [vmem:[#allocation2 + $0x1ec] sm:$0xf0]  ;;  %vm1568_vm0 = vcmask 130048   ;;  %s3539_s30 = sshll.u32 %s6390_s5, 4  ;;  %s3540_s30 = int_to_ptr.hbm [resolvable:$true] %s3539_s30 }
   0x8   :  { %v4146_v5 = vld [vmem:[#allocation2 + $0x2e0] sm:$0xf]  ;;  %v4870_v6 = vld [vmem:[#allocation2 + $0x2ec] sm:$0xf0]  ;;  %v4019_v7 = vor.u32 %v4838_v4, %v4018_v2  ;;  %s5069_s6 = smov 128   ;;  %s5070_s7 = smov 8  }
   0x9   :  { %v4147_v8 = vor.u32 %v4870_v6, %v4146_v5  ;;  %v4274_v9 = vld [vmem:[#allocation2 + $0x3e0] sm:$0xf]  ;;  %v4902_v10 = vld [vmem:[#allocation2 + $0x3ec] sm:$0xf0]  ;;  %1593 = vmatpush.bf16.msra.mxu0 %v3891_v3 }
   0xa   :  { %v3874_v11 = vld [vmem:[#allocation2 + $0xc0] sm:$0xf]  ;;  %v4275_v12 = vor.u32 %v4902_v10, %v4274_v9  ;;  %v4802_v13 = vld [vmem:[#allocation2 + $0xcc] sm:$0xf0]  ;;  %1642 = vmatpush.bf16.msra.mxu1 %v4019_v7 }
   0xb   :  { %v4002_v14 = vld [vmem:[#allocation2 + $0x1c0] sm:$0xf]  ;;  %v4834_v15 = vld [vmem:[#allocation2 + $0x1cc] sm:$0xf0]  ;;  %1691 = vmatpush.bf16.msra.mxu2 %v4147_v8  ;;  %v3875_v16 = vor.u32 %v4802_v13, %v3874_v11 }
   0xc   :  { %v4003_v17 = vor.u32 %v4834_v15, %v4002_v14  ;;  %v4130_v18 = vld [vmem:[#allocation2 + $0x2c0] sm:$0xf]  ;;  %v4866_v19 = vld [vmem:[#allocation2 + $0x2cc] sm:$0xf0]  ;;  %1740 = vmatpush.bf16.msra.mxu3 %v4275_v12 }
   0xd   :  { %v4258_v20 = vld [vmem:[#allocation2 + $0x3c0] sm:$0xf]  ;;  %v4131_v21 = vor.u32 %v4866_v19, %v4130_v18  ;;  %v4898_v22 = vld [vmem:[#allocation2 + $0x3cc] sm:$0xf0]  ;;  %1594 = vmatpush.bf16.msra.mxu0 %v3875_v16 }
   0xe   :  { %v3858_v23 = vld [vmem:[#allocation2 + $0xa0] sm:$0xf]  ;;  %v4798_v24 = vld [vmem:[#allocation2 + $0xac] sm:$0xf0]  ;;  %v4259_v25 = vor.u32 %v4898_v22, %v4258_v20  ;;  %1643 = vmatpush.bf16.msra.mxu1 %v4003_v17 }
   0xf   :  { %v3986_v26 = vld [vmem:[#allocation2 + $0x1a0] sm:$0xf]  ;;  %v4830_v27 = vld [vmem:[#allocation2 + $0x1ac] sm:$0xf0]  ;;  %v3859_v29 = vor.u32 %v4798_v24, %v3858_v23  ;;  %1692 = vmatpush.bf16.msra.mxu2 %v4131_v21 }
  0x10   :  { %v4114_v28 = vld [vmem:[#allocation2 + $0x2a0] sm:$0xf]  ;;  %v4862_v30 = vld [vmem:[#allocation2 + $0x2ac] sm:$0xf0]  ;;  %v3987_v33 = vor.u32 %v4830_v27, %v3986_v26  ;;  %1741 = vmatpush.bf16.msra.mxu3 %v4259_v25 }
  0x11   :  { %v4242_v31 = vld [vmem:[#allocation2 + $0x3a0] sm:$0xf]  ;;  %v4894_v32 = vld [vmem:[#allocation2 + $0x3ac] sm:$0xf0]  ;;  %v4115_v34 = vor.u32 %v4862_v30, %v4114_v28  ;;  %1595 = vmatpush.bf16.msra.mxu0 %v3859_v29  ;;  %v4723_v29 = vld [vmem:[%s6385_s0 + $0x18] sm:$0xf0] }
  0x12   :  { %v3842_v35 = vld [vmem:[#allocation2 + $0x80] sm:$0xf]  ;;  %v4794_v36 = vld [vmem:[#allocation2 + $0x8c] sm:$0xf0]  ;;  %v4243_v38 = vor.u32 %v4894_v32, %v4242_v31  ;;  %1644 = vmatpush.bf16.msra.mxu1 %v3987_v33  ;;  %v4720_v30 = vld [vmem:[%s6385_s0 + $0x4] sm:$0xf] }
  0x13   :  { %v3970_v37 = vld [vmem:[#allocation2 + $0x180] sm:$0xf]  ;;  %v4826_v39 = vld [vmem:[#allocation2 + $0x18c] sm:$0xf0]  ;;  %v3843_v44 = vor.u32 %v4794_v36, %v3842_v35  ;;  %1693 = vmatpush.bf16.msra.mxu2 %v4115_v34  ;;  %v4804_v35 = vld [vmem:[#allocation2 + $0xe4] sm:$0xf] }
  0x14   :  { %v4098_v40 = vld [vmem:[#allocation2 + $0x280] sm:$0xf]  ;;  %v4858_v41 = vld [vmem:[#allocation2 + $0x28c] sm:$0xf0]  ;;  %v3971_v45 = vor.u32 %v4826_v39, %v3970_v37  ;;  %1742 = vmatpush.bf16.msra.mxu3 %v4243_v38  ;;  %v3892_v36 = vld [vmem:[#allocation2 + $0xf0] sm:$0xf0] }
  0x15   :  { %v4226_v42 = vld [vmem:[#allocation2 + $0x380] sm:$0xf]  ;;  %v4890_v43 = vld [vmem:[#allocation2 + $0x38c] sm:$0xf0]  ;;  %v4099_v46 = vor.u32 %v4858_v41, %v4098_v40  ;;  %1596 = vmatpush.bf16.msra.mxu0 %v3843_v44  ;;  %v3562_v39 = vld [vmem:[%s6385_s0 + $0x8] sm:$0xf] }
  0x16   :  { %v3826_v47 = vld [vmem:[#allocation2 + $0x60] sm:$0xf]  ;;  %v4790_v48 = vld [vmem:[#allocation2 + $0x6c] sm:$0xf0]  ;;  %v4227_v50 = vor.u32 %v4890_v43, %v4226_v42  ;;  %1645 = vmatpush.bf16.msra.mxu1 %v3971_v45  ;;  %v4724_v40 = vld [vmem:[%s6385_s0 + $0x20] sm:$0xf0] }
  0x17   :  { %v3954_v49 = vld [vmem:[#allocation2 + $0x160] sm:$0xf]  ;;  %v4822_v51 = vld [vmem:[#allocation2 + $0x16c] sm:$0xf0]  ;;  %v3827_v56 = vor.u32 %v4790_v48, %v3826_v47  ;;  %1694 = vmatpush.bf16.msra.mxu2 %v4099_v46  ;;  %v4721_v41 = vld [vmem:[%s6385_s0 + $0xc] sm:$0xf]  ;;  %v3895_v48 = vor.u32 %v4804_v35, %v3892_v36 }
  0x18   :  { %v4082_v52 = vld [vmem:[#allocation2 + $0x260] sm:$0xf]  ;;  %v4854_v53 = vld [vmem:[#allocation2 + $0x26c] sm:$0xf0]  ;;  %v3955_v57 = vor.u32 %v4822_v51, %v3954_v49  ;;  %1743 = vmatpush.bf16.msra.mxu3 %v4227_v50  ;;  %v3564_v43 = vld [vmem:[%s6385_s0 + $0x24] sm:$0xf0] }
  0x19   :  { %v4210_v54 = vld [vmem:[#allocation2 + $0x360] sm:$0xf]  ;;  %v4886_v55 = vld [vmem:[#allocation2 + $0x36c] sm:$0xf0]  ;;  %v4083_v58 = vor.u32 %v4854_v53, %v4082_v52  ;;  %1597 = vmatpush.bf16.msra.mxu0 %v3827_v56  ;;  %v5132_v52 = vor.u32 %v4724_v40, %v3562_v39  ;;  %v4800_v53 = vld [vmem:[#allocation2 + $0xc4] sm:$0xf] }
  0x1a   :  { %v3810_v59 = vld [vmem:[#allocation2 + $0x40] sm:$0xf]  ;;  %v4786_v60 = vld [vmem:[#allocation2 + $0x4c] sm:$0xf0]  ;;  %v4211_v62 = vor.u32 %v4886_v55, %v4210_v54  ;;  %1646 = vmatpush.bf16.msra.mxu1 %v3955_v57  ;;  %v3876_v54 = vld [vmem:[#allocation2 + $0xd0] sm:$0xf0]  ;;  %v5134_v55 = vor.u32 %v4721_v41, %v3564_v43 }
  0x1b   :  { %v3938_v61 = vld [vmem:[#allocation2 + $0x140] sm:$0xf]  ;;  %v4818_v63 = vld [vmem:[#allocation2 + $0x14c] sm:$0xf0]  ;;  %v3811_v4 = vor.u32 %v4786_v60, %v3810_v59  ;;  %1695 = vmatpush.bf16.msra.mxu2 %v4083_v58  ;;  %v3879_v60 = vor.u32 %v4800_v53, %v3876_v54  ;;  %v3618_v35 = vld [vmem:[%s6385_s0 + $0x78] sm:$0xf] }
  0x1c   :  { %v4066_v0 = vld [vmem:[#allocation2 + $0x240] sm:$0xf]  ;;  %v4850_v1 = vld [vmem:[#allocation2 + $0x24c] sm:$0xf0]  ;;  %v3939_v5 = vor.u32 %v4818_v63, %v3938_v61  ;;  %1744 = vmatpush.bf16.msra.mxu3 %v4211_v62  ;;  %v4738_v36 = vld [vmem:[%s6385_s0 + $0x90] sm:$0xf0] }
  0x1d   :  { %v4194_v2 = vld [vmem:[#allocation2 + $0x340] sm:$0xf]  ;;  %v4882_v3 = vld [vmem:[#allocation2 + $0x34c] sm:$0xf0]  ;;  %v4067_v6 = vor.u32 %v4850_v1, %v4066_v0  ;;  %1598 = vmatpush.bf16.msra.mxu0 %v3811_v4  ;;  %v4796_v0 = vld [vmem:[#allocation2 + $0xa4] sm:$0xf]  ;;  %v5204_v41 = vor.u32 %v4738_v36, %v3618_v35 }
  0x1e   :  { %v3794_v7 = vld [vmem:[#allocation2 + $0x20] sm:$0xf]  ;;  %v4782_v8 = vld [vmem:[#allocation2 + $0x2c] sm:$0xf0]  ;;  %v4195_v10 = vor.u32 %v4882_v3, %v4194_v2  ;;  %1647 = vmatpush.bf16.msra.mxu1 %v3939_v5  ;;  %v3860_v4 = vld [vmem:[#allocation2 + $0xb0] sm:$0xf0] }
  0x1f   :  { %v3922_v9 = vld [vmem:[#allocation2 + $0x120] sm:$0xf]  ;;  %v4814_v11 = vld [vmem:[#allocation2 + $0x12c] sm:$0xf0]  ;;  %v3795_v17 = vor.u32 %v4782_v8, %v3794_v7  ;;  %1696 = vmatpush.bf16.msra.mxu2 %v4067_v6  ;;  %v3863_v5 = vor.u32 %v4796_v0, %v3860_v4 }
  0x20   :  { %v4050_v12 = vld [vmem:[#allocation2 + $0x220] sm:$0xf]  ;;  %v4846_v13 = vld [vmem:[#allocation2 + $0x22c] sm:$0xf0]  ;;  %v3923_v21 = vor.u32 %v4814_v11, %v3922_v9  ;;  %1745 = vmatpush.bf16.msra.mxu3 %v4195_v10  ;;  %v3582_v10 = vld [vmem:[%s6385_s0 + $0x38] sm:$0xf] }
  0x21   :  { %v4178_v14 = vld [vmem:[#allocation2 + $0x320] sm:$0xf]  ;;  %v4878_v15 = vld [vmem:[#allocation2 + $0x32c] sm:$0xf0]  ;;  %v4051_v22 = vor.u32 %v4846_v13, %v4050_v12  ;;  %1599 = vmatpush.bf16.msra.mxu0 %v3795_v17  ;;  %v4730_v11 = vld [vmem:[%s6385_s0 + $0x50] sm:$0xf0] }
  0x22   :  { %v3778_v16 = vld [vmem:[#allocation2] sm:$0xf]  ;;  %v4778_v18 = vld [vmem:[#allocation2 + $0xc] sm:$0xf0]  ;;  %v4179_v26 = vor.u32 %v4878_v15, %v4178_v14  ;;  %1648 = vmatpush.bf16.msra.mxu1 %v3923_v21  ;;  %v4727_v12 = vld [vmem:[%s6385_s0 + $0x3c] sm:$0xf] }
  0x23   :  { %v3906_v19 = vld [vmem:[#allocation2 + $0x100] sm:$0xf]  ;;  %v4810_v20 = vld [vmem:[#allocation2 + $0x10c] sm:$0xf0]  ;;  %v3779_v33 = vor.u32 %v4778_v18, %v3778_v16  ;;  %1697 = vmatpush.bf16.msra.mxu2 %v4051_v22  ;;  %v3584_v13 = vld [vmem:[%s6385_s0 + $0x54] sm:$0xf0]  ;;  %v5164_v18 = vor.u32 %v4730_v11, %v3582_v10 }
  0x24   :  { %v4034_v23 = vld [vmem:[#allocation2 + $0x200] sm:$0xf]  ;;  %v4842_v24 = vld [vmem:[#allocation2 + $0x20c] sm:$0xf0]  ;;  %v3907_v37 = vor.u32 %v4810_v20, %v3906_v19  ;;  %1746 = vmatpush.bf16.msra.mxu3 %v4179_v26  ;;  %v4731_v15 = vld [vmem:[%s6385_s0 + $0x58] sm:$0xf0]  ;;  %v5166_v19 = vor.u32 %v4727_v12, %v3584_v13 }
  0x25   :  { %v4162_v25 = vld [vmem:[#allocation2 + $0x300] sm:$0xf]  ;;  %v4874_v27 = vld [vmem:[#allocation2 + $0x30c] sm:$0xf0]  ;;  %v4035_v38 = vor.u32 %v4842_v24, %v4034_v23  ;;  %1600 = vmatpush.bf16.msra.mxu0 %v3779_v33  ;;  %v4728_v16 = vld [vmem:[%s6385_s0 + $0x44] sm:$0xf] }
  0x26   :  { %v3554_v28 = vld [vmem:[%s6385_s0] sm:$0xf]  ;;  %v4970_v32 = vld [vmem:[#allocation2 + $0x60c] sm:$0xf0]  ;;  %v4163_v42 = vor.u32 %v4874_v27, %v4162_v25  ;;  %1649 = vmatpush.bf16.msra.mxu1 %v3907_v37  ;;  %6463 = vst [vmem:[#allocation10_spill] sm:$0xff] %v5164_v18 }
  0x27   :  { %v4546_v31 = vld [vmem:[#allocation2 + $0x600] sm:$0xf]  ;;  %v4934_v46 = vld [vmem:[#allocation2 + $0x4ec] sm:$0xf0]  ;;  %v5128_v47 = vor.u32 %v4723_v29, %v3554_v28  ;;  %1698 = vmatpush.bf16.msra.mxu2 %v4035_v38  ;;  %6464 = vst [vmem:[#allocation11_spill] sm:$0xff] %v5166_v19 }
  0x28   :  { %v3556_v34 = vld [vmem:[%s6385_s0 + $0x1c] sm:$0xf0]  ;;  %v4547_v44 = vor.u32 %v4970_v32, %v4546_v31  ;;  %v4966_v50 = vld [vmem:[#allocation2 + $0x5ec] sm:$0xf0]  ;;  %1747 = vmatpush.bf16.msra.mxu3 %v4163_v42  ;;  %v4792_v24 = vld [vmem:[#allocation2 + $0x84] sm:$0xf] }
  0x29   :  { %v4402_v45 = vld [vmem:[#allocation2 + $0x4e0] sm:$0xf]  ;;  %6461 = vst [vmem:[#allocation8_spill] sm:$0xff] %v5128_v47  ;;  %v5130_v51 = vor.u32 %v4720_v30, %v3556_v34  ;;  %v4930_v59 = vld [vmem:[#allocation2 + $0x4cc] sm:$0xf0]  ;;  %1601 = vmatmul.bf16.vlgmr.msra.gmra.mxu0 %v5128_v47 }
  0x2a   :  { %v4530_v49 = vld [vmem:[#allocation2 + $0x5e0] sm:$0xf]  ;;  %v4403_v56 = vor.u32 %v4934_v46, %v4402_v45  ;;  %v4962_v62 = vld [vmem:[#allocation2 + $0x5cc] sm:$0xf0]  ;;  %1699 = vmatmul.bf16.vlgmr.msra.gmra.mxu2 %v5132_v52  ;;  %v3844_v26 = vld [vmem:[#allocation2 + $0x90] sm:$0xf0] }
  0x2b   :  { %6462 = vst [vmem:[#allocation9_spill] sm:$0xff] %v5130_v51  ;;  %1894 = vmatpush.bf16.msrb.mxu2 %v4547_v44  ;;  %v4531_v57 = vor.u32 %v4966_v50, %v4530_v49  ;;  %v4386_v58 = vld [vmem:[#allocation2 + $0x4c0] sm:$0xf]  ;;  %1650 = vmatmul.bf16.vlgmr.msra.gmra.mxu1 %v5130_v51  ;;  %v4926_v3 = vld [vmem:[#allocation2 + $0x4ac] sm:$0xf0]  ;;  %v3847_v29 = vor.u32 %v4792_v24, %v3844_v26 }
  0x2c   :  { %1936 = vmatpush.bf16.msrb.mxu3 %v3895_v48  ;;  %v4514_v61 = vld [vmem:[#allocation2 + $0x5c0] sm:$0xf]  ;;  %1789 = vmatpush.bf16.msrb.mxu0 %v4403_v56  ;;  %v4387_v63 = vor.u32 %v4930_v59, %v4386_v58  ;;  %v4958_v7 = vld [vmem:[#allocation2 + $0x5ac] sm:$0xf0]  ;;  %v4737_v32 = vld [vmem:[%s6385_s0 + $0x88] sm:$0xf0] }
  0x2d   :  { %1748 = vmatmul.bf16.vlgmr.msra.gmra.mxu3 %v5134_v55  ;;  %1838 = vmatpush.bf16.msrb.mxu1 %v4531_v57  ;;  %v4515_v1 = vor.u32 %v4962_v62, %v4514_v61  ;;  %v4370_v2 = vld [vmem:[#allocation2 + $0x4a0] sm:$0xf]  ;;  %v4922_v23 = vld [vmem:[#allocation2 + $0x48c] sm:$0xf0]  ;;  %v4734_v33 = vld [vmem:[%s6385_s0 + $0x74] sm:$0xf] }
  0x2e   :  { %v4498_v6 = vld [vmem:[#allocation2 + $0x5a0] sm:$0xf]  ;;  %v4371_v8 = vor.u32 %v4926_v3, %v4370_v2  ;;  %v4954_v28 = vld [vmem:[#allocation2 + $0x58c] sm:$0xf0]  ;;  %v4735_v37 = vld [vmem:[%s6385_s0 + $0x7c] sm:$0xf] }
  0x2f   :  { %v4499_v9 = vor.u32 %v4958_v7, %v4498_v6  ;;  %v3590_v14 = vld [vmem:[%s6385_s0 + $0x40] sm:$0xf]  ;;  %v3610_v31 = vld [vmem:[%s6385_s0 + $0x70] sm:$0xf]  ;;  %v3620_v38 = vld [vmem:[%s6385_s0 + $0x94] sm:$0xf0] }
  0x30   :  { %1937 = vmatpush.bf16.msrb.mxu3 %v3879_v60  ;;  %1790 = vmatpush.bf16.msrb.mxu0 %v4387_v63  ;;  %v3592_v17 = vld [vmem:[%s6385_s0 + $0x5c] sm:$0xf0]  ;;  %v5168_v20 = vor.u32 %v4731_v15, %v3590_v14  ;;  %v3612_v34 = vld [vmem:[%s6385_s0 + $0x8c] sm:$0xf0]  ;;  %v5200_v39 = vor.u32 %v4737_v32, %v3610_v31  ;;  %v5206_v42 = vor.u32 %v4735_v37, %v3620_v38  ;;  %v4788_v45 = vld [vmem:[#allocation2 + $0x64] sm:$0xf] }
  0x31   :  { %1839 = vmatpush.bf16.msrb.mxu1 %v4515_v1  ;;  %v5170_v21 = vor.u32 %v4728_v16, %v3592_v17  ;;  %v4354_v22 = vld [vmem:[#allocation2 + $0x480] sm:$0xf]  ;;  %v5202_v40 = vor.u32 %v4734_v33, %v3612_v34  ;;  %v4918_v44 = vld [vmem:[#allocation2 + $0x46c] sm:$0xf0]  ;;  %v3828_v48 = vld [vmem:[#allocation2 + $0x70] sm:$0xf0] }
  0x32   :  { %v4355_v25 = vor.u32 %v4922_v23, %v4354_v22  ;;  %v4482_v27 = vld [vmem:[#allocation2 + $0x580] sm:$0xf]  ;;  %6465 = vst [vmem:[#allocation12_spill] sm:$0xff] %v5200_v39  ;;  %v4950_v50 = vld [vmem:[#allocation2 + $0x56c] sm:$0xf0]  ;;  %v3831_v53 = vor.u32 %v4788_v45, %v3828_v48 }
  0x33   :  { %v4483_v30 = vor.u32 %v4954_v28, %v4482_v27  ;;  %6466 = vst [vmem:[#allocation13_spill] sm:$0xff] %v5202_v40  ;;  %v4338_v43 = vld [vmem:[#allocation2 + $0x460] sm:$0xf]  ;;  %v3638_v56 = vld [vmem:[%s6385_s0 + $0xa8] sm:$0xf] }
  0x34   :  { %1938 = vmatpush.bf16.msrb.mxu3 %v3863_v5  ;;  %1791 = vmatpush.bf16.msrb.mxu0 %v4371_v8  ;;  %v4339_v46 = vor.u32 %v4918_v44, %v4338_v43  ;;  %v4466_v49 = vld [vmem:[#allocation2 + $0x560] sm:$0xf]  ;;  %v4744_v57 = vld [vmem:[%s6385_s0 + $0xc0] sm:$0xf0]  ;;  %v4741_v58 = vld [vmem:[%s6385_s0 + $0xac] sm:$0xf] }
  0x35   :  { %1840 = vmatpush.bf16.msrb.mxu1 %v4499_v9  ;;  %v4467_v54 = vor.u32 %v4950_v50, %v4466_v49  ;;  %v3640_v59 = vld [vmem:[%s6385_s0 + $0xc4] sm:$0xf0]  ;;  %v3646_v60 = vld [vmem:[%s6385_s0 + $0xb0] sm:$0xf]  ;;  %v4745_v61 = vld [vmem:[%s6385_s0 + $0xc8] sm:$0xf0]  ;;  %v5236_v0 = vor.u32 %v4744_v57, %v3638_v56 }
  0x36   :  { %v4742_v62 = vld [vmem:[%s6385_s0 + $0xb4] sm:$0xf]  ;;  %v3648_v63 = vld [vmem:[%s6385_s0 + $0xcc] sm:$0xf0]  ;;  %v5238_v1 = vor.u32 %v4741_v58, %v3640_v59  ;;  %v5240_v2 = vor.u32 %v4745_v61, %v3646_v60  ;;  %v4322_v4 = vld [vmem:[#allocation2 + $0x440] sm:$0xf] }
  0x37   :  { %6467 = vst [vmem:[#allocation14_spill] sm:$0xff] %v5236_v0  ;;  %v5242_v3 = vor.u32 %v4742_v62, %v3648_v63  ;;  %v4914_v5 = vld [vmem:[#allocation2 + $0x44c] sm:$0xf0]  ;;  %v4784_v6 = vld [vmem:[#allocation2 + $0x44] sm:$0xf] }
  0x38   :  { %1792 = vmatpush.bf16.msrb.mxu0 %v4355_v25  ;;  %1939 = vmatpush.bf16.msrb.mxu3 %v3847_v29  ;;  %6468 = vst [vmem:[#allocation15_spill] sm:$0xff] %v5238_v1  ;;  %v4323_v7 = vor.u32 %v4914_v5, %v4322_v4  ;;  %v3812_v8 = vld [vmem:[#allocation2 + $0x50] sm:$0xf0]  ;;  %v4450_v9 = vld [vmem:[#allocation2 + $0x540] sm:$0xf] }
  0x39   :  { %1606 = vmatmul.bf16.gmra.mxu0 %v5164_v18  ;;  %1841 = vmatpush.bf16.msrb.mxu1 %v4483_v30  ;;  %v4946_v10 = vld [vmem:[#allocation2 + $0x54c] sm:$0xf0]  ;;  %v3815_v11 = vor.u32 %v4784_v6, %v3812_v8  ;;  %v3666_v13 = vld [vmem:[%s6385_s0 + $0xe0] sm:$0xf]  ;;  %v4751_v14 = vld [vmem:[%s6385_s0 + $0xf8] sm:$0xf0] }
  0x3a   :  { %1704 = vmatmul.bf16.gmra.mxu2 %v5168_v20  ;;  %v4451_v12 = vor.u32 %v4946_v10, %v4450_v9  ;;  %v4748_v15 = vld [vmem:[%s6385_s0 + $0xe4] sm:$0xf]  ;;  %v3668_v16 = vld [vmem:[%s6385_s0 + $0xfc] sm:$0xf0]  ;;  %v3674_v17 = vld [vmem:[%s6385_s0 + $0xe8] sm:$0xf]  ;;  %v5272_v25 = vor.u32 %v4751_v14, %v3666_v13 }
  0x3b   :  { %1655 = vmatmul.bf16.gmra.mxu1 %v5166_v19  ;;  %v4752_v22 = vld [vmem:[%s6385_s0 + $0x100] sm:$0xf0]  ;;  %v4749_v23 = vld [vmem:[%s6385_s0 + $0xec] sm:$0xf]  ;;  %v3676_v24 = vld [vmem:[%s6385_s0 + $0x104] sm:$0xf0]  ;;  %v5274_v26 = vor.u32 %v4748_v15, %v3668_v16 }
  0x3c   :  { %1793 = vmatpush.bf16.msrb.mxu0 %v4339_v46  ;;  %1940 = vmatpush.bf16.msrb.mxu3 %v3831_v53  ;;  %6469 = vst [vmem:[#allocation16_spill] sm:$0xff] %v5272_v25  ;;  %v5276_v27 = vor.u32 %v4752_v22, %v3674_v17  ;;  %v5278_v28 = vor.u32 %v4749_v23, %v3676_v24  ;;  %v4306_v29 = vld [vmem:[#allocation2 + $0x420] sm:$0xf]  ;;  %v4910_v30 = vld [vmem:[#allocation2 + $0x42c] sm:$0xf0] }
  0x3d   :  { %1753 = vmatmul.bf16.gmra.mxu3 %v5170_v21  ;;  %1842 = vmatpush.bf16.msrb.mxu1 %v4467_v54  ;;  %6470 = vst [vmem:[#allocation17_spill] sm:$0xff] %v5274_v26  ;;  %v4780_v31 = vld [vmem:[#allocation2 + $0x24] sm:$0xf]  ;;  %v4307_v32 = vor.u32 %v4910_v30, %v4306_v29  ;;  %v3796_v33 = vld [vmem:[#allocation2 + $0x30] sm:$0xf0] }
  0x3e   :  { %v4434_v34 = vld [vmem:[#allocation2 + $0x520] sm:$0xf]  ;;  %v4942_v35 = vld [vmem:[#allocation2 + $0x52c] sm:$0xf0]  ;;  %v3799_v36 = vor.u32 %v4780_v31, %v3796_v33  ;;  %v3694_v38 = vld [vmem:[%s6385_s0 + $0x118] sm:$0xf] }
  0x3f   :  { %v4435_v37 = vor.u32 %v4942_v35, %v4434_v34  ;;  %v4758_v43 = vld [vmem:[%s6385_s0 + $0x130] sm:$0xf0]  ;;  %v4755_v44 = vld [vmem:[%s6385_s0 + $0x11c] sm:$0xf]  ;;  %v3696_v45 = vld [vmem:[%s6385_s0 + $0x134] sm:$0xf0] }
  0x40   :  { %1794 = vmatpush.bf16.msrb.mxu0 %v4323_v7  ;;  %1941 = vmatpush.bf16.msrb.mxu3 %v3815_v11  ;;  %v3702_v46 = vld [vmem:[%s6385_s0 + $0x120] sm:$0xf]  ;;  %v4759_v48 = vld [vmem:[%s6385_s0 + $0x138] sm:$0xf0]  ;;  %v4756_v49 = vld [vmem:[%s6385_s0 + $0x124] sm:$0xf]  ;;  %v5308_v53 = vor.u32 %v4758_v43, %v3694_v38  ;;  %v5310_v54 = vor.u32 %v4755_v44, %v3696_v45 }
  0x41   :  { %1843 = vmatpush.bf16.msrb.mxu1 %v4451_v12  ;;  %v3704_v50 = vld [vmem:[%s6385_s0 + $0x13c] sm:$0xf0]  ;;  %v5312_v56 = vor.u32 %v4759_v48, %v3702_v46  ;;  %v4906_v59 = vld [vmem:[#allocation2 + $0x40c] sm:$0xf0]  ;;  %v4776_v60 = vld [vmem:[#allocation2 + $0x4] sm:$0xf] }
  0x42   :  { %6471 = vst [vmem:[#allocation18_spill] sm:$0xff] %v5308_v53  ;;  %v5314_v57 = vor.u32 %v4756_v49, %v3704_v50  ;;  %v4290_v58 = vld [vmem:[#allocation2 + $0x400] sm:$0xf]  ;;  %v3780_v62 = vld [vmem:[#allocation2 + $0x10] sm:$0xf0] }
  0x43   :  { %6472 = vst [vmem:[#allocation19_spill] sm:$0xff] %v5310_v54  ;;  %v4291_v61 = vor.u32 %v4906_v59, %v4290_v58  ;;  %v4418_v63 = vld [vmem:[#allocation2 + $0x500] sm:$0xf]  ;;  %v4938_v4 = vld [vmem:[#allocation2 + $0x50c] sm:$0xf0]  ;;  %v3783_v5 = vor.u32 %v4776_v60, %v3780_v62 }
  0x44   :  { %1795 = vmatpush.bf16.msrb.mxu0 %v4307_v32  ;;  %1942 = vmatpush.bf16.msrb.mxu3 %v3799_v36  ;;  %v4419_v6 = vor.u32 %v4938_v4, %v4418_v63  ;;  %v3722_v7 = vld [vmem:[%s6385_s0 + $0x150] sm:$0xf]  ;;  %v4765_v8 = vld [vmem:[%s6385_s0 + $0x168] sm:$0xf0]  ;;  %v4762_v9 = vld [vmem:[%s6385_s0 + $0x154] sm:$0xf] }
  0x45   :  { %1844 = vmatpush.bf16.msrb.mxu1 %v4435_v37  ;;  %v3724_v10 = vld [vmem:[%s6385_s0 + $0x16c] sm:$0xf0]  ;;  %v3730_v11 = vld [vmem:[%s6385_s0 + $0x158] sm:$0xf]  ;;  %v4766_v12 = vld [vmem:[%s6385_s0 + $0x170] sm:$0xf0]  ;;  %v5344_v15 = vor.u32 %v4765_v8, %v3722_v7 }
  0x46   :  { %v4763_v13 = vld [vmem:[%s6385_s0 + $0x15c] sm:$0xf]  ;;  %v3732_v14 = vld [vmem:[%s6385_s0 + $0x174] sm:$0xf0]  ;;  %v5346_v16 = vor.u32 %v4762_v9, %v3724_v10  ;;  %v5348_v17 = vor.u32 %v4766_v12, %v3730_v11  ;;  %v4900_v23 = vld [vmem:[#allocation2 + $0x3e4] sm:$0xf] }
  0x47   :  { %6473 = vst [vmem:[#allocation20_spill] sm:$0xff] %v5344_v15  ;;  %v5350_v22 = vor.u32 %v4763_v13, %v3732_v14  ;;  %v4276_v24 = vld [vmem:[#allocation2 + $0x3f0] sm:$0xf0]  ;;  %v4836_v29 = vld [vmem:[#allocation2 + $0x1e4] sm:$0xf] }
  0x48   :  { %1796 = vmatpush.bf16.msrb.mxu0 %v4291_v61  ;;  %1943 = vmatpush.bf16.msrb.mxu3 %v3783_v5  ;;  %6474 = vst [vmem:[#allocation21_spill] sm:$0xff] %v5346_v16  ;;  %v4279_v30 = vor.u32 %v4900_v23, %v4276_v24  ;;  %v4020_v31 = vld [vmem:[#allocation2 + $0x1f0] sm:$0xf0]  ;;  %v4932_v32 = vld [vmem:[#allocation2 + $0x4e4] sm:$0xf] }
  0x49   :  { %1611 = vmatmul.bf16.gmra.mxu0 %v5200_v39  ;;  %1845 = vmatpush.bf16.msrb.mxu1 %v4419_v6  ;;  %6475 = vst [vmem:[#allocation22_spill] sm:$0xff] %v5350_v22  ;;  %v4404_v33 = vld [vmem:[#allocation2 + $0x4f0] sm:$0xf0]  ;;  %v4023_v34 = vor.u32 %v4836_v29, %v4020_v31  ;;  %v4868_v36 = vld [vmem:[#allocation2 + $0x2e4] sm:$0xf] }
  0x4a   :  { %1709 = vmatmul.bf16.gmra.mxu2 %v5204_v41  ;;  %v4407_v35 = vor.u32 %v4932_v32, %v4404_v33  ;;  %v4148_v37 = vld [vmem:[#allocation2 + $0x2f0] sm:$0xf0]  ;;  %v3750_v43 = vld [vmem:[%s6385_s0 + $0x188] sm:$0xf]  ;;  %v4772_v44 = vld [vmem:[%s6385_s0 + $0x1a0] sm:$0xf0] }
  0x4b   :  { %1660 = vmatmul.bf16.gmra.mxu1 %v5202_v40  ;;  %2083 = vmatpush.bf16.msra.mxu2 %v4279_v30  ;;  %v4151_v38 = vor.u32 %v4868_v36, %v4148_v37  ;;  %v4769_v45 = vld [vmem:[%s6385_s0 + $0x18c] sm:$0xf]  ;;  %v3752_v46 = vld [vmem:[%s6385_s0 + $0x1a4] sm:$0xf0]  ;;  %v3758_v48 = vld [vmem:[%s6385_s0 + $0x190] sm:$0xf]  ;;  %v5380_v59 = vor.u32 %v4772_v44, %v3750_v43 }
  0x4c   :  { %1985 = vmatpush.bf16.msra.mxu0 %v4023_v34  ;;  %2132 = vmatpush.bf16.msra.mxu3 %v4407_v35  ;;  %v4773_v49 = vld [vmem:[%s6385_s0 + $0x1a8] sm:$0xf0]  ;;  %v4770_v50 = vld [vmem:[%s6385_s0 + $0x194] sm:$0xf]  ;;  %v3760_v58 = vld [vmem:[%s6385_s0 + $0x1ac] sm:$0xf0]  ;;  %v5382_v60 = vor.u32 %v4769_v45, %v3752_v46 }
  0x4d   :  { %1758 = vmatmul.bf16.gmra.mxu3 %v5206_v42  ;;  %2034 = vmatpush.bf16.msra.mxu1 %v4151_v38  ;;  %6476 = vst [vmem:[#allocation23_spill] sm:$0xff] %v5380_v59  ;;  %v5384_v61 = vor.u32 %v4773_v49, %v3758_v48  ;;  %v5386_v62 = vor.u32 %v4770_v50, %v3760_v58  ;;  %v4896_v63 = vld [vmem:[#allocation2 + $0x3c4] sm:$0xf]  ;;  %v4260_v4 = vld [vmem:[#allocation2 + $0x3d0] sm:$0xf0] }
  0x4e   :  { %6477 = vst [vmem:[#allocation24_spill] sm:$0xff] %v5382_v60  ;;  %v4832_v5 = vld [vmem:[#allocation2 + $0x1c4] sm:$0xf]  ;;  %v4263_v6 = vor.u32 %v4896_v63, %v4260_v4  ;;  %v4004_v7 = vld [vmem:[#allocation2 + $0x1d0] sm:$0xf0] }
  0x4f   :  { %6478 = vst [vmem:[#allocation25_spill] sm:$0xff] %v5384_v61  ;;  %v4928_v8 = vld [vmem:[#allocation2 + $0x4c4] sm:$0xf]  ;;  %v4388_v9 = vld [vmem:[#allocation2 + $0x4d0] sm:$0xf0]  ;;  %v4007_v10 = vor.u32 %v4832_v5, %v4004_v7 }
  0x50   :  { %6479 = vst [vmem:[#allocation26_spill] sm:$0xff] %v5386_v62  ;;  %v4391_v11 = vor.u32 %v4928_v8, %v4388_v9  ;;  %v298_v12 = vld [vmem:[%s6387_s2] sm:$0xf]  ;;  %2084 = vmatpush.bf16.msra.mxu2 %v4263_v6  ;;  %v4864_v13 = vld [vmem:[#allocation2 + $0x2c4] sm:$0xf] }
  0x51   :  { %1986 = vmatpush.bf16.msra.mxu0 %v4007_v10  ;;  %v4132_v14 = vld [vmem:[#allocation2 + $0x2d0] sm:$0xf0]  ;;  %v5395_v23 = vperm.slane %v298_v12, 0  ;;  %v3570_v29 = vld [vmem:[%s6385_s0 + $0x10] sm:$0xf] }
  0x52   :  { %2133 = vmatpush.bf16.msra.mxu3 %v4391_v11  ;;  %v4135_v24 = vor.u32 %v4864_v13, %v4132_v14  ;;  %v4725_v30 = vld [vmem:[%s6385_s0 + $0x28] sm:$0xf0]  ;;  %v4722_v31 = vld [vmem:[%s6385_s0 + $0x14] sm:$0xf]  ;;  %v3572_v32 = vld [vmem:[%s6385_s0 + $0x2c] sm:$0xf0] }
  0x53   :  { %v3578_v33 = vld [vmem:[%s6385_s0 + $0x18] sm:$0xf]  ;;  %v4726_v34 = vld [vmem:[%s6385_s0 + $0x30] sm:$0xf0]  ;;  %v5415_v35 = vor.u32 %v4725_v30, %v3570_v29  ;;  %v5417_v37 = vor.u32 %v4722_v31, %v3572_v32  ;;  %v4892_v46 = vld [vmem:[#allocation2 + $0x3a4] sm:$0xf] }
  0x54   :  { %2035 = vmatpush.bf16.msra.mxu1 %v4135_v24  ;;  %v5419_v38 = vor.u32 %v4726_v34, %v3578_v33  ;;  %v4244_v48 = vld [vmem:[#allocation2 + $0x3b0] sm:$0xf0]  ;;  %v4828_v49 = vld [vmem:[#allocation2 + $0x1a4] sm:$0xf]  ;;  %v3598_v31 = vld [vmem:[%s6385_s0 + $0x48] sm:$0xf] }
  0x55   :  { %6480 = vst [vmem:[#allocation27_spill] sm:$0xff] %v5417_v37  ;;  %v4247_v50 = vor.u32 %v4892_v46, %v4244_v48  ;;  %v3988_v58 = vld [vmem:[#allocation2 + $0x1b0] sm:$0xf0]  ;;  %v4924_v63 = vld [vmem:[#allocation2 + $0x4a4] sm:$0xf] }
  0x56   :  { %6481 = vst [vmem:[#allocation28_spill] sm:$0xff] %v5419_v38  ;;  %v4372_v4 = vld [vmem:[#allocation2 + $0x4b0] sm:$0xf0]  ;;  %v3991_v6 = vor.u32 %v4828_v49, %v3988_v58  ;;  %v4860_v14 = vld [vmem:[#allocation2 + $0x2a4] sm:$0xf] }
  0x57   :  { %v4375_v7 = vor.u32 %v4924_v63, %v4372_v4  ;;  %2085 = vmatpush.bf16.msra.mxu2 %v4247_v50  ;;  %v4116_v24 = vld [vmem:[#allocation2 + $0x2b0] sm:$0xf0]  ;;  %v4732_v32 = vld [vmem:[%s6385_s0 + $0x60] sm:$0xf0]  ;;  %v4729_v33 = vld [vmem:[%s6385_s0 + $0x4c] sm:$0xf] }
  0x58   :  { %1987 = vmatpush.bf16.msra.mxu0 %v3991_v6  ;;  %v4119_v30 = vor.u32 %v4860_v14, %v4116_v24  ;;  %v3600_v34 = vld [vmem:[%s6385_s0 + $0x64] sm:$0xf0]  ;;  %v4356_v14 = vld [vmem:[#allocation2 + $0x490] sm:$0xf0] }
  0x59   :  { %1616 = vmatmul.bf16.gmra.mxu0 %v5236_v0  ;;  %2134 = vmatpush.bf16.msra.mxu3 %v4375_v7  ;;  %v5450_v50 = vor.u32 %v4729_v33, %v3600_v34  ;;  %v4888_v7 = vld [vmem:[#allocation2 + $0x384] sm:$0xf] }
  0x5a   :  { %1714 = vmatmul.bf16.gmra.mxu2 %v5240_v2  ;;  %2036 = vmatpush.bf16.msra.mxu1 %v4119_v30 }
  0x5b   :  { %1665 = vmatmul.bf16.gmra.mxu1 %v5238_v1  ;;  %6482 = vst [vmem:[#allocation29_spill] sm:$0xff] %v5450_v50 }
  0x5d   :  { %1763 = vmatmul.bf16.gmra.mxu3 %v5242_v3 }
  0x69   :  { %1621 = vmatmul.bf16.gmra.mxu0 %v5272_v25 }
  0x6a   :  { %1719 = vmatmul.bf16.gmra.mxu2 %v5276_v27 }
  0x6b   :  { %1670 = vmatmul.bf16.gmra.mxu1 %v5274_v26 }
  0x6d   :  { %1768 = vmatmul.bf16.gmra.mxu3 %v5278_v28 }
  0x79   :  { %1626 = vmatmul.bf16.gmra.mxu0 %v5308_v53 }
  0x7a   :  { %1724 = vmatmul.bf16.gmra.mxu2 %v5312_v56 }
  0x7b   :  { %1675 = vmatmul.bf16.gmra.mxu1 %v5310_v54 }
  0x7d   :  { %1773 = vmatmul.bf16.gmra.mxu3 %v5314_v57 }
  0x89   :  { %1631 = vmatmul.bf16.gmra.mxu0 %v5344_v15 }
  0x8a   :  { %1729 = vmatmul.bf16.gmra.mxu2 %v5348_v17 }
  0x8b   :  { %1680 = vmatmul.bf16.gmra.mxu1 %v5346_v16 }
  0x8d   :  { %1778 = vmatmul.bf16.gmra.mxu3 %v5350_v22 }
  0x99   :  { %1636 = vmatmul.bf16.gmra.mxu0 %v5380_v59 }
  0x9a   :  { %1734 = vmatmul.bf16.gmra.mxu2 %v5384_v61 }
  0x9b   :  { %1685 = vmatmul.bf16.gmra.mxu1 %v5382_v60 }
  0x9d   :  { %1783 = vmatmul.bf16.gmra.mxu3 %v5386_v62 }
  0xa6   :  { %v1602_v36 = vpop.f32.mrf.mxu0 }
  0xa7   :  { %v1603_v43 = vadd.f32 %v1602_v36, %v5395_v23  ;;  %v3606_v36 = vld [vmem:[%s6385_s0 + $0x50] sm:$0xf] }
  0xa8   :  { %v1651_v44 = vpop.f32.mrf.mxu1 }
  0xa9   :  { %v1652_v45 = vadd.f32 %v1651_v44, %v1603_v43  ;;  %1797 = vmatmul.bf16.vlgmr.msrb.gmra.mxu0 %v5415_v35  ;;  %v4733_v43 = vld [vmem:[%s6385_s0 + $0x68] sm:$0xf0] }
  0xaa   :  { %4560 = vmatmul.msk.bf16.vlgmr.msrb.gmra.mxu2 %vm1568_vm0, %v5419_v38  ;;  %v5452_v58 = vor.u32 %v4733_v43, %v3606_v36 }
  0xab   :  { %1846 = vmatmul.bf16.vlgmr.msrb.gmra.mxu1 %v5417_v37  ;;  %v4548_v37 = vld [vmem:[#allocation2 + $0x610] sm:$0xf0] }
  0xac   :  { %6483 = vst [vmem:[#allocation30_spill] sm:$0xff] %v5452_v58 }
  0xad   :  { %1944 = vmatmul.bf16.vlgmr.msrb.gmra.mxu3 %v5128_v47  ;;  %v1700_v5 = vpop.f32.mrf.mxu2  ;;  %v4036_v47 = vld [vmem:[#allocation2 + $0x210] sm:$0xf0] }
  0xae   :  { %v1701_v8 = vadd.f32 %v1700_v5, %v1652_v45  ;;  %v1604_v10 = vpop.f32.mrf.mxu0  ;;  %v5448_v45 = vor.u32 %v4732_v32, %v3598_v31 }
  0xaf   :  { %v1605_v11 = vadd.f32 %v1604_v10, %v5395_v23 }
  0xb0   :  { %v1749_v9 = vpop.f32.mrf.mxu3  ;;  %v1653_v12 = vpop.f32.mrf.mxu1 }
  0xb1   :  { %v5428_v13 = vadd.f32 %v1749_v9, %v1701_v8  ;;  %v1654_v29 = vadd.f32 %v1653_v12, %v1605_v11  ;;  %v4228_v8 = vld [vmem:[#allocation2 + $0x390] sm:$0xf0]  ;;  %v4824_v9 = vld [vmem:[#allocation2 + $0x184] sm:$0xf] }
  0xb2   :  { %v4231_v10 = vor.u32 %v4888_v7, %v4228_v8  ;;  %v3972_v11 = vld [vmem:[#allocation2 + $0x190] sm:$0xf0]  ;;  %v4920_v12 = vld [vmem:[#allocation2 + $0x484] sm:$0xf]  ;;  %v3628_v7 = vld [vmem:[%s6385_s0 + $0x9c] sm:$0xf0] }
  0xb3   :  { %v4359_v30 = vor.u32 %v4920_v12, %v4356_v14  ;;  %v3634_v8 = vld [vmem:[%s6385_s0 + $0x88] sm:$0xf] }
  0xb4   :  { %2086 = vmatpush.bf16.msra.mxu2 %v4231_v10 }
  0xb5   :  { %v1702_v44 = vpop.f32.mrf.mxu2  ;;  %2135 = vmatpush.bf16.msra.mxu3 %v4359_v30 }
  0xb6   :  { %v1703_v46 = vadd.f32 %v1702_v44, %v1654_v29  ;;  %v1607_v49 = vpop.f32.mrf.mxu0  ;;  %v3975_v29 = vor.u32 %v4824_v9, %v3972_v11  ;;  %v4856_v44 = vld [vmem:[#allocation2 + $0x284] sm:$0xf] }
  0xb7   :  { %v1608_v63 = vadd.f32 %v1607_v49, %v5395_v23  ;;  %v4740_v9 = vld [vmem:[%s6385_s0 + $0xa0] sm:$0xf0] }
  0xb8   :  { %v1751_v48 = vpop.f32.mrf.mxu3  ;;  %v1656_v4 = vpop.f32.mrf.mxu1  ;;  %1988 = vmatpush.bf16.msra.mxu0 %v3975_v29  ;;  %v5487_v30 = vor.u32 %v4740_v9, %v3634_v8 }
  0xb9   :  { %v5455_v5 = vadd.f32 %v1751_v48, %v1703_v46  ;;  %v1657_v6 = vadd.f32 %v1656_v4, %v1608_v63  ;;  %1802 = vmatmul.bf16.gmra.mxu0 %v5448_v45  ;;  %v4100_v46 = vld [vmem:[#allocation2 + $0x290] sm:$0xf0]  ;;  %v3626_v63 = vld [vmem:[%s6385_s0 + $0x80] sm:$0xf]  ;;  %v4739_v4 = vld [vmem:[%s6385_s0 + $0x98] sm:$0xf0] }
  0xba   :  { %4561 = vmatmul.msk.bf16.gmra.mxu2 %vm1568_vm0, %v5452_v58  ;;  %v4103_v49 = vor.u32 %v4856_v44, %v4100_v46  ;;  %v5483_v11 = vor.u32 %v4739_v4, %v3626_v63  ;;  %6485 = vst [vmem:[#allocation32_spill] sm:$0xff] %v5487_v30  ;;  %v4212_v44 = vld [vmem:[#allocation2 + $0x370] sm:$0xf0]  ;;  %v4820_v46 = vld [vmem:[#allocation2 + $0x164] sm:$0xf] }
  0xbb   :  { %1851 = vmatmul.bf16.gmra.mxu1 %v5450_v50  ;;  %v4916_v63 = vld [vmem:[#allocation2 + $0x464] sm:$0xf]  ;;  %v4340_v4 = vld [vmem:[#allocation2 + $0x470] sm:$0xf0] }
  0xbc   :  { %2037 = vmatpush.bf16.msra.mxu1 %v4103_v49  ;;  %v3956_v49 = vld [vmem:[#allocation2 + $0x170] sm:$0xf0]  ;;  %v4343_v8 = vor.u32 %v4916_v63, %v4340_v4  ;;  %v4747_v63 = vld [vmem:[%s6385_s0 + $0xd8] sm:$0xf0] }
  0xbd   :  { %1949 = vmatmul.bf16.gmra.mxu3 %v5164_v18  ;;  %v1705_v24 = vpop.f32.mrf.mxu2  ;;  %v4052_v58 = vld [vmem:[#allocation2 + $0x230] sm:$0xf0] }
  0xbe   :  { %v1706_v31 = vadd.f32 %v1705_v24, %v1657_v6  ;;  %v1609_v33 = vpop.f32.mrf.mxu0  ;;  %v4736_v6 = vld [vmem:[%s6385_s0 + $0x84] sm:$0xf]  ;;  %2136 = vmatpush.bf16.msra.mxu3 %v4343_v8 }
  0xbf   :  { %v1610_v34 = vadd.f32 %v1609_v33, %v5395_v23  ;;  %v5485_v29 = vor.u32 %v4736_v6, %v3628_v7  ;;  %v3959_v7 = vor.u32 %v4820_v46, %v3956_v49  ;;  %v3654_v46 = vld [vmem:[%s6385_s0 + $0xb8] sm:$0xf] }
  0xc0   :  { %v1754_v32 = vpop.f32.mrf.mxu3  ;;  %v1658_v36 = vpop.f32.mrf.mxu1  ;;  %v3656_v49 = vld [vmem:[%s6385_s0 + $0xd4] sm:$0xf0] }
  0xc1   :  { %v5463_v43 = vadd.f32 %v1754_v32, %v1706_v31  ;;  %v1659_v48 = vadd.f32 %v1658_v36, %v1610_v34  ;;  %6484 = vst [vmem:[#allocation31_spill] sm:$0xff] %v5485_v29  ;;  %v4884_v36 = vld [vmem:[#allocation2 + $0x364] sm:$0xf]  ;;  %1989 = vmatpush.bf16.msra.mxu0 %v3959_v7 }
  0xc5   :  { %v1707_v10 = vpop.f32.mrf.mxu2 }
  0xc6   :  { %v1708_v12 = vadd.f32 %v1707_v10, %v1659_v48  ;;  %v1612_v24 = vpop.f32.mrf.mxu0  ;;  %v4215_v48 = vor.u32 %v4884_v36, %v4212_v44 }
  0xc7   :  { %v1613_v31 = vadd.f32 %v1612_v24, %v5395_v23 }
  0xc8   :  { %v1756_v14 = vpop.f32.mrf.mxu3  ;;  %v1661_v32 = vpop.f32.mrf.mxu1  ;;  %2087 = vmatpush.bf16.msra.mxu2 %v4215_v48  ;;  %v4743_v48 = vld [vmem:[%s6385_s0 + $0xbc] sm:$0xf] }
  0xc9   :  { %v5490_v33 = vadd.f32 %v1756_v14, %v1708_v12  ;;  %v1662_v34 = vadd.f32 %v1661_v32, %v1613_v31  ;;  %1807 = vmatmul.bf16.gmra.mxu0 %v5483_v11  ;;  %v4852_v32 = vld [vmem:[#allocation2 + $0x264] sm:$0xf] }
  0xca   :  { %4562 = vmatmul.msk.bf16.gmra.mxu2 %vm1568_vm0, %v5487_v30 }
  0xcb   :  { %1856 = vmatmul.bf16.gmra.mxu1 %v5485_v29  ;;  %v4068_v29 = vld [vmem:[#allocation2 + $0x250] sm:$0xf0] }
  0xcd   :  { %1954 = vmatmul.bf16.gmra.mxu3 %v5200_v39  ;;  %v1710_v6 = vpop.f32.mrf.mxu2  ;;  %v4084_v39 = vld [vmem:[#allocation2 + $0x270] sm:$0xf0] }
  0xce   :  { %v1711_v9 = vadd.f32 %v1710_v6, %v1662_v34  ;;  %v1614_v12 = vpop.f32.mrf.mxu0  ;;  %v4087_v44 = vor.u32 %v4852_v32, %v4084_v39  ;;  %v4746_v34 = vld [vmem:[%s6385_s0 + $0xd0] sm:$0xf0]  ;;  %v3662_v39 = vld [vmem:[%s6385_s0 + $0xc0] sm:$0xf] }
  0xcf   :  { %v1615_v14 = vadd.f32 %v1614_v12, %v5395_v23  ;;  %v5518_v6 = vor.u32 %v4746_v34, %v3654_v46  ;;  %v5522_v12 = vor.u32 %v4747_v63, %v3662_v39  ;;  %v4816_v46 = vld [vmem:[#allocation2 + $0x144] sm:$0xf]  ;;  %v4324_v39 = vld [vmem:[#allocation2 + $0x450] sm:$0xf0] }
  0xd0   :  { %v1759_v10 = vpop.f32.mrf.mxu3  ;;  %v1663_v24 = vpop.f32.mrf.mxu1  ;;  %2038 = vmatpush.bf16.msra.mxu1 %v4087_v44  ;;  %v4196_v44 = vld [vmem:[#allocation2 + $0x350] sm:$0xf0] }
  0xd1   :  { %v5498_v31 = vadd.f32 %v1759_v10, %v1711_v9  ;;  %v1664_v36 = vadd.f32 %v1663_v24, %v1615_v14  ;;  %v5520_v10 = vor.u32 %v4743_v48, %v3656_v49  ;;  %6487 = vst [vmem:[#allocation34_spill] sm:$0xff] %v5522_v12  ;;  %v3940_v48 = vld [vmem:[#allocation2 + $0x150] sm:$0xf0]  ;;  %v4912_v49 = vld [vmem:[#allocation2 + $0x444] sm:$0xf] }
  0xd3   :  { %6486 = vst [vmem:[#allocation33_spill] sm:$0xff] %v5520_v10 }
  0xd5   :  { %v1712_v4 = vpop.f32.mrf.mxu2 }
  0xd6   :  { %v1713_v7 = vadd.f32 %v1712_v4, %v1664_v36  ;;  %v1617_v9 = vpop.f32.mrf.mxu0  ;;  %v4880_v36 = vld [vmem:[#allocation2 + $0x344] sm:$0xf]  ;;  %v3943_v4 = vor.u32 %v4816_v46, %v3940_v48  ;;  %v3682_v46 = vld [vmem:[%s6385_s0 + $0xf0] sm:$0xf] }
  0xd7   :  { %v1618_v14 = vadd.f32 %v1617_v9, %v5395_v23  ;;  %v4199_v34 = vor.u32 %v4880_v36, %v4196_v44  ;;  %v3684_v48 = vld [vmem:[%s6385_s0 + $0x10c] sm:$0xf0] }
  0xd8   :  { %v1761_v8 = vpop.f32.mrf.mxu3  ;;  %v1666_v24 = vpop.f32.mrf.mxu1  ;;  %1990 = vmatpush.bf16.msra.mxu0 %v3943_v4 }
  0xd9   :  { %v5525_v32 = vadd.f32 %v1761_v8, %v1713_v7  ;;  %v1667_v30 = vadd.f32 %v1666_v24, %v1618_v14  ;;  %1812 = vmatmul.bf16.gmra.mxu0 %v5518_v6  ;;  %v4327_v7 = vor.u32 %v4912_v49, %v4324_v39  ;;  %2088 = vmatpush.bf16.msra.mxu2 %v4199_v34  ;;  %v4750_v34 = vld [vmem:[%s6385_s0 + $0xf4] sm:$0xf] }
  0xda   :  { %4563 = vmatmul.msk.bf16.gmra.mxu2 %vm1568_vm0, %v5522_v12  ;;  %v4848_v12 = vld [vmem:[#allocation2 + $0x244] sm:$0xf] }
  0xdb   :  { %1861 = vmatmul.bf16.gmra.mxu1 %v5520_v10  ;;  %2137 = vmatpush.bf16.msra.mxu3 %v4327_v7  ;;  %v4071_v44 = vor.u32 %v4848_v12, %v4068_v29  ;;  %v3690_v29 = vld [vmem:[%s6385_s0 + $0xf8] sm:$0xf]  ;;  %v5555_v7 = vor.u32 %v4750_v34, %v3684_v48  ;;  %v3924_v34 = vld [vmem:[#allocation2 + $0x130] sm:$0xf0]  ;;  %v4908_v48 = vld [vmem:[#allocation2 + $0x424] sm:$0xf] }
  0xdd   :  { %1959 = vmatmul.bf16.gmra.mxu3 %v5236_v0  ;;  %v1715_v63 = vpop.f32.mrf.mxu2  ;;  %2039 = vmatpush.bf16.msra.mxu1 %v4071_v44  ;;  %6488 = vst [vmem:[#allocation35_spill] sm:$0xff] %v5555_v7  ;;  %v4180_v44 = vld [vmem:[#allocation2 + $0x330] sm:$0xf0] }
  0xde   :  { %v1716_v8 = vadd.f32 %v1715_v63, %v1667_v30  ;;  %v1619_v14 = vpop.f32.mrf.mxu0  ;;  %v4753_v30 = vld [vmem:[%s6385_s0 + $0x108] sm:$0xf0] }
  0xdf   :  { %v1620_v24 = vadd.f32 %v1619_v14, %v5395_v23  ;;  %v5553_v49 = vor.u32 %v4753_v30, %v3682_v46  ;;  %v4812_v46 = vld [vmem:[#allocation2 + $0x124] sm:$0xf] }
  0xe0   :  { %v1764_v9 = vpop.f32.mrf.mxu3  ;;  %v1668_v10 = vpop.f32.mrf.mxu1 }
  0xe1   :  { %v5533_v0 = vadd.f32 %v1764_v9, %v1716_v8  ;;  %v1669_v36 = vadd.f32 %v1668_v10, %v1620_v24  ;;  %v4754_v10 = vld [vmem:[%s6385_s0 + $0x110] sm:$0xf0] }
  0xe2   :  { %v5557_v8 = vor.u32 %v4754_v10, %v3690_v29  ;;  %v4308_v29 = vld [vmem:[#allocation2 + $0x430] sm:$0xf0] }
  0xe4   :  { %6489 = vst [vmem:[#allocation36_spill] sm:$0xff] %v5557_v8 }
  0xe5   :  { %v1717_v12 = vpop.f32.mrf.mxu2 }
  0xe6   :  { %v1718_v39 = vadd.f32 %v1717_v12, %v1669_v36  ;;  %v1622_v4 = vpop.f32.mrf.mxu0  ;;  %v4876_v36 = vld [vmem:[#allocation2 + $0x324] sm:$0xf]  ;;  %v3927_v12 = vor.u32 %v4812_v46, %v3924_v34  ;;  %v3710_v46 = vld [vmem:[%s6385_s0 + $0x128] sm:$0xf] }
  0xe7   :  { %v1623_v9 = vadd.f32 %v1622_v4, %v5395_v23  ;;  %v4183_v30 = vor.u32 %v4876_v36, %v4180_v44  ;;  %v3712_v34 = vld [vmem:[%s6385_s0 + $0x144] sm:$0xf0] }
  0xe8   :  { %v1766_v63 = vpop.f32.mrf.mxu3  ;;  %v1671_v14 = vpop.f32.mrf.mxu1  ;;  %1991 = vmatpush.bf16.msra.mxu0 %v3927_v12 }
  0xe9   :  { %v5560_v24 = vadd.f32 %v1766_v63, %v1718_v39  ;;  %v1672_v18 = vadd.f32 %v1671_v14, %v1623_v9  ;;  %1817 = vmatmul.bf16.gmra.mxu0 %v5553_v49  ;;  %v4311_v39 = vor.u32 %v4908_v48, %v4308_v29  ;;  %2089 = vmatpush.bf16.msra.mxu2 %v4183_v30  ;;  %v4757_v30 = vld [vmem:[%s6385_s0 + $0x12c] sm:$0xf] }
  0xea   :  { %4564 = vmatmul.msk.bf16.gmra.mxu2 %vm1568_vm0, %v5557_v8  ;;  %v4844_v8 = vld [vmem:[#allocation2 + $0x224] sm:$0xf] }
  0xeb   :  { %1866 = vmatmul.bf16.gmra.mxu1 %v5555_v7  ;;  %2138 = vmatpush.bf16.msra.mxu3 %v4311_v39  ;;  %v4055_v44 = vor.u32 %v4844_v8, %v4052_v58  ;;  %v3718_v58 = vld [vmem:[%s6385_s0 + $0x130] sm:$0xf]  ;;  %v5590_v39 = vor.u32 %v4757_v30, %v3712_v34  ;;  %v3908_v30 = vld [vmem:[#allocation2 + $0x110] sm:$0xf0]  ;;  %v4904_v34 = vld [vmem:[#allocation2 + $0x404] sm:$0xf] }
  0xed   :  { %1964 = vmatmul.bf16.gmra.mxu3 %v5272_v25  ;;  %v1720_v10 = vpop.f32.mrf.mxu2  ;;  %2040 = vmatpush.bf16.msra.mxu1 %v4055_v44  ;;  %6490 = vst [vmem:[#allocation37_spill] sm:$0xff] %v5590_v39  ;;  %v4164_v44 = vld [vmem:[#allocation2 + $0x310] sm:$0xf0] }
  0xee   :  { %v1721_v63 = vadd.f32 %v1720_v10, %v1672_v18  ;;  %v1624_v9 = vpop.f32.mrf.mxu0  ;;  %v4760_v18 = vld [vmem:[%s6385_s0 + $0x140] sm:$0xf0] }
  0xef   :  { %v1625_v14 = vadd.f32 %v1624_v9, %v5395_v23  ;;  %v5588_v48 = vor.u32 %v4760_v18, %v3710_v46  ;;  %v4808_v46 = vld [vmem:[#allocation2 + $0x104] sm:$0xf] }
  0xf0   :  { %v1769_v4 = vpop.f32.mrf.mxu3  ;;  %v1673_v7 = vpop.f32.mrf.mxu1 }
  0xf1   :  { %v5568_v25 = vadd.f32 %v1769_v4, %v1721_v63  ;;  %v1674_v36 = vadd.f32 %v1673_v7, %v1625_v14  ;;  %v4761_v7 = vld [vmem:[%s6385_s0 + $0x148] sm:$0xf0] }
  0xf2   :  { %v5592_v63 = vor.u32 %v4761_v7, %v3718_v58  ;;  %v4292_v58 = vld [vmem:[#allocation2 + $0x410] sm:$0xf0] }
  0xf4   :  { %6491 = vst [vmem:[#allocation38_spill] sm:$0xff] %v5592_v63 }
  0xf5   :  { %v1722_v8 = vpop.f32.mrf.mxu2 }
  0xf6   :  { %v1723_v29 = vadd.f32 %v1722_v8, %v1674_v36  ;;  %v1627_v12 = vpop.f32.mrf.mxu0  ;;  %v4872_v36 = vld [vmem:[#allocation2 + $0x304] sm:$0xf]  ;;  %v3911_v8 = vor.u32 %v4808_v46, %v3908_v30  ;;  %v3738_v46 = vld [vmem:[%s6385_s0 + $0x160] sm:$0xf] }
  0xf7   :  { %v1628_v4 = vadd.f32 %v1627_v12, %v5395_v23  ;;  %v4167_v18 = vor.u32 %v4872_v36, %v4164_v44  ;;  %v3740_v30 = vld [vmem:[%s6385_s0 + $0x17c] sm:$0xf0] }
  0xf8   :  { %v1771_v10 = vpop.f32.mrf.mxu3  ;;  %v1676_v9 = vpop.f32.mrf.mxu1  ;;  %1992 = vmatpush.bf16.msra.mxu0 %v3911_v8 }
  0xf9   :  { %v5595_v14 = vadd.f32 %v1771_v10, %v1723_v29  ;;  %v1677_v50 = vadd.f32 %v1676_v9, %v1628_v4  ;;  %1822 = vmatmul.bf16.gmra.mxu0 %v5588_v48  ;;  %v4295_v29 = vor.u32 %v4904_v34, %v4292_v58  ;;  %2090 = vmatpush.bf16.msra.mxu2 %v4167_v18  ;;  %v4764_v18 = vld [vmem:[%s6385_s0 + $0x164] sm:$0xf] }
  0xfa   :  { %4565 = vmatmul.msk.bf16.gmra.mxu2 %vm1568_vm0, %v5592_v63  ;;  %v4840_v63 = vld [vmem:[#allocation2 + $0x204] sm:$0xf] }
  0xfb   :  { %1871 = vmatmul.bf16.gmra.mxu1 %v5590_v39  ;;  %2139 = vmatpush.bf16.msra.mxu3 %v4295_v29  ;;  %v4039_v44 = vor.u32 %v4840_v63, %v4036_v47  ;;  %v3746_v47 = vld [vmem:[%s6385_s0 + $0x168] sm:$0xf]  ;;  %v5625_v29 = vor.u32 %v4764_v18, %v3740_v30  ;;  %v4532_v18 = vld [vmem:[#allocation2 + $0x5f0] sm:$0xf0] }
  0xfc   :  { %v4026_v30 = vld [vmem:[#allocation2 + $0x1e8] sm:$0xf] }
  0xfd   :  { %1969 = vmatmul.bf16.gmra.mxu3 %v5308_v53  ;;  %v1725_v7 = vpop.f32.mrf.mxu2  ;;  %2041 = vmatpush.bf16.msra.mxu1 %v4039_v44  ;;  %6493 = vst [vmem:[#allocation40_spill] sm:$0xff] %v5625_v29  ;;  %v4807_v44 = vld [vmem:[#allocation2 + $0xf4] sm:$0xf0] }
  0xfe   :  { %v1726_v10 = vadd.f32 %v1725_v7, %v1677_v50  ;;  %v1629_v4 = vpop.f32.mrf.mxu0  ;;  %v4767_v50 = vld [vmem:[%s6385_s0 + $0x178] sm:$0xf0] }
  0xff   :  { %v1630_v9 = vadd.f32 %v1629_v4, %v5395_v23  ;;  %v5623_v34 = vor.u32 %v4767_v50, %v3738_v46  ;;  %v4964_v46 = vld [vmem:[#allocation2 + $0x5e4] sm:$0xf] }
 0x100   :  { %v1774_v12 = vpop.f32.mrf.mxu3  ;;  %v1678_v39 = vpop.f32.mrf.mxu1 }
 0x101   :  { %v5603_v53 = vadd.f32 %v1774_v12, %v1726_v10  ;;  %v1679_v36 = vadd.f32 %v1678_v39, %v1630_v9  ;;  %v4768_v39 = vld [vmem:[%s6385_s0 + $0x180] sm:$0xf0]  ;;  %6492 = vst [vmem:[#allocation39_spill] sm:$0xff] %v5623_v34 }
 0x102   :  { %v5627_v10 = vor.u32 %v4768_v39, %v3746_v47  ;;  %v4839_v47 = vld [vmem:[#allocation2 + $0x1f4] sm:$0xf0] }
 0x104   :  { %6494 = vst [vmem:[#allocation41_spill] sm:$0xff] %v5627_v10 }
 0x105   :  { %v1727_v63 = vpop.f32.mrf.mxu2 }
 0x106   :  { %v1728_v58 = vadd.f32 %v1727_v63, %v1679_v36  ;;  %v1632_v8 = vpop.f32.mrf.mxu0  ;;  %v3898_v36 = vld [vmem:[#allocation2 + $0xe8] sm:$0xf]  ;;  %v4535_v63 = vor.u32 %v4964_v46, %v4532_v18  ;;  %v3766_v46 = vld [vmem:[%s6385_s0 + $0x198] sm:$0xf] }
 0x107   :  { %v1633_v12 = vadd.f32 %v1632_v8, %v5395_v23  ;;  %v3899_v50 = vor.u32 %v4807_v44, %v3898_v36  ;;  %v3768_v18 = vld [vmem:[%s6385_s0 + $0x1b4] sm:$0xf0] }
 0x108   :  { %v1776_v7 = vpop.f32.mrf.mxu3  ;;  %v1681_v4 = vpop.f32.mrf.mxu1  ;;  %2181 = vmatpush.bf16.msrb.mxu0 %v4535_v63 }
 0x109   :  { %v5630_v9 = vadd.f32 %v1776_v7, %v1728_v58  ;;  %v1682_v38 = vadd.f32 %v1681_v4, %v1633_v12  ;;  %1827 = vmatmul.bf16.gmra.mxu0 %v5623_v34  ;;  %v4027_v58 = vor.u32 %v4839_v47, %v4026_v30  ;;  %2279 = vmatpush.bf16.msrb.mxu2 %v3899_v50  ;;  %v4771_v50 = vld [vmem:[%s6385_s0 + $0x19c] sm:$0xf] }
 0x10a   :  { %4566 = vmatmul.msk.bf16.gmra.mxu2 %vm1568_vm0, %v5627_v10  ;;  %v4968_v10 = vld [vmem:[#allocation2 + $0x604] sm:$0xf] }
 0x10b   :  { %1876 = vmatmul.bf16.gmra.mxu1 %v5625_v29  ;;  %2328 = vmatpush.bf16.msrb.mxu3 %v4027_v58  ;;  %v4551_v44 = vor.u32 %v4968_v10, %v4548_v37  ;;  %v3774_v37 = vld [vmem:[%s6385_s0 + $0x1a0] sm:$0xf]  ;;  %v5660_v58 = vor.u32 %v4771_v50, %v3768_v18  ;;  %v4516_v50 = vld [vmem:[#allocation2 + $0x5d0] sm:$0xf0]  ;;  %v4010_v18 = vld [vmem:[#allocation2 + $0x1c8] sm:$0xf] }
 0x10d   :  { %1974 = vmatmul.bf16.gmra.mxu3 %v5344_v15  ;;  %v1730_v39 = vpop.f32.mrf.mxu2  ;;  %2237 = vmatpush.bf16.msrb.mxu1 %v4551_v44  ;;  %6496 = vst [vmem:[#allocation43_spill] sm:$0xff] %v5660_v58  ;;  %v4803_v44 = vld [vmem:[#allocation2 + $0xd4] sm:$0xf0] }
 0x10e   :  { %v1731_v7 = vadd.f32 %v1730_v39, %v1682_v38  ;;  %v1634_v12 = vpop.f32.mrf.mxu0  ;;  %v4774_v38 = vld [vmem:[%s6385_s0 + $0x1b0] sm:$0xf0] }
 0x10f   :  { %v1635_v4 = vadd.f32 %v1634_v12, %v5395_v23  ;;  %v5658_v30 = vor.u32 %v4774_v38, %v3766_v46  ;;  %v4960_v46 = vld [vmem:[#allocation2 + $0x5c4] sm:$0xf] }
 0x110   :  { %v1779_v8 = vpop.f32.mrf.mxu3  ;;  %v1683_v29 = vpop.f32.mrf.mxu1 }
 0x111   :  { %v5638_v15 = vadd.f32 %v1779_v8, %v1731_v7  ;;  %v1684_v36 = vadd.f32 %v1683_v29, %v1635_v4  ;;  %v4775_v29 = vld [vmem:[%s6385_s0 + $0x1b8] sm:$0xf0]  ;;  %6495 = vst [vmem:[#allocation42_spill] sm:$0xff] %v5658_v30 }
 0x112   :  { %v5662_v7 = vor.u32 %v4775_v29, %v3774_v37  ;;  %v4835_v37 = vld [vmem:[#allocation2 + $0x1d4] sm:$0xf0] }
 0x114   :  { %6497 = vst [vmem:[#allocation44_spill] sm:$0xff] %v5662_v7 }
 0x115   :  { %v1732_v10 = vpop.f32.mrf.mxu2 }
 0x116   :  { %v1733_v47 = vadd.f32 %v1732_v10, %v1684_v36  ;;  %v1637_v63 = vpop.f32.mrf.mxu0  ;;  %v3882_v36 = vld [vmem:[#allocation2 + $0xc8] sm:$0xf]  ;;  %v4519_v10 = vor.u32 %v4960_v46, %v4516_v50 }
 0x117   :  { %v1638_v8 = vadd.f32 %v1637_v63, %v5395_v23  ;;  %v3883_v38 = vor.u32 %v4803_v44, %v3882_v36 }
 0x118   :  { %v1781_v39 = vpop.f32.mrf.mxu3  ;;  %v1686_v12 = vpop.f32.mrf.mxu1  ;;  %2182 = vmatpush.bf16.msrb.mxu0 %v4519_v10 }
 0x119   :  { %v5665_v4 = vadd.f32 %v1781_v39, %v1733_v47  ;;  %v1687_v62 = vadd.f32 %v1686_v12, %v1638_v8  ;;  %1832 = vmatmul.bf16.gmra.mxu0 %v5658_v30  ;;  %v4011_v47 = vor.u32 %v4835_v37, %v4010_v18  ;;  %2280 = vmatpush.bf16.msrb.mxu2 %v3883_v38  ;;  %v4956_v38 = vld [vmem:[#allocation2 + $0x5a4] sm:$0xf]  ;;  %v3994_v18 = vld [vmem:[#allocation2 + $0x1a8] sm:$0xf]  ;;  %v4831_v37 = vld [vmem:[#allocation2 + $0x1b4] sm:$0xf0] }
 0x11a   :  { %4567 = vmatmul.msk.bf16.gmra.mxu2 %vm1568_vm0, %v5662_v7 }
 0x11b   :  { %1881 = vmatmul.bf16.gmra.mxu1 %v5660_v58  ;;  %2329 = vmatpush.bf16.msrb.mxu3 %v4011_v47 }
 0x11d   :  { %1979 = vmatmul.bf16.gmra.mxu3 %v5380_v59  ;;  %v1735_v29 = vpop.f32.mrf.mxu2 }
 0x11e   :  { %v1736_v39 = vadd.f32 %v1735_v29, %v1687_v62  ;;  %v1639_v8 = vpop.f32.mrf.mxu0  ;;  %v3995_v29 = vor.u32 %v4831_v37, %v3994_v18  ;;  %v4795_v18 = vld [vmem:[#allocation2 + $0x94] sm:$0xf0]  ;;  %v4952_v37 = vld [vmem:[#allocation2 + $0x584] sm:$0xf] }
 0x11f   :  { %v1640_v12 = vadd.f32 %v1639_v8, %v5395_v23  ;;  %v3866_v23 = vld [vmem:[#allocation2 + $0xa8] sm:$0xf] }
 0x120   :  { %v1784_v63 = vpop.f32.mrf.mxu3  ;;  %v1688_v58 = vpop.f32.mrf.mxu1  ;;  %2330 = vmatpush.bf16.msrb.mxu3 %v3995_v29  ;;  %v4827_v29 = vld [vmem:[#allocation2 + $0x194] sm:$0xf0] }
 0x121   :  { %v5673_v59 = vadd.f32 %v1784_v63, %v1736_v39  ;;  %v1689_v7 = vadd.f32 %v1688_v58, %v1640_v12  ;;  %v4799_v58 = vld [vmem:[#allocation2 + $0xb4] sm:$0xf0] }
 0x125   :  { %v1737_v30 = vpop.f32.mrf.mxu2 }
 0x126   :  { %v1738_v36 = vadd.f32 %v1737_v30, %v1689_v7  ;;  %v1798_v61 = vpop.f32.mrf.mxu0  ;;  %v3867_v30 = vor.u32 %v4799_v58, %v3866_v23  ;;  %v4500_v7 = vld [vmem:[#allocation2 + $0x5b0] sm:$0xf0] }
 0x127   :  { %v1799_v60 = vadd.f32 %v1798_v61, %v5428_v13  ;;  %v4503_v13 = vor.u32 %v4956_v38, %v4500_v7 }
 0x128   :  { %v1786_v44 = vpop.f32.mrf.mxu3  ;;  %v1847_v46 = vpop.f32.mrf.mxu1  ;;  %2281 = vmatpush.bf16.msrb.mxu2 %v3867_v30 }
 0x129   :  { %v5676_v50 = vadd.f32 %v1786_v44, %v1738_v36  ;;  %v1848_v62 = vadd.f32 %v1847_v46, %v1799_v60  ;;  %1993 = vmatmul.bf16.vlgmr.msra.gmra.mxu0 %v5130_v51 }
 0x12a   :  { %2091 = vmatmul.bf16.vlgmr.msra.gmra.mxu2 %v5134_v55  ;;  %2183 = vmatpush.bf16.msrb.mxu0 %v4503_v13  ;;  %v4484_v13 = vld [vmem:[#allocation2 + $0x590] sm:$0xf0] }
 0x12b   :  { %2042 = vmatmul.bf16.vlgmr.msra.gmra.mxu1 %v5132_v52 }
 0x12d   :  { %2140 = vmatmul.bf16.vlgmr.msra.gmra.mxu3 %v5415_v35  ;;  %v1896_v61 = vpop.f32.mrf.mxu2 }
 0x12e   :  { %v1897_v10 = vadd.f32 %v1896_v61, %v1848_v62  ;;  %v1800_v47 = vpop.f32.mrf.mxu0 }
 0x12f   :  { %v1801_v39 = vadd.f32 %v1800_v47, %v5455_v5  ;;  %v3850_v5 = vld [vmem:[#allocation2 + $0x88] sm:$0xf]  ;;  %v4487_v47 = vor.u32 %v4952_v37, %v4484_v13 }
 0x130   :  { %v5682_v60 = vpop.f32.mrf.mxu3  ;;  %v1849_v63 = vpop.f32.mrf.mxu1  ;;  %v2965_v38 = vmax.f32 %v1897_v10, 0.0  ;;  %v3851_v61 = vor.u32 %v4795_v18, %v3850_v5 }
 0x131   :  { %v1850_v8 = vadd.f32 %v1849_v63, %v1801_v39  ;;  %2184 = vmatpush.bf16.msrb.mxu0 %v4487_v47 }
 0x132   :  { %2282 = vmatpush.bf16.msrb.mxu2 %v3851_v61  ;;  %v3834_v61 = vld [vmem:[#allocation2 + $0x68] sm:$0xf] }
 0x135   :  { %v1898_v12 = vpop.f32.mrf.mxu2 }
 0x136   :  { %v1899_v36 = vadd.f32 %v1898_v12, %v1850_v8  ;;  %v1803_v46 = vpop.f32.mrf.mxu0 }
 0x137   :  { %v1804_v23 = vadd.f32 %v1803_v46, %v5463_v43  ;;  %v3978_v43 = vld [vmem:[#allocation2 + $0x188] sm:$0xf] }
 0x138   :  { %v5685_v44 = vpop.f32.mrf.mxu3  ;;  %v1852_v58 = vpop.f32.mrf.mxu1  ;;  %v2969_v62 = vmax.f32 %v1899_v36, 0.0  ;;  %v3979_v39 = vor.u32 %v4827_v29, %v3978_v43  ;;  %v4791_v29 = vld [vmem:[#allocation2 + $0x74] sm:$0xf0] }
 0x139   :  { %v1853_v7 = vadd.f32 %v1852_v58, %v1804_v23  ;;  %1998 = vmatmul.bf16.gmra.mxu0 %v5166_v19  ;;  %v3835_v47 = vor.u32 %v4791_v29, %v3834_v61 }
 0x13a   :  { %v5689_v30 = vpack.c.bf16 %v2969_v62, %v2965_v38  ;;  %2096 = vmatmul.bf16.gmra.mxu2 %v5170_v21  ;;  %2331 = vmatpush.bf16.msrb.mxu3 %v3979_v39  ;;  %v4468_v39 = vld [vmem:[#allocation2 + $0x570] sm:$0xf0] }
 0x13b   :  { %2047 = vmatmul.bf16.gmra.mxu1 %v5168_v20  ;;  %2283 = vmatpush.bf16.msrb.mxu2 %v3835_v47  ;;  %v3818_v47 = vld [vmem:[#allocation2 + $0x48] sm:$0xf] }
 0x13c   :  { %6498 = vst [vmem:[#allocation45_spill] sm:$0xff] %v5689_v30 }
 0x13d   :  { %2145 = vmatmul.bf16.gmra.mxu3 %v5448_v45  ;;  %v1901_v10 = vpop.f32.mrf.mxu2 }
 0x13e   :  { %v1902_v63 = vadd.f32 %v1901_v10, %v1853_v7  ;;  %v1805_v12 = vpop.f32.mrf.mxu0  ;;  %v4948_v10 = vld [vmem:[#allocation2 + $0x564] sm:$0xf] }
 0x13f   :  { %v1806_v36 = vadd.f32 %v1805_v12, %v5490_v33  ;;  %v4823_v12 = vld [vmem:[#allocation2 + $0x174] sm:$0xf0] }
 0x140   :  { %v5694_v8 = vpop.f32.mrf.mxu3  ;;  %v1854_v46 = vpop.f32.mrf.mxu1  ;;  %v2973_v13 = vmax.f32 %v1902_v63, 0.0 }
 0x141   :  { %v1855_v23 = vadd.f32 %v1854_v46, %v1806_v36  ;;  %v4471_v36 = vor.u32 %v4948_v10, %v4468_v39 }
 0x143   :  { %2185 = vmatpush.bf16.msrb.mxu0 %v4471_v36 }
 0x145   :  { %v1903_v58 = vpop.f32.mrf.mxu2 }
 0x146   :  { %v1904_v38 = vadd.f32 %v1903_v58, %v1855_v23  ;;  %v1808_v5 = vpop.f32.mrf.mxu0 }
 0x147   :  { %v1809_v18 = vadd.f32 %v1808_v5, %v5498_v31  ;;  %v3962_v31 = vld [vmem:[#allocation2 + $0x168] sm:$0xf] }
 0x148   :  { %v5697_v62 = vpop.f32.mrf.mxu3  ;;  %v1857_v37 = vpop.f32.mrf.mxu1  ;;  %v2977_v7 = vmax.f32 %v1904_v38, 0.0  ;;  %v3963_v46 = vor.u32 %v4823_v12, %v3962_v31  ;;  %v4787_v12 = vld [vmem:[#allocation2 + $0x54] sm:$0xf0] }
 0x149   :  { %v1858_v43 = vadd.f32 %v1857_v37, %v1809_v18  ;;  %2003 = vmatmul.bf16.gmra.mxu0 %v5202_v40  ;;  %v3819_v36 = vor.u32 %v4787_v12, %v3818_v47 }
 0x14a   :  { %2101 = vmatmul.bf16.gmra.mxu2 %v5206_v42  ;;  %v5703_v33 = vpack.c.bf16 %v2977_v7, %v2973_v13  ;;  %2332 = vmatpush.bf16.msrb.mxu3 %v3963_v46  ;;  %v4452_v46 = vld [vmem:[#allocation2 + $0x550] sm:$0xf0] }
 0x14b   :  { %2052 = vmatmul.bf16.gmra.mxu1 %v5204_v41  ;;  %2284 = vmatpush.bf16.msrb.mxu2 %v3819_v36  ;;  %v3802_v36 = vld [vmem:[#allocation2 + $0x28] sm:$0xf] }
 0x14c   :  { %6499 = vst [vmem:[#allocation46_spill] sm:$0xff] %v5703_v33 }
 0x14d   :  { %2150 = vmatmul.bf16.gmra.mxu3 %v5483_v11  ;;  %v1906_v63 = vpop.f32.mrf.mxu2 }
 0x14e   :  { %v1907_v23 = vadd.f32 %v1906_v63, %v1858_v43  ;;  %v1810_v38 = vpop.f32.mrf.mxu0  ;;  %v4944_v63 = vld [vmem:[#allocation2 + $0x544] sm:$0xf] }
 0x14f   :  { %v1811_v5 = vadd.f32 %v1810_v38, %v5525_v32  ;;  %v4819_v38 = vld [vmem:[#allocation2 + $0x154] sm:$0xf0] }
 0x150   :  { %v5706_v58 = vpop.f32.mrf.mxu3  ;;  %v1859_v18 = vpop.f32.mrf.mxu1  ;;  %v2981_v39 = vmax.f32 %v1907_v23, 0.0 }
 0x151   :  { %v1860_v37 = vadd.f32 %v1859_v18, %v1811_v5  ;;  %v4455_v5 = vor.u32 %v4944_v63, %v4452_v46 }
 0x153   :  { %2186 = vmatpush.bf16.msrb.mxu0 %v4455_v5 }
 0x155   :  { %v1908_v13 = vpop.f32.mrf.mxu2 }
 0x156   :  { %v1909_v7 = vadd.f32 %v1908_v13, %v1860_v37  ;;  %v1813_v29 = vpop.f32.mrf.mxu0 }
 0x157   :  { %v1814_v33 = vadd.f32 %v1813_v29, %v5533_v0  ;;  %v3946_v0 = vld [vmem:[#allocation2 + $0x148] sm:$0xf] }
 0x158   :  { %v5709_v61 = vpop.f32.mrf.mxu3  ;;  %v1862_v10 = vpop.f32.mrf.mxu1  ;;  %v2985_v43 = vmax.f32 %v1909_v7, 0.0 }
 0x159   :  { %v1863_v31 = vadd.f32 %v1862_v10, %v1814_v33  ;;  %2008 = vmatmul.bf16.gmra.mxu0 %v5238_v1  ;;  %v3947_v33 = vor.u32 %v4819_v38, %v3946_v0  ;;  %v4783_v38 = vld [vmem:[#allocation2 + $0x34] sm:$0xf0] }
 0x15a   :  { %2106 = vmatmul.bf16.gmra.mxu2 %v5242_v3  ;;  %v5715_v32 = vpack.c.bf16 %v2985_v43, %v2981_v39  ;;  %v3803_v5 = vor.u32 %v4783_v38, %v3802_v36 }
 0x15b   :  { %2057 = vmatmul.bf16.gmra.mxu1 %v5240_v2  ;;  %2333 = vmatpush.bf16.msrb.mxu3 %v3947_v33  ;;  %v4436_v33 = vld [vmem:[#allocation2 + $0x530] sm:$0xf0] }
 0x15c   :  { %6500 = vst [vmem:[#allocation47_spill] sm:$0xff] %v5715_v32  ;;  %2285 = vmatpush.bf16.msrb.mxu2 %v3803_v5  ;;  %v3786_v5 = vld [vmem:[#allocation2 + $0x8] sm:$0xf] }
 0x15d   :  { %2155 = vmatmul.bf16.gmra.mxu3 %v5518_v6  ;;  %v1911_v23 = vpop.f32.mrf.mxu2 }
 0x15e   :  { %v1912_v18 = vadd.f32 %v1911_v23, %v1863_v31  ;;  %v1815_v13 = vpop.f32.mrf.mxu0  ;;  %v4940_v23 = vld [vmem:[#allocation2 + $0x524] sm:$0xf] }
 0x15f   :  { %v1816_v7 = vadd.f32 %v1815_v13, %v5560_v24  ;;  %v4815_v13 = vld [vmem:[#allocation2 + $0x134] sm:$0xf0] }
 0x160   :  { %v5718_v37 = vpop.f32.mrf.mxu3  ;;  %v1864_v29 = vpop.f32.mrf.mxu1  ;;  %v2989_v46 = vmax.f32 %v1912_v18, 0.0 }
 0x161   :  { %v1865_v10 = vadd.f32 %v1864_v29, %v1816_v7  ;;  %v4439_v7 = vor.u32 %v4940_v23, %v4436_v33 }
 0x163   :  { %2187 = vmatpush.bf16.msrb.mxu0 %v4439_v7 }
 0x165   :  { %v1913_v39 = vpop.f32.mrf.mxu2 }
 0x166   :  { %v1914_v43 = vadd.f32 %v1913_v39, %v1865_v10  ;;  %v1818_v12 = vpop.f32.mrf.mxu0 }
 0x167   :  { %v1819_v32 = vadd.f32 %v1818_v12, %v5568_v25  ;;  %v3930_v25 = vld [vmem:[#allocation2 + $0x128] sm:$0xf] }
 0x168   :  { %v5721_v47 = vpop.f32.mrf.mxu3  ;;  %v1867_v63 = vpop.f32.mrf.mxu1  ;;  %v2993_v31 = vmax.f32 %v1914_v43, 0.0 }
 0x169   :  { %v1868_v0 = vadd.f32 %v1867_v63, %v1819_v32  ;;  %2013 = vmatmul.bf16.gmra.mxu0 %v5274_v26  ;;  %v3931_v32 = vor.u32 %v4815_v13, %v3930_v25  ;;  %v4779_v13 = vld [vmem:[#allocation2 + $0x14] sm:$0xf0] }
 0x16a   :  { %2111 = vmatmul.bf16.gmra.mxu2 %v5278_v28  ;;  %v5727_v24 = vpack.c.bf16 %v2993_v31, %v2989_v46  ;;  %v3787_v7 = vor.u32 %v4779_v13, %v3786_v5 }
 0x16b   :  { %2062 = vmatmul.bf16.gmra.mxu1 %v5276_v27  ;;  %2334 = vmatpush.bf16.msrb.mxu3 %v3931_v32  ;;  %v4420_v32 = vld [vmem:[#allocation2 + $0x510] sm:$0xf0] }
 0x16c   :  { %6501 = vst [vmem:[#allocation48_spill] sm:$0xff] %v5727_v24  ;;  %2286 = vmatpush.bf16.msrb.mxu2 %v3787_v7  ;;  %v4410_v7 = vld [vmem:[#allocation2 + $0x4e8] sm:$0xf] }
 0x16d   :  { %2160 = vmatmul.bf16.gmra.mxu3 %v5553_v49  ;;  %v1916_v18 = vpop.f32.mrf.mxu2 }
 0x16e   :  { %v1917_v29 = vadd.f32 %v1916_v18, %v1868_v0  ;;  %v1820_v39 = vpop.f32.mrf.mxu0  ;;  %v4936_v18 = vld [vmem:[#allocation2 + $0x504] sm:$0xf] }
 0x16f   :  { %v1821_v43 = vadd.f32 %v1820_v39, %v5595_v14  ;;  %v4811_v39 = vld [vmem:[#allocation2 + $0x114] sm:$0xf0] }
 0x170   :  { %v5730_v10 = vpop.f32.mrf.mxu3  ;;  %v1869_v12 = vpop.f32.mrf.mxu1  ;;  %v2997_v33 = vmax.f32 %v1917_v29, 0.0 }
 0x171   :  { %v1870_v63 = vadd.f32 %v1869_v12, %v1821_v43  ;;  %v4423_v43 = vor.u32 %v4936_v18, %v4420_v32 }
 0x173   :  { %2188 = vmatpush.bf16.msrb.mxu0 %v4423_v43 }
 0x175   :  { %v1918_v46 = vpop.f32.mrf.mxu2 }
 0x176   :  { %v1919_v31 = vadd.f32 %v1918_v46, %v1870_v63  ;;  %v1823_v38 = vpop.f32.mrf.mxu0 }
 0x177   :  { %v1824_v24 = vadd.f32 %v1823_v38, %v5603_v53  ;;  %v3914_v53 = vld [vmem:[#allocation2 + $0x108] sm:$0xf] }
 0x178   :  { %v5733_v36 = vpop.f32.mrf.mxu3  ;;  %v1872_v23 = vpop.f32.mrf.mxu1  ;;  %v3001_v0 = vmax.f32 %v1919_v31, 0.0 }
 0x179   :  { %v1873_v25 = vadd.f32 %v1872_v23, %v1824_v24  ;;  %2018 = vmatmul.bf16.gmra.mxu0 %v5310_v54  ;;  %v3915_v24 = vor.u32 %v4811_v39, %v3914_v53  ;;  %v4935_v39 = vld [vmem:[#allocation2 + $0x4f4] sm:$0xf0] }
 0x17a   :  { %2116 = vmatmul.bf16.gmra.mxu2 %v5314_v57  ;;  %v5739_v14 = vpack.c.bf16 %v3001_v0, %v2997_v33  ;;  %v4411_v43 = vor.u32 %v4935_v39, %v4410_v7 }
 0x17b   :  { %2067 = vmatmul.bf16.gmra.mxu1 %v5312_v56  ;;  %2335 = vmatpush.bf16.msrb.mxu3 %v3915_v24  ;;  %v4871_v24 = vld [vmem:[#allocation2 + $0x2f4] sm:$0xf0] }
 0x17c   :  { %6502 = vst [vmem:[#allocation49_spill] sm:$0xff] %v5739_v14  ;;  %2475 = vmatpush.bf16.msra.mxu2 %v4411_v43 }
 0x17d   :  { %2165 = vmatmul.bf16.gmra.mxu3 %v5588_v48  ;;  %v1921_v29 = vpop.f32.mrf.mxu2 }
 0x17e   :  { %v1922_v12 = vadd.f32 %v1921_v29, %v1873_v25  ;;  %v1825_v46 = vpop.f32.mrf.mxu0  ;;  %v4154_v29 = vld [vmem:[#allocation2 + $0x2e8] sm:$0xf] }
 0x17f   :  { %v1826_v31 = vadd.f32 %v1825_v46, %v5630_v9  ;;  %v4967_v46 = vld [vmem:[#allocation2 + $0x5f4] sm:$0xf0] }
 0x180   :  { %v5742_v63 = vpop.f32.mrf.mxu3  ;;  %v1874_v38 = vpop.f32.mrf.mxu1  ;;  %v3005_v32 = vmax.f32 %v1922_v12, 0.0 }
 0x181   :  { %v1875_v23 = vadd.f32 %v1874_v38, %v1826_v31  ;;  %v4155_v31 = vor.u32 %v4871_v24, %v4154_v29 }
 0x183   :  { %2377 = vmatpush.bf16.msra.mxu0 %v4155_v31  ;;  %v6506_v31 = vld [vmem:[#allocation26_spill] sm:$0xff] }
 0x185   :  { %v1923_v33 = vpop.f32.mrf.mxu2 }
 0x186   :  { %v1924_v0 = vadd.f32 %v1923_v33, %v1875_v23  ;;  %v1828_v13 = vpop.f32.mrf.mxu0 }
 0x187   :  { %v1829_v14 = vadd.f32 %v1828_v13, %v5638_v15  ;;  %v4538_v15 = vld [vmem:[#allocation2 + $0x5e8] sm:$0xf] }
 0x188   :  { %v5745_v5 = vpop.f32.mrf.mxu3  ;;  %v1877_v18 = vpop.f32.mrf.mxu1  ;;  %v3009_v25 = vmax.f32 %v1924_v0, 0.0 }
 0x189   :  { %v1878_v53 = vadd.f32 %v1877_v18, %v1829_v14  ;;  %2023 = vmatmul.bf16.gmra.mxu0 %v5346_v16  ;;  %v4539_v14 = vor.u32 %v4967_v46, %v4538_v15  ;;  %v4282_v18 = vld [vmem:[#allocation2 + $0x3e8] sm:$0xf] }
 0x18a   :  { %2121 = vmatmul.bf16.gmra.mxu2 %v5350_v22  ;;  %v5751_v9 = vpack.c.bf16 %v3009_v25, %v3005_v32  ;;  %v4903_v32 = vld [vmem:[#allocation2 + $0x3f4] sm:$0xf0] }
 0x18b   :  { %2072 = vmatmul.bf16.gmra.mxu1 %v5348_v17  ;;  %2524 = vmatpush.bf16.msra.mxu3 %v4539_v14  ;;  %v4283_v7 = vor.u32 %v4903_v32, %v4282_v18  ;;  %v4138_v18 = vld [vmem:[#allocation2 + $0x2c8] sm:$0xf] }
 0x18c   :  { %6503 = vst [vmem:[#allocation50_spill] sm:$0xff] %v5751_v9 }
 0x18d   :  { %2170 = vmatmul.bf16.gmra.mxu3 %v5623_v34  ;;  %v1926_v12 = vpop.f32.mrf.mxu2  ;;  %2426 = vmatpush.bf16.msra.mxu1 %v4283_v7  ;;  %v4963_v7 = vld [vmem:[#allocation2 + $0x5d4] sm:$0xf0]  ;;  %v6510_v34 = vld [vmem:[#allocation28_spill] sm:$0xff] }
 0x18e   :  { %v1927_v38 = vadd.f32 %v1926_v12, %v1878_v53  ;;  %v1830_v33 = vpop.f32.mrf.mxu0  ;;  %v6505_v12 = vld [vmem:[#allocation25_spill] sm:$0xff] }
 0x18f   :  { %v1831_v0 = vadd.f32 %v1830_v33, %v5665_v4  ;;  %v6504_v4 = vld [vmem:[#allocation24_spill] sm:$0xff]  ;;  %v6508_v33 = vld [vmem:[#allocation42_spill] sm:$0xff] }
 0x190   :  { %v5754_v23 = vpop.f32.mrf.mxu3  ;;  %v1879_v13 = vpop.f32.mrf.mxu1  ;;  %v3013_v15 = vmax.f32 %v1927_v38, 0.0 }
 0x191   :  { %v1880_v25 = vadd.f32 %v1879_v13, %v1831_v0  ;;  %v4394_v0 = vld [vmem:[#allocation2 + $0x4c8] sm:$0xf]  ;;  %v4931_v13 = vld [vmem:[#allocation2 + $0x4d4] sm:$0xf0] }
 0x192   :  { %v4395_v32 = vor.u32 %v4931_v13, %v4394_v0  ;;  %v5772_v0 = vld [vmem:[%s6387_s2] sm:$0xf] }
 0x193   :  { %v5775_v13 = vperm.slane %v5772_v0, 1 }
 0x194   :  { %2476 = vmatpush.bf16.msra.mxu2 %v4395_v32 }
 0x195   :  { %v1928_v39 = vpop.f32.mrf.mxu2  ;;  %v1946_v32 = vadd.f32 %v5682_v60, %v5775_v13  ;;  %v4378_v60 = vld [vmem:[#allocation2 + $0x4a8] sm:$0xf] }
 0x196   :  { %v1929_v9 = vadd.f32 %v1928_v39, %v1880_v25  ;;  %v1833_v29 = vpop.f32.mrf.mxu0  ;;  %v4867_v25 = vld [vmem:[#allocation2 + $0x2d4] sm:$0xf0] }
 0x197   :  { %v1834_v53 = vadd.f32 %v1833_v29, %v5673_v59  ;;  %v4522_v59 = vld [vmem:[#allocation2 + $0x5c8] sm:$0xf] }
 0x198   :  { %v5757_v30 = vpop.f32.mrf.mxu3  ;;  %v1882_v24 = vpop.f32.mrf.mxu1  ;;  %v3017_v43 = vmax.f32 %v1929_v9, 0.0  ;;  %v4139_v9 = vor.u32 %v4867_v25, %v4138_v18  ;;  %v4523_v39 = vor.u32 %v4963_v7, %v4522_v59 }
 0x199   :  { %v1883_v46 = vadd.f32 %v1882_v24, %v1834_v53  ;;  %2028 = vmatmul.bf16.gmra.mxu0 %v6504_v4 }
 0x19a   :  { %2126 = vmatmul.bf16.gmra.mxu2 %v6506_v31  ;;  %v5763_v14 = vpack.c.bf16 %v3017_v43, %v3013_v15  ;;  %2378 = vmatpush.bf16.msra.mxu0 %v4139_v9 }
 0x19b   :  { %2077 = vmatmul.bf16.gmra.mxu1 %v6505_v12  ;;  %2525 = vmatpush.bf16.msra.mxu3 %v4523_v39  ;;  %v6509_v12 = vld [vmem:[#allocation27_spill] sm:$0xff] }
 0x19c   :  { %6507 = vst [vmem:[#allocation51_spill] sm:$0xff] %v5763_v14  ;;  %v4266_v14 = vld [vmem:[#allocation2 + $0x3c8] sm:$0xf] }
 0x19d   :  { %2175 = vmatmul.bf16.gmra.mxu3 %v6508_v33  ;;  %v1931_v38 = vpop.f32.mrf.mxu2  ;;  %v4899_v33 = vld [vmem:[#allocation2 + $0x3d4] sm:$0xf0] }
 0x19e   :  { %v1932_v29 = vadd.f32 %v1931_v38, %v1883_v46  ;;  %v1835_v24 = vpop.f32.mrf.mxu0  ;;  %v4267_v18 = vor.u32 %v4899_v33, %v4266_v14  ;;  %v6511_v14 = vld [vmem:[#allocation8_spill] sm:$0xff] }
 0x19f   :  { %v1836_v15 = vadd.f32 %v1835_v24, %v5676_v50 }
 0x1a0   :  { %v5766_v53 = vpop.f32.mrf.mxu3  ;;  %v1884_v43 = vpop.f32.mrf.mxu1  ;;  %2427 = vmatpush.bf16.msra.mxu1 %v4267_v18  ;;  %v3021_v39 = vmax.f32 %v1932_v29, 0.0  ;;  %v4863_v18 = vld [vmem:[#allocation2 + $0x2b4] sm:$0xf0] }
 0x1a1   :  { %v1885_v46 = vadd.f32 %v1884_v43, %v1836_v15  ;;  %v4927_v15 = vld [vmem:[#allocation2 + $0x4b4] sm:$0xf0]  ;;  %v4122_v43 = vld [vmem:[#allocation2 + $0x2a8] sm:$0xf] }
 0x1a2   :  { %v4959_v29 = vld [vmem:[#allocation2 + $0x5b4] sm:$0xf0] }
 0x1a5   :  { %v1933_v50 = vpop.f32.mrf.mxu2 }
 0x1a6   :  { %v1934_v25 = vadd.f32 %v1933_v50, %v1885_v46  ;;  %v1994_v7 = vpop.f32.mrf.mxu0  ;;  %v4379_v46 = vor.u32 %v4927_v15, %v4378_v60  ;;  %v1948_v50 = vadd.f32 %v5685_v44, %v5775_v13  ;;  %v4250_v60 = vld [vmem:[#allocation2 + $0x3a8] sm:$0xf]  ;;  %v4895_v15 = vld [vmem:[#allocation2 + $0x3b4] sm:$0xf0]  ;;  %v1951_v44 = vadd.f32 %v5694_v8, %v5775_v13 }
 0x1a7   :  { %v1995_v38 = vadd.f32 %v1994_v7, %v1946_v32  ;;  %v4506_v32 = vld [vmem:[#allocation2 + $0x5a8] sm:$0xf]  ;;  %v4123_v7 = vor.u32 %v4863_v18, %v4122_v43  ;;  %v4251_v22 = vor.u32 %v4895_v15, %v4250_v60  ;;  %v4923_v8 = vld [vmem:[#allocation2 + $0x494] sm:$0xf0]  ;;  %v1953_v60 = vadd.f32 %v5697_v62, %v5775_v13 }
 0x1a8   :  { %v5779_v59 = vpop.f32.mrf.mxu3  ;;  %v2043_v9 = vpop.f32.mrf.mxu1  ;;  %v3025_v24 = vmax.f32 %v1934_v25, 0.0  ;;  %2477 = vmatpush.bf16.msra.mxu2 %v4379_v46  ;;  %v1956_v62 = vadd.f32 %v5706_v58, %v5775_v13  ;;  %v4919_v58 = vld [vmem:[#allocation2 + $0x474] sm:$0xf0] }
 0x1a9   :  { %v2044_v31 = vadd.f32 %v2043_v9, %v1995_v38  ;;  %2189 = vmatmul.bf16.vlgmr.msrb.gmra.mxu0 %v6509_v12  ;;  %v4507_v38 = vor.u32 %v4959_v29, %v4506_v32  ;;  %2428 = vmatpush.bf16.msra.mxu1 %v4251_v22  ;;  %v4362_v22 = vld [vmem:[#allocation2 + $0x488] sm:$0xf] }
 0x1aa   :  { %2287 = vmatmul.bf16.vlgmr.msrb.gmra.mxu2 %v6511_v14  ;;  %v5785_v33 = vpack.c.bf16 %v3025_v24, %v3021_v39  ;;  %2379 = vmatpush.bf16.msra.mxu0 %v4123_v7  ;;  %v6515_v7 = vld [vmem:[#allocation10_spill] sm:$0xff] }
 0x1ab   :  { %4568 = vmatmul.msk.bf16.vlgmr.msrb.gmra.mxu1 %vm1568_vm0, %v6510_v34  ;;  %2526 = vmatpush.bf16.msra.mxu3 %v4507_v38  ;;  %v4106_v38 = vld [vmem:[#allocation2 + $0x288] sm:$0xf] }
 0x1ac   :  { %6512 = vst [vmem:[#allocation27_spill] sm:$0xff] %v5785_v33 }
 0x1ad   :  { %2336 = vmatmul.bf16.vlgmr.msrb.gmra.mxu3 %v5130_v51  ;;  %v2092_v25 = vpop.f32.mrf.mxu2 }
 0x1ae   :  { %v2093_v9 = vadd.f32 %v2092_v25, %v2044_v31  ;;  %v1996_v14 = vpop.f32.mrf.mxu0  ;;  %v6513_v25 = vld [vmem:[#allocation29_spill] sm:$0xff] }
 0x1af   :  { %v1997_v39 = vadd.f32 %v1996_v14, %v1948_v50 }
 0x1b0   :  { %v2141_v34 = vpop.f32.mrf.mxu3  ;;  %v2045_v24 = vpop.f32.mrf.mxu1 }
 0x1b1   :  { %v5790_v33 = vadd.f32 %v2141_v34, %v2093_v9  ;;  %v2046_v51 = vadd.f32 %v2045_v24, %v1997_v39  ;;  %v6514_v34 = vld [vmem:[#allocation30_spill] sm:$0xff]  ;;  %v4859_v9 = vld [vmem:[#allocation2 + $0x294] sm:$0xf0]  ;;  %v4490_v39 = vld [vmem:[#allocation2 + $0x588] sm:$0xf] }
 0x1b2   :  { %v4955_v24 = vld [vmem:[#allocation2 + $0x594] sm:$0xf0] }
 0x1b5   :  { %v2094_v43 = vpop.f32.mrf.mxu2 }
 0x1b6   :  { %v2095_v18 = vadd.f32 %v2094_v43, %v2046_v51  ;;  %v1999_v32 = vpop.f32.mrf.mxu0  ;;  %v4363_v51 = vor.u32 %v4923_v8, %v4362_v22  ;;  %v4491_v43 = vor.u32 %v4955_v24, %v4490_v39  ;;  %v4234_v22 = vld [vmem:[#allocation2 + $0x388] sm:$0xf]  ;;  %v4891_v8 = vld [vmem:[#allocation2 + $0x394] sm:$0xf0] }
 0x1b7   :  { %v2000_v29 = vadd.f32 %v1999_v32, %v1951_v44  ;;  %v4107_v44 = vor.u32 %v4859_v9, %v4106_v38 }
 0x1b8   :  { %v2143_v31 = vpop.f32.mrf.mxu3  ;;  %v2048_v46 = vpop.f32.mrf.mxu1  ;;  %2478 = vmatpush.bf16.msra.mxu2 %v4363_v51  ;;  %2527 = vmatpush.bf16.msra.mxu3 %v4491_v43  ;;  %v6517_v43 = vld [vmem:[#allocation32_spill] sm:$0xff] }
 0x1b9   :  { %v5794_v14 = vadd.f32 %v2143_v31, %v2095_v18  ;;  %v2049_v50 = vadd.f32 %v2048_v46, %v2000_v29  ;;  %2194 = vmatmul.bf16.gmra.mxu0 %v6513_v25 }
 0x1ba   :  { %2292 = vmatmul.bf16.gmra.mxu2 %v6515_v7  ;;  %2380 = vmatpush.bf16.msra.mxu0 %v4107_v44  ;;  %v6516_v44 = vld [vmem:[#allocation31_spill] sm:$0xff] }
 0x1bb   :  { %4569 = vmatmul.msk.bf16.gmra.mxu1 %vm1568_vm0, %v6514_v34  ;;  %v4235_v34 = vor.u32 %v4891_v8, %v4234_v22  ;;  %v1958_v22 = vadd.f32 %v5709_v61, %v5775_v13  ;;  %v1961_v61 = vadd.f32 %v5718_v37, %v5775_v13  ;;  %v4915_v37 = vld [vmem:[#allocation2 + $0x454] sm:$0xf0] }
 0x1bd   :  { %2341 = vmatmul.bf16.gmra.mxu3 %v5166_v19  ;;  %v2097_v15 = vpop.f32.mrf.mxu2  ;;  %2429 = vmatpush.bf16.msra.mxu1 %v4235_v34  ;;  %v4346_v34 = vld [vmem:[#allocation2 + $0x468] sm:$0xf] }
 0x1be   :  { %v2098_v18 = vadd.f32 %v2097_v15, %v2049_v50  ;;  %v2001_v32 = vpop.f32.mrf.mxu0 }
 0x1bf   :  { %v2002_v29 = vadd.f32 %v2001_v32, %v1953_v60  ;;  %v4855_v32 = vld [vmem:[#allocation2 + $0x274] sm:$0xf0] }
 0x1c0   :  { %v2146_v31 = vpop.f32.mrf.mxu3  ;;  %v2050_v46 = vpop.f32.mrf.mxu1 }
 0x1c1   :  { %v5803_v19 = vadd.f32 %v2146_v31, %v2098_v18  ;;  %v2051_v7 = vadd.f32 %v2050_v46, %v2002_v29  ;;  %v6518_v18 = vld [vmem:[#allocation12_spill] sm:$0xff]  ;;  %v4090_v31 = vld [vmem:[#allocation2 + $0x268] sm:$0xf]  ;;  %v4951_v46 = vld [vmem:[#allocation2 + $0x574] sm:$0xf0] }
 0x1c2   :  { %v4474_v29 = vld [vmem:[#allocation2 + $0x568] sm:$0xf] }
 0x1c5   :  { %v2099_v38 = vpop.f32.mrf.mxu2 }
 0x1c6   :  { %v2100_v9 = vadd.f32 %v2099_v38, %v2051_v7  ;;  %v2004_v39 = vpop.f32.mrf.mxu0  ;;  %v4347_v7 = vor.u32 %v4919_v58, %v4346_v34  ;;  %v4475_v38 = vor.u32 %v4951_v46, %v4474_v29  ;;  %v4218_v34 = vld [vmem:[#allocation2 + $0x368] sm:$0xf]  ;;  %v4887_v58 = vld [vmem:[#allocation2 + $0x374] sm:$0xf0] }
 0x1c7   :  { %v2005_v24 = vadd.f32 %v2004_v39, %v1956_v62  ;;  %v4091_v62 = vor.u32 %v4855_v32, %v4090_v31 }
 0x1c8   :  { %v2148_v50 = vpop.f32.mrf.mxu3  ;;  %v2053_v51 = vpop.f32.mrf.mxu1  ;;  %2479 = vmatpush.bf16.msra.mxu2 %v4347_v7  ;;  %2528 = vmatpush.bf16.msra.mxu3 %v4475_v38  ;;  %v6520_v38 = vld [vmem:[#allocation34_spill] sm:$0xff] }
 0x1c9   :  { %v5807_v60 = vadd.f32 %v2148_v50, %v2100_v9  ;;  %v2054_v15 = vadd.f32 %v2053_v51, %v2005_v24  ;;  %2199 = vmatmul.bf16.gmra.mxu0 %v6516_v44 }
 0x1ca   :  { %2297 = vmatmul.bf16.gmra.mxu2 %v6518_v18  ;;  %2381 = vmatpush.bf16.msra.mxu0 %v4091_v62  ;;  %v6519_v62 = vld [vmem:[#allocation33_spill] sm:$0xff] }
 0x1cb   :  { %4570 = vmatmul.msk.bf16.gmra.mxu1 %vm1568_vm0, %v6517_v43  ;;  %v4219_v43 = vor.u32 %v4887_v58, %v4218_v34  ;;  %v1963_v34 = vadd.f32 %v5721_v47, %v5775_v13  ;;  %v1966_v47 = vadd.f32 %v5730_v10, %v5775_v13  ;;  %v4911_v10 = vld [vmem:[#allocation2 + $0x434] sm:$0xf0] }
 0x1cd   :  { %2346 = vmatmul.bf16.gmra.mxu3 %v5202_v40  ;;  %v2102_v8 = vpop.f32.mrf.mxu2  ;;  %2430 = vmatpush.bf16.msra.mxu1 %v4219_v43  ;;  %v4330_v43 = vld [vmem:[#allocation2 + $0x448] sm:$0xf] }
 0x1ce   :  { %v2103_v9 = vadd.f32 %v2102_v8, %v2054_v15  ;;  %v2006_v39 = vpop.f32.mrf.mxu0 }
 0x1cf   :  { %v2007_v24 = vadd.f32 %v2006_v39, %v1958_v22  ;;  %v4851_v39 = vld [vmem:[#allocation2 + $0x254] sm:$0xf0] }
 0x1d0   :  { %v2151_v50 = vpop.f32.mrf.mxu3  ;;  %v2055_v51 = vpop.f32.mrf.mxu1 }
 0x1d1   :  { %v5816_v40 = vadd.f32 %v2151_v50, %v2103_v9  ;;  %v2056_v18 = vadd.f32 %v2055_v51, %v2007_v24  ;;  %v6521_v9 = vld [vmem:[#allocation14_spill] sm:$0xff]  ;;  %v4074_v50 = vld [vmem:[#allocation2 + $0x248] sm:$0xf]  ;;  %v4947_v51 = vld [vmem:[#allocation2 + $0x554] sm:$0xf0] }
 0x1d2   :  { %v4458_v24 = vld [vmem:[#allocation2 + $0x548] sm:$0xf] }
 0x1d5   :  { %v2104_v31 = vpop.f32.mrf.mxu2 }
 0x1d6   :  { %v2105_v32 = vadd.f32 %v2104_v31, %v2056_v18  ;;  %v2009_v29 = vpop.f32.mrf.mxu0  ;;  %v4331_v18 = vor.u32 %v4915_v37, %v4330_v43  ;;  %v4459_v31 = vor.u32 %v4947_v51, %v4458_v24  ;;  %v4202_v43 = vld [vmem:[#allocation2 + $0x348] sm:$0xf]  ;;  %v4883_v37 = vld [vmem:[#allocation2 + $0x354] sm:$0xf0] }
 0x1d7   :  { %v2010_v46 = vadd.f32 %v2009_v29, %v1961_v61  ;;  %v4075_v61 = vor.u32 %v4851_v39, %v4074_v50 }
 0x1d8   :  { %v2153_v15 = vpop.f32.mrf.mxu3  ;;  %v2058_v7 = vpop.f32.mrf.mxu1  ;;  %2480 = vmatpush.bf16.msra.mxu2 %v4331_v18  ;;  %2529 = vmatpush.bf16.msra.mxu3 %v4459_v31  ;;  %v6523_v31 = vld [vmem:[#allocation36_spill] sm:$0xff] }
 0x1d9   :  { %v5820_v22 = vadd.f32 %v2153_v15, %v2105_v32  ;;  %v2059_v8 = vadd.f32 %v2058_v7, %v2010_v46  ;;  %2204 = vmatmul.bf16.gmra.mxu0 %v6519_v62 }
 0x1da   :  { %2302 = vmatmul.bf16.gmra.mxu2 %v6521_v9  ;;  %2382 = vmatpush.bf16.msra.mxu0 %v4075_v61  ;;  %v6522_v61 = vld [vmem:[#allocation35_spill] sm:$0xff] }
 0x1db   :  { %4571 = vmatmul.msk.bf16.gmra.mxu1 %vm1568_vm0, %v6520_v38  ;;  %v4203_v38 = vor.u32 %v4883_v37, %v4202_v43  ;;  %v1968_v43 = vadd.f32 %v5733_v36, %v5775_v13  ;;  %v1971_v36 = vadd.f32 %v5742_v63, %v5775_v13  ;;  %v4907_v63 = vld [vmem:[#allocation2 + $0x414] sm:$0xf0] }
 0x1dd   :  { %2351 = vmatmul.bf16.gmra.mxu3 %v5238_v1  ;;  %v2107_v58 = vpop.f32.mrf.mxu2  ;;  %2431 = vmatpush.bf16.msra.mxu1 %v4203_v38  ;;  %v4314_v38 = vld [vmem:[#allocation2 + $0x428] sm:$0xf] }
 0x1de   :  { %v2108_v32 = vadd.f32 %v2107_v58, %v2059_v8  ;;  %v2011_v29 = vpop.f32.mrf.mxu0 }
 0x1df   :  { %v2012_v46 = vadd.f32 %v2011_v29, %v1963_v34  ;;  %v4847_v29 = vld [vmem:[#allocation2 + $0x234] sm:$0xf0] }
 0x1e0   :  { %v2156_v15 = vpop.f32.mrf.mxu3  ;;  %v2060_v7 = vpop.f32.mrf.mxu1 }
 0x1e1   :  { %v5829_v1 = vadd.f32 %v2156_v15, %v2108_v32  ;;  %v2061_v9 = vadd.f32 %v2060_v7, %v2012_v46  ;;  %v6524_v32 = vld [vmem:[#allocation16_spill] sm:$0xff]  ;;  %v4058_v15 = vld [vmem:[#allocation2 + $0x228] sm:$0xf]  ;;  %v4943_v7 = vld [vmem:[#allocation2 + $0x534] sm:$0xf0] }
 0x1e2   :  { %v4442_v46 = vld [vmem:[#allocation2 + $0x528] sm:$0xf] }
 0x1e5   :  { %v2109_v50 = vpop.f32.mrf.mxu2 }
 0x1e6   :  { %v2110_v39 = vadd.f32 %v2109_v50, %v2061_v9  ;;  %v2014_v24 = vpop.f32.mrf.mxu0  ;;  %v4315_v9 = vor.u32 %v4911_v10, %v4314_v38  ;;  %v4443_v50 = vor.u32 %v4943_v7, %v4442_v46  ;;  %v4186_v38 = vld [vmem:[#allocation2 + $0x328] sm:$0xf]  ;;  %v4879_v10 = vld [vmem:[#allocation2 + $0x334] sm:$0xf0] }
 0x1e7   :  { %v2015_v51 = vadd.f32 %v2014_v24, %v1966_v47  ;;  %v4059_v47 = vor.u32 %v4847_v29, %v4058_v15 }
 0x1e8   :  { %v2158_v8 = vpop.f32.mrf.mxu3  ;;  %v2063_v18 = vpop.f32.mrf.mxu1  ;;  %2481 = vmatpush.bf16.msra.mxu2 %v4315_v9  ;;  %2530 = vmatpush.bf16.msra.mxu3 %v4443_v50  ;;  %v6526_v50 = vld [vmem:[#allocation38_spill] sm:$0xff] }
 0x1e9   :  { %v5833_v34 = vadd.f32 %v2158_v8, %v2110_v39  ;;  %v2064_v58 = vadd.f32 %v2063_v18, %v2015_v51  ;;  %2209 = vmatmul.bf16.gmra.mxu0 %v6522_v61 }
 0x1ea   :  { %2307 = vmatmul.bf16.gmra.mxu2 %v6524_v32  ;;  %2383 = vmatpush.bf16.msra.mxu0 %v4059_v47  ;;  %v6525_v47 = vld [vmem:[#allocation37_spill] sm:$0xff] }
 0x1eb   :  { %4572 = vmatmul.msk.bf16.gmra.mxu1 %vm1568_vm0, %v6523_v31  ;;  %v4187_v31 = vor.u32 %v4879_v10, %v4186_v38  ;;  %v1973_v38 = vadd.f32 %v5745_v5, %v5775_v13  ;;  %v1976_v5 = vadd.f32 %v5754_v23, %v5775_v13  ;;  %v4028_v23 = vld [vmem:[#allocation2 + $0x1f8] sm:$0xf0] }
 0x1ed   :  { %2356 = vmatmul.bf16.gmra.mxu3 %v5274_v26  ;;  %v2112_v37 = vpop.f32.mrf.mxu2  ;;  %2432 = vmatpush.bf16.msra.mxu1 %v4187_v31  ;;  %v4298_v31 = vld [vmem:[#allocation2 + $0x408] sm:$0xf] }
 0x1ee   :  { %v2113_v39 = vadd.f32 %v2112_v37, %v2064_v58  ;;  %v2016_v24 = vpop.f32.mrf.mxu0 }
 0x1ef   :  { %v2017_v51 = vadd.f32 %v2016_v24, %v1968_v43  ;;  %v4843_v24 = vld [vmem:[#allocation2 + $0x214] sm:$0xf0] }
 0x1f0   :  { %v2161_v8 = vpop.f32.mrf.mxu3  ;;  %v2065_v18 = vpop.f32.mrf.mxu1 }
 0x1f1   :  { %v5842_v26 = vadd.f32 %v2161_v8, %v2113_v39  ;;  %v2066_v32 = vadd.f32 %v2065_v18, %v2017_v51  ;;  %v6527_v39 = vld [vmem:[#allocation18_spill] sm:$0xff]  ;;  %v4042_v8 = vld [vmem:[#allocation2 + $0x208] sm:$0xf]  ;;  %v4939_v18 = vld [vmem:[#allocation2 + $0x514] sm:$0xf0] }
 0x1f2   :  { %v4426_v51 = vld [vmem:[#allocation2 + $0x508] sm:$0xf] }
 0x1f5   :  { %v2114_v15 = vpop.f32.mrf.mxu2 }
 0x1f6   :  { %v2115_v29 = vadd.f32 %v2114_v15, %v2066_v32  ;;  %v2019_v46 = vpop.f32.mrf.mxu0  ;;  %v4299_v32 = vor.u32 %v4907_v63, %v4298_v31  ;;  %v4427_v15 = vor.u32 %v4939_v18, %v4426_v51  ;;  %v4170_v31 = vld [vmem:[#allocation2 + $0x308] sm:$0xf]  ;;  %v4875_v63 = vld [vmem:[#allocation2 + $0x314] sm:$0xf0] }
 0x1f7   :  { %v2020_v7 = vadd.f32 %v2019_v46, %v1971_v36  ;;  %v4043_v36 = vor.u32 %v4843_v24, %v4042_v8 }
 0x1f8   :  { %v2163_v58 = vpop.f32.mrf.mxu3  ;;  %v2068_v9 = vpop.f32.mrf.mxu1  ;;  %2482 = vmatpush.bf16.msra.mxu2 %v4299_v32  ;;  %2531 = vmatpush.bf16.msra.mxu3 %v4427_v15  ;;  %v6529_v15 = vld [vmem:[#allocation41_spill] sm:$0xff] }
 0x1f9   :  { %v5846_v43 = vadd.f32 %v2163_v58, %v2115_v29  ;;  %v2069_v37 = vadd.f32 %v2068_v9, %v2020_v7  ;;  %2214 = vmatmul.bf16.gmra.mxu0 %v6525_v47 }
 0x1fa   :  { %2312 = vmatmul.bf16.gmra.mxu2 %v6527_v39  ;;  %2384 = vmatpush.bf16.msra.mxu0 %v4043_v36  ;;  %v6528_v36 = vld [vmem:[#allocation40_spill] sm:$0xff] }
 0x1fb   :  { %4573 = vmatmul.msk.bf16.gmra.mxu1 %vm1568_vm0, %v6526_v50  ;;  %v4171_v50 = vor.u32 %v4875_v63, %v4170_v31  ;;  %v1978_v31 = vadd.f32 %v5757_v30, %v5775_v13  ;;  %v1981_v30 = vadd.f32 %v5766_v53, %v5775_v13  ;;  %v4012_v53 = vld [vmem:[#allocation2 + $0x1d8] sm:$0xf0] }
 0x1fd   :  { %2361 = vmatmul.bf16.gmra.mxu3 %v5310_v54  ;;  %v2117_v10 = vpop.f32.mrf.mxu2  ;;  %2433 = vmatpush.bf16.msra.mxu1 %v4171_v50  ;;  %v4837_v50 = vld [vmem:[#allocation2 + $0x1ec] sm:$0xf] }
 0x1fe   :  { %v2118_v29 = vadd.f32 %v2117_v10, %v2069_v37  ;;  %v2021_v46 = vpop.f32.mrf.mxu0 }
 0x1ff   :  { %v2022_v7 = vadd.f32 %v2021_v46, %v1973_v38  ;;  %v4971_v46 = vld [vmem:[#allocation2 + $0x614] sm:$0xf0] }
 0x200   :  { %v2166_v58 = vpop.f32.mrf.mxu3  ;;  %v2070_v9 = vpop.f32.mrf.mxu1 }
 0x201   :  { %v5855_v54 = vadd.f32 %v2166_v58, %v2118_v29  ;;  %v2071_v39 = vadd.f32 %v2070_v9, %v2022_v7  ;;  %v6530_v29 = vld [vmem:[#allocation20_spill] sm:$0xff]  ;;  %v4554_v58 = vld [vmem:[#allocation2 + $0x608] sm:$0xf]  ;;  %v4869_v7 = vld [vmem:[#allocation2 + $0x2ec] sm:$0xf] }
 0x202   :  { %v4156_v9 = vld [vmem:[#allocation2 + $0x2f8] sm:$0xf0] }
 0x205   :  { %v2119_v8 = vpop.f32.mrf.mxu2 }
 0x206   :  { %v2120_v24 = vadd.f32 %v2119_v8, %v2071_v39  ;;  %v2024_v51 = vpop.f32.mrf.mxu0  ;;  %v4031_v39 = vor.u32 %v4837_v50, %v4028_v23  ;;  %v4159_v8 = vor.u32 %v4869_v7, %v4156_v9  ;;  %v4805_v50 = vld [vmem:[#allocation2 + $0xec] sm:$0xf]  ;;  %v3900_v23 = vld [vmem:[#allocation2 + $0xf8] sm:$0xf0] }
 0x207   :  { %v2025_v18 = vadd.f32 %v2024_v51, %v1976_v5  ;;  %v4555_v5 = vor.u32 %v4971_v46, %v4554_v58 }
 0x208   :  { %v2168_v37 = vpop.f32.mrf.mxu3  ;;  %v2073_v32 = vpop.f32.mrf.mxu1  ;;  %2671 = vmatpush.bf16.msrb.mxu2 %v4031_v39  ;;  %2720 = vmatpush.bf16.msrb.mxu3 %v4159_v8  ;;  %v6532_v8 = vld [vmem:[#allocation44_spill] sm:$0xff] }
 0x209   :  { %v5859_v38 = vadd.f32 %v2168_v37, %v2120_v24  ;;  %v2074_v10 = vadd.f32 %v2073_v32, %v2025_v18  ;;  %2219 = vmatmul.bf16.gmra.mxu0 %v6528_v36 }
 0x20a   :  { %2317 = vmatmul.bf16.gmra.mxu2 %v6530_v29  ;;  %2580 = vmatpush.bf16.msrb.mxu0 %v4555_v5  ;;  %v6531_v5 = vld [vmem:[#allocation43_spill] sm:$0xff] }
 0x20b   :  { %4574 = vmatmul.msk.bf16.gmra.mxu1 %vm1568_vm0, %v6529_v15  ;;  %v3903_v15 = vor.u32 %v4805_v50, %v3900_v23 }
 0x20d   :  { %2366 = vmatmul.bf16.gmra.mxu3 %v5346_v16  ;;  %v2122_v63 = vpop.f32.mrf.mxu2  ;;  %2622 = vmatpush.bf16.msrb.mxu1 %v3903_v15  ;;  %v4833_v15 = vld [vmem:[#allocation2 + $0x1cc] sm:$0xf] }
 0x20e   :  { %v2123_v24 = vadd.f32 %v2122_v63, %v2074_v10  ;;  %v2026_v51 = vpop.f32.mrf.mxu0 }
 0x20f   :  { %v2027_v18 = vadd.f32 %v2026_v51, %v1978_v31  ;;  %v4140_v51 = vld [vmem:[#allocation2 + $0x2d8] sm:$0xf0] }
 0x210   :  { %v2171_v37 = vpop.f32.mrf.mxu3  ;;  %v2075_v32 = vpop.f32.mrf.mxu1 }
 0x211   :  { %v5868_v16 = vadd.f32 %v2171_v37, %v2123_v24  ;;  %v2076_v29 = vadd.f32 %v2075_v32, %v2027_v18  ;;  %v6533_v24 = vld [vmem:[#allocation23_spill] sm:$0xff]  ;;  %v4865_v37 = vld [vmem:[#allocation2 + $0x2cc] sm:$0xf]  ;;  %v1983_v18 = vadd.f32 %v5779_v59, %v5775_v13 }
 0x212   :  { %v4143_v50 = vor.u32 %v4865_v37, %v4140_v51  ;;  %v5890_v51 = vperm.slane %v5772_v0, 2 }
 0x214   :  { %2721 = vmatpush.bf16.msrb.mxu3 %v4143_v50 }
 0x215   :  { %v2124_v58 = vpop.f32.mrf.mxu2 }
 0x216   :  { %v2125_v46 = vadd.f32 %v2124_v58, %v2076_v29  ;;  %v2029_v7 = vpop.f32.mrf.mxu0  ;;  %v4015_v29 = vor.u32 %v4833_v15, %v4012_v53 }
 0x217   :  { %v2030_v9 = vadd.f32 %v2029_v7, %v1981_v30 }
 0x218   :  { %v2173_v10 = vpop.f32.mrf.mxu3  ;;  %v2078_v39 = vpop.f32.mrf.mxu1  ;;  %2672 = vmatpush.bf16.msrb.mxu2 %v4015_v29 }
 0x219   :  { %v5872_v31 = vadd.f32 %v2173_v10, %v2125_v46  ;;  %v2079_v63 = vadd.f32 %v2078_v39, %v2030_v9  ;;  %2224 = vmatmul.bf16.gmra.mxu0 %v6531_v5  ;;  %v4801_v9 = vld [vmem:[#allocation2 + $0xcc] sm:$0xf]  ;;  %v3884_v39 = vld [vmem:[#allocation2 + $0xd8] sm:$0xf0] }
 0x21a   :  { %2322 = vmatmul.bf16.gmra.mxu2 %v6533_v24  ;;  %v3887_v24 = vor.u32 %v4801_v9, %v3884_v39  ;;  %v4797_v9 = vld [vmem:[#allocation2 + $0xac] sm:$0xf]  ;;  %v3868_v39 = vld [vmem:[#allocation2 + $0xb8] sm:$0xf0] }
 0x21b   :  { %4575 = vmatmul.msk.bf16.gmra.mxu1 %vm1568_vm0, %v6532_v8 }
 0x21c   :  { %2623 = vmatpush.bf16.msrb.mxu1 %v3887_v24  ;;  %v3996_v24 = vld [vmem:[#allocation2 + $0x1b8] sm:$0xf0] }
 0x21d   :  { %2371 = vmatmul.bf16.gmra.mxu3 %v6504_v4  ;;  %v2127_v32 = vpop.f32.mrf.mxu2 }
 0x21e   :  { %v2128_v23 = vadd.f32 %v2127_v32, %v2079_v63  ;;  %v2031_v58 = vpop.f32.mrf.mxu0  ;;  %v4861_v32 = vld [vmem:[#allocation2 + $0x2ac] sm:$0xf] }
 0x21f   :  { %v2032_v46 = vadd.f32 %v2031_v58, %v1983_v18 }
 0x220   :  { %v2176_v30 = vpop.f32.mrf.mxu3  ;;  %v2080_v10 = vpop.f32.mrf.mxu1 }
 0x221   :  { %v5881_v7 = vadd.f32 %v2176_v30, %v2128_v23  ;;  %v2081_v4 = vadd.f32 %v2080_v10, %v2032_v46 }
 0x225   :  { %v2129_v15 = vpop.f32.mrf.mxu2 }
 0x226   :  { %v2130_v53 = vadd.f32 %v2129_v15, %v2081_v4  ;;  %v2190_v13 = vpop.f32.mrf.mxu0  ;;  %v4829_v4 = vld [vmem:[#allocation2 + $0x1ac] sm:$0xf] }
 0x227   :  { %v2191_v59 = vadd.f32 %v2190_v13, %v5790_v33  ;;  %v3999_v18 = vor.u32 %v4829_v4, %v3996_v24  ;;  %v4124_v33 = vld [vmem:[#allocation2 + $0x2b8] sm:$0xf0] }
 0x228   :  { %v2178_v8 = vpop.f32.mrf.mxu3  ;;  %v2239_v63 = vpop.f32.mrf.mxu1 }
 0x229   :  { %v5884_v37 = vadd.f32 %v2178_v8, %v2130_v53  ;;  %v2240_v29 = vadd.f32 %v2239_v63, %v2191_v59  ;;  %2385 = vmatmul.bf16.vlgmr.msra.gmra.mxu0 %v5132_v52  ;;  %v4127_v8 = vor.u32 %v4861_v32, %v4124_v33  ;;  %2673 = vmatpush.bf16.msrb.mxu2 %v3999_v18 }
 0x22a   :  { %2483 = vmatmul.bf16.vlgmr.msra.gmra.mxu2 %v5415_v35  ;;  %v3871_v53 = vor.u32 %v4797_v9, %v3868_v39 }
 0x22b   :  { %2434 = vmatmul.bf16.vlgmr.msra.gmra.mxu1 %v5134_v55  ;;  %2722 = vmatpush.bf16.msrb.mxu3 %v4127_v8  ;;  %v2966_v13 = vmax.f32 %v2240_v29, 0.0  ;;  %v4825_v29 = vld [vmem:[#allocation2 + $0x18c] sm:$0xf] }
 0x22c   :  { %2624 = vmatpush.bf16.msrb.mxu1 %v3871_v53 }
 0x22d   :  { %2532 = vmatmul.bf16.vlgmr.msra.gmra.mxu3 %v6509_v12  ;;  %v2288_v50 = vpop.f32.mrf.mxu2 }
 0x22e   :  { %v2289_v23 = vadd.f32 %v2288_v50, %v5890_v51  ;;  %v2192_v58 = vpop.f32.mrf.mxu0 }
 0x22f   :  { %v2193_v46 = vadd.f32 %v2192_v58, %v5794_v14  ;;  %v4857_v58 = vld [vmem:[#allocation2 + $0x28c] sm:$0xf] }
 0x230   :  { %v2337_v30 = vpop.f32.mrf.mxu3  ;;  %v2241_v10 = vpop.f32.mrf.mxu1 }
 0x231   :  { %v5895_v0 = vadd.f32 %v2337_v30, %v2289_v23  ;;  %v2242_v15 = vadd.f32 %v2241_v10, %v2193_v46  ;;  %v3980_v23 = vld [vmem:[#allocation2 + $0x198] sm:$0xf0] }
 0x232   :  { %v3983_v30 = vor.u32 %v4825_v29, %v3980_v23  ;;  %v4108_v46 = vld [vmem:[#allocation2 + $0x298] sm:$0xf0] }
 0x233   :  { %v2970_v59 = vmax.f32 %v2242_v15, 0.0  ;;  %v4111_v9 = vor.u32 %v4857_v58, %v4108_v46 }
 0x234   :  { %2674 = vmatpush.bf16.msrb.mxu2 %v3983_v30 }
 0x235   :  { %v5897_v63 = vpack.c.bf16 %v2970_v59, %v2966_v13  ;;  %v2290_v4 = vpop.f32.mrf.mxu2  ;;  %2723 = vmatpush.bf16.msrb.mxu3 %v4111_v9 }
 0x236   :  { %v2291_v24 = vadd.f32 %v2290_v4, %v5890_v51  ;;  %v2195_v18 = vpop.f32.mrf.mxu0  ;;  %v4793_v4 = vld [vmem:[#allocation2 + $0x8c] sm:$0xf] }
 0x237   :  { %6534 = vst [vmem:[#allocation29_spill] sm:$0xff] %v5897_v63  ;;  %v2196_v14 = vadd.f32 %v2195_v18, %v5803_v19 }
 0x238   :  { %v2339_v32 = vpop.f32.mrf.mxu3  ;;  %v2244_v33 = vpop.f32.mrf.mxu1 }
 0x239   :  { %v5901_v50 = vadd.f32 %v2339_v32, %v2291_v24  ;;  %v2245_v8 = vadd.f32 %v2244_v33, %v2196_v14  ;;  %2390 = vmatmul.bf16.gmra.mxu0 %v5168_v20  ;;  %v3852_v24 = vld [vmem:[#allocation2 + $0x98] sm:$0xf0] }
 0x23a   :  { %2488 = vmatmul.bf16.gmra.mxu2 %v5448_v45  ;;  %v3855_v18 = vor.u32 %v4793_v4, %v3852_v24 }
 0x23b   :  { %2439 = vmatmul.bf16.gmra.mxu1 %v5170_v21  ;;  %v2974_v14 = vmax.f32 %v2245_v8, 0.0  ;;  %v4821_v8 = vld [vmem:[#allocation2 + $0x16c] sm:$0xf] }
 0x23c   :  { %2625 = vmatpush.bf16.msrb.mxu1 %v3855_v18 }
 0x23d   :  { %2537 = vmatmul.bf16.gmra.mxu3 %v6513_v25  ;;  %v2293_v10 = vpop.f32.mrf.mxu2 }
 0x23e   :  { %v2294_v19 = vadd.f32 %v2293_v10, %v5890_v51  ;;  %v2197_v15 = vpop.f32.mrf.mxu0 }
 0x23f   :  { %v2198_v53 = vadd.f32 %v2197_v15, %v5807_v60 }
 0x240   :  { %v2342_v39 = vpop.f32.mrf.mxu3  ;;  %v2246_v13 = vpop.f32.mrf.mxu1 }
 0x241   :  { %v5909_v59 = vadd.f32 %v2342_v39, %v2294_v19  ;;  %v2247_v32 = vadd.f32 %v2246_v13, %v2198_v53  ;;  %v3964_v39 = vld [vmem:[#allocation2 + $0x178] sm:$0xf0]  ;;  %v4853_v53 = vld [vmem:[#allocation2 + $0x26c] sm:$0xf] }
 0x242   :  { %v3967_v15 = vor.u32 %v4821_v8, %v3964_v39  ;;  %v4092_v13 = vld [vmem:[#allocation2 + $0x278] sm:$0xf0] }
 0x243   :  { %v2978_v33 = vmax.f32 %v2247_v32, 0.0  ;;  %v4095_v24 = vor.u32 %v4853_v53, %v4092_v13 }
 0x244   :  { %2675 = vmatpush.bf16.msrb.mxu2 %v3967_v15 }
 0x245   :  { %v2295_v29 = vpop.f32.mrf.mxu2  ;;  %v5911_v23 = vpack.c.bf16 %v2978_v33, %v2974_v14  ;;  %2724 = vmatpush.bf16.msrb.mxu3 %v4095_v24 }
 0x246   :  { %v2296_v58 = vadd.f32 %v2295_v29, %v5890_v51  ;;  %v2200_v30 = vpop.f32.mrf.mxu0 }
 0x247   :  { %6535 = vst [vmem:[#allocation31_spill] sm:$0xff] %v5911_v23  ;;  %v2201_v60 = vadd.f32 %v2200_v30, %v5816_v40 }
 0x248   :  { %v2344_v46 = vpop.f32.mrf.mxu3  ;;  %v2249_v10 = vpop.f32.mrf.mxu1 }
 0x249   :  { %v5915_v9 = vadd.f32 %v2344_v46, %v2296_v58  ;;  %v2250_v19 = vadd.f32 %v2249_v10, %v2201_v60  ;;  %2395 = vmatmul.bf16.gmra.mxu0 %v5204_v41  ;;  %v4789_v58 = vld [vmem:[#allocation2 + $0x6c] sm:$0xf]  ;;  %v3836_v46 = vld [vmem:[#allocation2 + $0x78] sm:$0xf0] }
 0x24a   :  { %2493 = vmatmul.bf16.gmra.mxu2 %v5483_v11  ;;  %v3839_v60 = vor.u32 %v4789_v58, %v3836_v46  ;;  %v4076_v58 = vld [vmem:[#allocation2 + $0x258] sm:$0xf0] }
 0x24b   :  { %2444 = vmatmul.bf16.gmra.mxu1 %v5206_v42  ;;  %v2982_v10 = vmax.f32 %v2250_v19, 0.0  ;;  %v4817_v19 = vld [vmem:[#allocation2 + $0x14c] sm:$0xf] }
 0x24c   :  { %2626 = vmatpush.bf16.msrb.mxu1 %v3839_v60 }
 0x24d   :  { %2542 = vmatmul.bf16.gmra.mxu3 %v6516_v44  ;;  %v2298_v4 = vpop.f32.mrf.mxu2 }
 0x24e   :  { %v2299_v40 = vadd.f32 %v2298_v4, %v5890_v51  ;;  %v2202_v18 = vpop.f32.mrf.mxu0 }
 0x24f   :  { %v2203_v14 = vadd.f32 %v2202_v18, %v5820_v22 }
 0x250   :  { %v2347_v32 = vpop.f32.mrf.mxu3  ;;  %v2251_v33 = vpop.f32.mrf.mxu1 }
 0x251   :  { %v5923_v29 = vadd.f32 %v2347_v32, %v2299_v40  ;;  %v2252_v30 = vadd.f32 %v2251_v33, %v2203_v14  ;;  %v3948_v32 = vld [vmem:[#allocation2 + $0x158] sm:$0xf0]  ;;  %v4849_v33 = vld [vmem:[#allocation2 + $0x24c] sm:$0xf] }
 0x252   :  { %v3951_v14 = vor.u32 %v4817_v19, %v3948_v32 }
 0x253   :  { %v2986_v8 = vmax.f32 %v2252_v30, 0.0  ;;  %v4079_v30 = vor.u32 %v4849_v33, %v4076_v58 }
 0x254   :  { %2676 = vmatpush.bf16.msrb.mxu2 %v3951_v14 }
 0x255   :  { %v2300_v39 = vpop.f32.mrf.mxu2  ;;  %v5925_v53 = vpack.c.bf16 %v2986_v8, %v2982_v10  ;;  %2725 = vmatpush.bf16.msrb.mxu3 %v4079_v30 }
 0x256   :  { %v2301_v13 = vadd.f32 %v2300_v39, %v5890_v51  ;;  %v2205_v15 = vpop.f32.mrf.mxu0 }
 0x257   :  { %6536 = vst [vmem:[#allocation33_spill] sm:$0xff] %v5925_v53  ;;  %v2206_v22 = vadd.f32 %v2205_v15, %v5829_v1  ;;  %v3820_v15 = vld [vmem:[#allocation2 + $0x58] sm:$0xf0] }
 0x258   :  { %v2349_v4 = vpop.f32.mrf.mxu3  ;;  %v2254_v18 = vpop.f32.mrf.mxu1 }
 0x259   :  { %v5929_v24 = vadd.f32 %v2349_v4, %v2301_v13  ;;  %v2255_v40 = vadd.f32 %v2254_v18, %v2206_v22  ;;  %2400 = vmatmul.bf16.gmra.mxu0 %v5240_v2  ;;  %v4785_v4 = vld [vmem:[#allocation2 + $0x4c] sm:$0xf] }
 0x25a   :  { %2498 = vmatmul.bf16.gmra.mxu2 %v5518_v6  ;;  %v3823_v18 = vor.u32 %v4785_v4, %v3820_v15 }
 0x25b   :  { %2449 = vmatmul.bf16.gmra.mxu1 %v5242_v3  ;;  %v2990_v19 = vmax.f32 %v2255_v40, 0.0  ;;  %v4813_v40 = vld [vmem:[#allocation2 + $0x12c] sm:$0xf] }
 0x25c   :  { %2627 = vmatpush.bf16.msrb.mxu1 %v3823_v18 }
 0x25d   :  { %2547 = vmatmul.bf16.gmra.mxu3 %v6519_v62  ;;  %v2303_v46 = vpop.f32.mrf.mxu2 }
 0x25e   :  { %v2304_v1 = vadd.f32 %v2303_v46, %v5890_v51  ;;  %v2207_v10 = vpop.f32.mrf.mxu0 }
 0x25f   :  { %v2208_v8 = vadd.f32 %v2207_v10, %v5833_v34 }
 0x260   :  { %v2352_v60 = vpop.f32.mrf.mxu3  ;;  %v2256_v39 = vpop.f32.mrf.mxu1 }
 0x261   :  { %v5937_v13 = vadd.f32 %v2352_v60, %v2304_v1  ;;  %v2257_v22 = vadd.f32 %v2256_v39, %v2208_v8  ;;  %v3932_v60 = vld [vmem:[#allocation2 + $0x138] sm:$0xf0] }
 0x262   :  { %v3935_v8 = vor.u32 %v4813_v40, %v3932_v60  ;;  %v4060_v39 = vld [vmem:[#allocation2 + $0x238] sm:$0xf0] }
 0x263   :  { %v2994_v32 = vmax.f32 %v2257_v22, 0.0 }
 0x264   :  { %2677 = vmatpush.bf16.msrb.mxu2 %v3935_v8 }
 0x265   :  { %v2305_v53 = vpop.f32.mrf.mxu2  ;;  %v5939_v33 = vpack.c.bf16 %v2994_v32, %v2990_v19 }
 0x266   :  { %v2306_v58 = vadd.f32 %v2305_v53, %v5890_v51  ;;  %v2210_v14 = vpop.f32.mrf.mxu0  ;;  %v4845_v53 = vld [vmem:[#allocation2 + $0x22c] sm:$0xf] }
 0x267   :  { %6537 = vst [vmem:[#allocation35_spill] sm:$0xff] %v5939_v33  ;;  %v2211_v34 = vadd.f32 %v2210_v14, %v5842_v26  ;;  %v4063_v15 = vor.u32 %v4845_v53, %v4060_v39  ;;  %v3804_v14 = vld [vmem:[#allocation2 + $0x38] sm:$0xf0] }
 0x268   :  { %v2354_v46 = vpop.f32.mrf.mxu3  ;;  %v2259_v10 = vpop.f32.mrf.mxu1 }
 0x269   :  { %v5943_v30 = vadd.f32 %v2354_v46, %v2306_v58  ;;  %v2260_v1 = vadd.f32 %v2259_v10, %v2211_v34  ;;  %2405 = vmatmul.bf16.gmra.mxu0 %v5276_v27  ;;  %2726 = vmatpush.bf16.msrb.mxu3 %v4063_v15  ;;  %v4781_v46 = vld [vmem:[#allocation2 + $0x2c] sm:$0xf] }
 0x26a   :  { %2503 = vmatmul.bf16.gmra.mxu2 %v5553_v49  ;;  %v3807_v10 = vor.u32 %v4781_v46, %v3804_v14 }
 0x26b   :  { %2454 = vmatmul.bf16.gmra.mxu1 %v5278_v28  ;;  %v2998_v40 = vmax.f32 %v2260_v1, 0.0  ;;  %v4809_v1 = vld [vmem:[#allocation2 + $0x10c] sm:$0xf] }
 0x26c   :  { %2628 = vmatpush.bf16.msrb.mxu1 %v3807_v10 }
 0x26d   :  { %2552 = vmatmul.bf16.gmra.mxu3 %v6522_v61  ;;  %v2308_v4 = vpop.f32.mrf.mxu2 }
 0x26e   :  { %v2309_v26 = vadd.f32 %v2308_v4, %v5890_v51  ;;  %v2212_v18 = vpop.f32.mrf.mxu0 }
 0x26f   :  { %v2213_v19 = vadd.f32 %v2212_v18, %v5846_v43 }
 0x270   :  { %v2357_v22 = vpop.f32.mrf.mxu3  ;;  %v2261_v32 = vpop.f32.mrf.mxu1 }
 0x271   :  { %v5951_v58 = vadd.f32 %v2357_v22, %v2309_v26  ;;  %v2262_v34 = vadd.f32 %v2261_v32, %v2213_v19  ;;  %v3916_v22 = vld [vmem:[#allocation2 + $0x118] sm:$0xf0] }
 0x272   :  { %v3919_v19 = vor.u32 %v4809_v1, %v3916_v22  ;;  %v4044_v32 = vld [vmem:[#allocation2 + $0x218] sm:$0xf0] }
 0x273   :  { %v3002_v60 = vmax.f32 %v2262_v34, 0.0 }
 0x274   :  { %2678 = vmatpush.bf16.msrb.mxu2 %v3919_v19 }
 0x275   :  { %v2310_v33 = vpop.f32.mrf.mxu2  ;;  %v5953_v53 = vpack.c.bf16 %v3002_v60, %v2998_v40 }
 0x276   :  { %v2311_v39 = vadd.f32 %v2310_v33, %v5890_v51  ;;  %v2215_v8 = vpop.f32.mrf.mxu0  ;;  %v4841_v33 = vld [vmem:[#allocation2 + $0x20c] sm:$0xf] }
 0x277   :  { %6538 = vst [vmem:[#allocation37_spill] sm:$0xff] %v5953_v53  ;;  %v2216_v43 = vadd.f32 %v2215_v8, %v5855_v54  ;;  %v4047_v14 = vor.u32 %v4841_v33, %v4044_v32  ;;  %v3788_v8 = vld [vmem:[#allocation2 + $0x18] sm:$0xf0] }
 0x278   :  { %v2359_v4 = vpop.f32.mrf.mxu3  ;;  %v2264_v18 = vpop.f32.mrf.mxu1 }
 0x279   :  { %v5957_v15 = vadd.f32 %v2359_v4, %v2311_v39  ;;  %v2265_v26 = vadd.f32 %v2264_v18, %v2216_v43  ;;  %2410 = vmatmul.bf16.gmra.mxu0 %v5312_v56  ;;  %2727 = vmatpush.bf16.msrb.mxu3 %v4047_v14  ;;  %v4777_v4 = vld [vmem:[#allocation2 + $0xc] sm:$0xf] }
 0x27a   :  { %2508 = vmatmul.bf16.gmra.mxu2 %v5588_v48  ;;  %v3791_v18 = vor.u32 %v4777_v4, %v3788_v8  ;;  %v4284_v8 = vld [vmem:[#allocation2 + $0x3f8] sm:$0xf0] }
 0x27b   :  { %2459 = vmatmul.bf16.gmra.mxu1 %v5314_v57  ;;  %v3006_v1 = vmax.f32 %v2265_v26, 0.0  ;;  %v6541_v26 = vld [vmem:[#allocation39_spill] sm:$0xff] }
 0x27c   :  { %2629 = vmatpush.bf16.msrb.mxu1 %v3791_v18 }
 0x27d   :  { %2557 = vmatmul.bf16.gmra.mxu3 %v6525_v47  ;;  %v2313_v46 = vpop.f32.mrf.mxu2 }
 0x27e   :  { %v2314_v54 = vadd.f32 %v2313_v46, %v5890_v51  ;;  %v2217_v10 = vpop.f32.mrf.mxu0 }
 0x27f   :  { %v2218_v40 = vadd.f32 %v2217_v10, %v5859_v38 }
 0x280   :  { %v2362_v34 = vpop.f32.mrf.mxu3  ;;  %v2266_v60 = vpop.f32.mrf.mxu1 }
 0x281   :  { %v5965_v39 = vadd.f32 %v2362_v34, %v2314_v54  ;;  %v2267_v43 = vadd.f32 %v2266_v60, %v2218_v40  ;;  %v6540_v34 = vld [vmem:[#allocation22_spill] sm:$0xff]  ;;  %v4965_v40 = vld [vmem:[#allocation2 + $0x5ec] sm:$0xf]  ;;  %v4540_v60 = vld [vmem:[#allocation2 + $0x5f8] sm:$0xf0] }
 0x282   :  { %v4543_v4 = vor.u32 %v4965_v40, %v4540_v60  ;;  %v4933_v40 = vld [vmem:[#allocation2 + $0x4ec] sm:$0xf]  ;;  %v4412_v60 = vld [vmem:[#allocation2 + $0x4f8] sm:$0xf0] }
 0x283   :  { %v3010_v22 = vmax.f32 %v2267_v43, 0.0  ;;  %v4969_v43 = vld [vmem:[#allocation2 + $0x60c] sm:$0xf]  ;;  %v4415_v63 = vor.u32 %v4933_v40, %v4412_v60 }
 0x284   :  { %2867 = vmatpush.bf16.msra.mxu2 %v4543_v4 }
 0x285   :  { %v2315_v53 = vpop.f32.mrf.mxu2  ;;  %v5967_v33 = vpack.c.bf16 %v3010_v22, %v3006_v1  ;;  %v4556_v1 = vld [vmem:[#allocation2 + $0x618] sm:$0xf0]  ;;  %2818 = vmatpush.bf16.msra.mxu1 %v4415_v63 }
 0x286   :  { %v2316_v32 = vadd.f32 %v2315_v53, %v5890_v51  ;;  %v2220_v19 = vpop.f32.mrf.mxu0  ;;  %v4901_v53 = vld [vmem:[#allocation2 + $0x3ec] sm:$0xf]  ;;  %v4524_v63 = vld [vmem:[#allocation2 + $0x5d8] sm:$0xf0] }
 0x287   :  { %6539 = vst [vmem:[#allocation52_spill] sm:$0xff] %v5967_v33  ;;  %v2221_v38 = vadd.f32 %v2220_v19, %v5868_v16  ;;  %v4287_v16 = vor.u32 %v4901_v53, %v4284_v8  ;;  %v4559_v19 = vor.u32 %v4969_v43, %v4556_v1 }
 0x288   :  { %v2364_v46 = vpop.f32.mrf.mxu3  ;;  %v2269_v10 = vpop.f32.mrf.mxu1 }
 0x289   :  { %v5971_v14 = vadd.f32 %v2364_v46, %v2316_v32  ;;  %v2270_v54 = vadd.f32 %v2269_v10, %v2221_v38  ;;  %2415 = vmatmul.bf16.gmra.mxu0 %v5348_v17  ;;  %2923 = vmatpush.bf16.msra.mxu3 %v4559_v19  ;;  %v6544_v19 = vld [vmem:[#allocation26_spill] sm:$0xff] }
 0x28a   :  { %2513 = vmatmul.bf16.gmra.mxu2 %v6541_v26  ;;  %2769 = vmatpush.bf16.msra.mxu0 %v4287_v16 }
 0x28b   :  { %2464 = vmatmul.bf16.gmra.mxu1 %v6540_v34 }
 0x28d   :  { %2562 = vmatmul.bf16.gmra.mxu3 %v6528_v36  ;;  %v2318_v18 = vpop.f32.mrf.mxu2  ;;  %v3014_v36 = vmax.f32 %v2270_v54, 0.0  ;;  %v6545_v54 = vld [vmem:[#allocation42_spill] sm:$0xff] }
 0x28e   :  { %v2319_v22 = vadd.f32 %v2318_v18, %v5890_v51  ;;  %v2222_v46 = vpop.f32.mrf.mxu0 }
 0x28f   :  { %v2223_v38 = vadd.f32 %v2222_v46, %v5872_v31  ;;  %v6543_v46 = vld [vmem:[#allocation25_spill] sm:$0xff] }
 0x290   :  { %v2367_v32 = vpop.f32.mrf.mxu3  ;;  %v2271_v10 = vpop.f32.mrf.mxu1 }
 0x291   :  { %v5979_v33 = vadd.f32 %v2367_v32, %v2319_v22  ;;  %v2272_v23 = vadd.f32 %v2271_v10, %v2223_v38  ;;  %v4897_v38 = vld [vmem:[#allocation2 + $0x3cc] sm:$0xf]  ;;  %v4268_v10 = vld [vmem:[#allocation2 + $0x3d8] sm:$0xf0] }
 0x292   :  { %v4271_v60 = vor.u32 %v4897_v38, %v4268_v10 }
 0x293   :  { %v3018_v53 = vmax.f32 %v2272_v23, 0.0 }
 0x294   :  { %2770 = vmatpush.bf16.msra.mxu0 %v4271_v60 }
 0x295   :  { %v2320_v8 = vpop.f32.mrf.mxu2  ;;  %v5981_v18 = vpack.c.bf16 %v3018_v53, %v3014_v36  ;;  %v4961_v36 = vld [vmem:[#allocation2 + $0x5cc] sm:$0xf] }
 0x296   :  { %v2321_v4 = vadd.f32 %v2320_v8, %v5890_v51  ;;  %v2225_v1 = vpop.f32.mrf.mxu0  ;;  %v4527_v23 = vor.u32 %v4961_v36, %v4524_v63 }
 0x297   :  { %6542 = vst [vmem:[#allocation22_spill] sm:$0xff] %v5981_v18  ;;  %v2226_v31 = vadd.f32 %v2225_v1, %v5881_v7 }
 0x298   :  { %v2369_v43 = vpop.f32.mrf.mxu3  ;;  %v2274_v16 = vpop.f32.mrf.mxu1  ;;  %2868 = vmatpush.bf16.msra.mxu2 %v4527_v23 }
 0x299   :  { %v5985_v22 = vadd.f32 %v2369_v43, %v2321_v4  ;;  %v2275_v32 = vadd.f32 %v2274_v16, %v2226_v31  ;;  %2420 = vmatmul.bf16.gmra.mxu0 %v6543_v46  ;;  %v4929_v31 = vld [vmem:[#allocation2 + $0x4cc] sm:$0xf]  ;;  %v4396_v16 = vld [vmem:[#allocation2 + $0x4d8] sm:$0xf0] }
 0x29a   :  { %2518 = vmatmul.bf16.gmra.mxu2 %v6545_v54 }
 0x29b   :  { %2469 = vmatmul.bf16.gmra.mxu1 %v6544_v19  ;;  %v3022_v36 = vmax.f32 %v2275_v32, 0.0  ;;  %v4508_v32 = vld [vmem:[#allocation2 + $0x5b8] sm:$0xf0] }
 0x29d   :  { %2567 = vmatmul.bf16.gmra.mxu3 %v6531_v5  ;;  %v2323_v40 = vpop.f32.mrf.mxu2  ;;  %v4399_v5 = vor.u32 %v4929_v31, %v4396_v16 }
 0x29e   :  { %v2324_v7 = vadd.f32 %v2323_v40, %v5890_v51  ;;  %v2227_v8 = vpop.f32.mrf.mxu0 }
 0x29f   :  { %v2228_v4 = vadd.f32 %v2227_v8, %v5884_v37  ;;  %2819 = vmatpush.bf16.msra.mxu1 %v4399_v5  ;;  %v4957_v5 = vld [vmem:[#allocation2 + $0x5ac] sm:$0xf] }
 0x2a0   :  { %v2372_v53 = vpop.f32.mrf.mxu3  ;;  %v2276_v43 = vpop.f32.mrf.mxu1 }
 0x2a1   :  { %v5993_v1 = vadd.f32 %v2372_v53, %v2324_v7  ;;  %v2277_v18 = vadd.f32 %v2276_v43, %v2228_v4  ;;  %v6547_v53 = vld [vmem:[#allocation28_spill] sm:$0xff]  ;;  %v4252_v43 = vld [vmem:[#allocation2 + $0x3b8] sm:$0xf0] }
 0x2a2   :  { %v6548_v4 = vld [vmem:[#allocation8_spill] sm:$0xff] }
 0x2a3   :  { %v3026_v63 = vmax.f32 %v2277_v18, 0.0  ;;  %v6549_v18 = vld [vmem:[#allocation9_spill] sm:$0xff] }
 0x2a5   :  { %v2325_v54 = vpop.f32.mrf.mxu2  ;;  %v5995_v38 = vpack.c.bf16 %v3026_v63, %v3022_v36 }
 0x2a6   :  { %v2326_v10 = vadd.f32 %v2325_v54, %v5890_v51  ;;  %v2386_v23 = vpop.f32.mrf.mxu0  ;;  %v4893_v51 = vld [vmem:[#allocation2 + $0x3ac] sm:$0xf]  ;;  %v4511_v54 = vor.u32 %v4957_v5, %v4508_v32 }
 0x2a7   :  { %6546 = vst [vmem:[#allocation39_spill] sm:$0xff] %v5995_v38  ;;  %v2387_v37 = vadd.f32 %v2386_v23, %v5895_v0  ;;  %v4255_v0 = vor.u32 %v4893_v51, %v4252_v43 }
 0x2a8   :  { %v2374_v40 = vpop.f32.mrf.mxu3  ;;  %v2435_v8 = vpop.f32.mrf.mxu1  ;;  %2869 = vmatpush.bf16.msra.mxu2 %v4511_v54 }
 0x2a9   :  { %v5999_v60 = vadd.f32 %v2374_v40, %v2326_v10  ;;  %v2436_v7 = vadd.f32 %v2435_v8, %v2387_v37  ;;  %4576 = vmatmul.msk.bf16.vlgmr.msrb.gmra.mxu0 %vm1568_vm0, %v6547_v53  ;;  %v4925_v37 = vld [vmem:[#allocation2 + $0x4ac] sm:$0xf]  ;;  %v4380_v8 = vld [vmem:[#allocation2 + $0x4b8] sm:$0xf0] }
 0x2aa   :  { %2679 = vmatmul.bf16.vlgmr.msrb.gmra.mxu2 %v6549_v18  ;;  %2771 = vmatpush.bf16.msra.mxu0 %v4255_v0  ;;  %v6552_v0 = vld [vmem:[#allocation11_spill] sm:$0xff] }
 0x2ab   :  { %2630 = vmatmul.bf16.vlgmr.msrb.gmra.mxu1 %v6548_v4  ;;  %v4383_v4 = vor.u32 %v4925_v37, %v4380_v8 }
 0x2ad   :  { %2728 = vmatmul.bf16.vlgmr.msrb.gmra.mxu3 %v5132_v52  ;;  %v2484_v31 = vpop.f32.mrf.mxu2  ;;  %2820 = vmatpush.bf16.msra.mxu1 %v4383_v4 }
 0x2ae   :  { %v2485_v16 = vadd.f32 %v2484_v31, %v2436_v7  ;;  %v2388_v63 = vpop.f32.mrf.mxu0  ;;  %v6551_v31 = vld [vmem:[#allocation10_spill] sm:$0xff] }
 0x2af   :  { %v2389_v10 = vadd.f32 %v2388_v63, %v5901_v50  ;;  %v6550_v50 = vld [vmem:[#allocation30_spill] sm:$0xff]  ;;  %v4889_v63 = vld [vmem:[#allocation2 + $0x38c] sm:$0xf] }
 0x2b0   :  { %v2533_v36 = vpop.f32.mrf.mxu3  ;;  %v2437_v40 = vpop.f32.mrf.mxu1 }
 0x2b1   :  { %v6007_v23 = vadd.f32 %v2533_v36, %v2485_v16  ;;  %v2438_v52 = vadd.f32 %v2437_v40, %v2389_v10  ;;  %v4953_v16 = vld [vmem:[#allocation2 + $0x58c] sm:$0xf]  ;;  %v4492_v36 = vld [vmem:[#allocation2 + $0x598] sm:$0xf0] }
 0x2b2   :  { %v4495_v10 = vor.u32 %v4953_v16, %v4492_v36  ;;  %v4236_v40 = vld [vmem:[#allocation2 + $0x398] sm:$0xf0] }
 0x2b4   :  { %2870 = vmatpush.bf16.msra.mxu2 %v4495_v10 }
 0x2b5   :  { %v2486_v18 = vpop.f32.mrf.mxu2 }
 0x2b6   :  { %v2487_v5 = vadd.f32 %v2486_v18, %v2438_v52  ;;  %v2391_v38 = vpop.f32.mrf.mxu0 }
 0x2b7   :  { %v2392_v7 = vadd.f32 %v2391_v38, %v5909_v59  ;;  %v4239_v59 = vor.u32 %v4889_v63, %v4236_v40 }
 0x2b8   :  { %v2535_v32 = vpop.f32.mrf.mxu3  ;;  %v2440_v51 = vpop.f32.mrf.mxu1 }
 0x2b9   :  { %v6010_v43 = vadd.f32 %v2535_v32, %v2487_v5  ;;  %v2441_v54 = vadd.f32 %v2440_v51, %v2392_v7  ;;  %4577 = vmatmul.msk.bf16.gmra.mxu0 %vm1568_vm0, %v6550_v50  ;;  %v4921_v32 = vld [vmem:[#allocation2 + $0x48c] sm:$0xf]  ;;  %v4364_v7 = vld [vmem:[#allocation2 + $0x498] sm:$0xf0] }
 0x2ba   :  { %2684 = vmatmul.bf16.gmra.mxu2 %v6552_v0  ;;  %2772 = vmatpush.bf16.msra.mxu0 %v4239_v59  ;;  %v4367_v51 = vor.u32 %v4921_v32, %v4364_v7  ;;  %v6555_v59 = vld [vmem:[#allocation13_spill] sm:$0xff] }
 0x2bb   :  { %2635 = vmatmul.bf16.gmra.mxu1 %v6551_v31 }
 0x2bc   :  { %2821 = vmatpush.bf16.msra.mxu1 %v4367_v51 }
 0x2bd   :  { %2733 = vmatmul.bf16.gmra.mxu3 %v5168_v20  ;;  %v2489_v37 = vpop.f32.mrf.mxu2 }
 0x2be   :  { %v2490_v38 = vadd.f32 %v2489_v37, %v2441_v54  ;;  %v2393_v52 = vpop.f32.mrf.mxu0  ;;  %v6554_v37 = vld [vmem:[#allocation12_spill] sm:$0xff] }
 0x2bf   :  { %v2394_v4 = vadd.f32 %v2393_v52, %v5915_v9  ;;  %v6553_v9 = vld [vmem:[#allocation32_spill] sm:$0xff]  ;;  %v4885_v52 = vld [vmem:[#allocation2 + $0x36c] sm:$0xf] }
 0x2c0   :  { %v2538_v8 = vpop.f32.mrf.mxu3  ;;  %v2442_v18 = vpop.f32.mrf.mxu1 }
 0x2c1   :  { %v6018_v5 = vadd.f32 %v2538_v8, %v2490_v38  ;;  %v2443_v20 = vadd.f32 %v2442_v18, %v2394_v4  ;;  %v4949_v38 = vld [vmem:[#allocation2 + $0x56c] sm:$0xf]  ;;  %v4476_v8 = vld [vmem:[#allocation2 + $0x578] sm:$0xf0] }
 0x2c2   :  { %v4479_v4 = vor.u32 %v4949_v38, %v4476_v8  ;;  %v4220_v18 = vld [vmem:[#allocation2 + $0x378] sm:$0xf0] }
 0x2c4   :  { %2871 = vmatpush.bf16.msra.mxu2 %v4479_v4 }
 0x2c5   :  { %v2491_v31 = vpop.f32.mrf.mxu2 }
 0x2c6   :  { %v2492_v0 = vadd.f32 %v2491_v31, %v2443_v20  ;;  %v2396_v36 = vpop.f32.mrf.mxu0 }
 0x2c7   :  { %v2397_v54 = vadd.f32 %v2396_v36, %v5923_v29  ;;  %v4223_v29 = vor.u32 %v4885_v52, %v4220_v18  ;;  %v4917_v36 = vld [vmem:[#allocation2 + $0x46c] sm:$0xf] }
 0x2c8   :  { %v2540_v16 = vpop.f32.mrf.mxu3  ;;  %v2445_v63 = vpop.f32.mrf.mxu1 }
 0x2c9   :  { %v6021_v40 = vadd.f32 %v2540_v16, %v2492_v0  ;;  %v2446_v10 = vadd.f32 %v2445_v63, %v2397_v54  ;;  %4578 = vmatmul.msk.bf16.gmra.mxu0 %vm1568_vm0, %v6553_v9  ;;  %v4348_v54 = vld [vmem:[#allocation2 + $0x478] sm:$0xf0] }
 0x2ca   :  { %2689 = vmatmul.bf16.gmra.mxu2 %v6555_v59  ;;  %2773 = vmatpush.bf16.msra.mxu0 %v4223_v29  ;;  %v4351_v63 = vor.u32 %v4917_v36, %v4348_v54  ;;  %v6558_v29 = vld [vmem:[#allocation15_spill] sm:$0xff] }
 0x2cb   :  { %2640 = vmatmul.bf16.gmra.mxu1 %v6554_v37 }
 0x2cc   :  { %2822 = vmatpush.bf16.msra.mxu1 %v4351_v63 }
 0x2cd   :  { %2738 = vmatmul.bf16.gmra.mxu3 %v5204_v41  ;;  %v2494_v32 = vpop.f32.mrf.mxu2 }
 0x2ce   :  { %v2495_v7 = vadd.f32 %v2494_v32, %v2446_v10  ;;  %v2398_v51 = vpop.f32.mrf.mxu0  ;;  %v6557_v32 = vld [vmem:[#allocation14_spill] sm:$0xff] }
 0x2cf   :  { %v2399_v31 = vadd.f32 %v2398_v51, %v5929_v24  ;;  %v6556_v24 = vld [vmem:[#allocation34_spill] sm:$0xff]  ;;  %v4881_v51 = vld [vmem:[#allocation2 + $0x34c] sm:$0xf] }
 0x2d0   :  { %v2543_v20 = vpop.f32.mrf.mxu3  ;;  %v2447_v0 = vpop.f32.mrf.mxu1 }
 0x2d1   :  { %v6029_v16 = vadd.f32 %v2543_v20, %v2495_v7  ;;  %v2448_v41 = vadd.f32 %v2447_v0, %v2399_v31  ;;  %v4945_v7 = vld [vmem:[#allocation2 + $0x54c] sm:$0xf]  ;;  %v4460_v20 = vld [vmem:[#allocation2 + $0x558] sm:$0xf0] }
 0x2d2   :  { %v4463_v31 = vor.u32 %v4945_v7, %v4460_v20  ;;  %v4204_v0 = vld [vmem:[#allocation2 + $0x358] sm:$0xf0] }
 0x2d4   :  { %2872 = vmatpush.bf16.msra.mxu2 %v4463_v31 }
 0x2d5   :  { %v2496_v37 = vpop.f32.mrf.mxu2 }
 0x2d6   :  { %v2497_v59 = vadd.f32 %v2496_v37, %v2448_v41  ;;  %v2401_v8 = vpop.f32.mrf.mxu0 }
 0x2d7   :  { %v2402_v10 = vadd.f32 %v2401_v8, %v5937_v13  ;;  %v4207_v13 = vor.u32 %v4881_v51, %v4204_v0  ;;  %v4913_v8 = vld [vmem:[#allocation2 + $0x44c] sm:$0xf] }
 0x2d8   :  { %v2545_v38 = vpop.f32.mrf.mxu3  ;;  %v2450_v52 = vpop.f32.mrf.mxu1 }
 0x2d9   :  { %v6032_v18 = vadd.f32 %v2545_v38, %v2497_v59  ;;  %v2451_v4 = vadd.f32 %v2450_v52, %v2402_v10  ;;  %4579 = vmatmul.msk.bf16.gmra.mxu0 %vm1568_vm0, %v6556_v24  ;;  %v4332_v10 = vld [vmem:[#allocation2 + $0x458] sm:$0xf0] }
 0x2da   :  { %2694 = vmatmul.bf16.gmra.mxu2 %v6558_v29  ;;  %2774 = vmatpush.bf16.msra.mxu0 %v4207_v13  ;;  %v4335_v52 = vor.u32 %v4913_v8, %v4332_v10  ;;  %v6561_v13 = vld [vmem:[#allocation17_spill] sm:$0xff] }
 0x2db   :  { %2645 = vmatmul.bf16.gmra.mxu1 %v6557_v32 }
 0x2dc   :  { %2823 = vmatpush.bf16.msra.mxu1 %v4335_v52 }
 0x2dd   :  { %2743 = vmatmul.bf16.gmra.mxu3 %v5240_v2  ;;  %v2499_v36 = vpop.f32.mrf.mxu2 }
 0x2de   :  { %v2500_v54 = vadd.f32 %v2499_v36, %v2451_v4  ;;  %v2403_v63 = vpop.f32.mrf.mxu0  ;;  %v6560_v36 = vld [vmem:[#allocation16_spill] sm:$0xff] }
 0x2df   :  { %v2404_v37 = vadd.f32 %v2403_v63, %v5943_v30  ;;  %v6559_v30 = vld [vmem:[#allocation36_spill] sm:$0xff]  ;;  %v4877_v63 = vld [vmem:[#allocation2 + $0x32c] sm:$0xf] }
 0x2e0   :  { %v2548_v41 = vpop.f32.mrf.mxu3  ;;  %v2452_v59 = vpop.f32.mrf.mxu1 }
 0x2e1   :  { %v6040_v38 = vadd.f32 %v2548_v41, %v2500_v54  ;;  %v2453_v2 = vadd.f32 %v2452_v59, %v2404_v37  ;;  %v4941_v54 = vld [vmem:[#allocation2 + $0x52c] sm:$0xf]  ;;  %v4444_v41 = vld [vmem:[#allocation2 + $0x538] sm:$0xf0] }
 0x2e2   :  { %v4447_v37 = vor.u32 %v4941_v54, %v4444_v41  ;;  %v4188_v59 = vld [vmem:[#allocation2 + $0x338] sm:$0xf0] }
 0x2e4   :  { %2873 = vmatpush.bf16.msra.mxu2 %v4447_v37 }
 0x2e5   :  { %v2501_v32 = vpop.f32.mrf.mxu2 }
 0x2e6   :  { %v2502_v29 = vadd.f32 %v2501_v32, %v2453_v2  ;;  %v2406_v20 = vpop.f32.mrf.mxu0 }
 0x2e7   :  { %v2407_v4 = vadd.f32 %v2406_v20, %v5951_v58  ;;  %v4191_v58 = vor.u32 %v4877_v63, %v4188_v59  ;;  %v4909_v20 = vld [vmem:[#allocation2 + $0x42c] sm:$0xf] }
 0x2e8   :  { %v2550_v7 = vpop.f32.mrf.mxu3  ;;  %v2455_v51 = vpop.f32.mrf.mxu1 }
 0x2e9   :  { %v6043_v0 = vadd.f32 %v2550_v7, %v2502_v29  ;;  %v2456_v31 = vadd.f32 %v2455_v51, %v2407_v4  ;;  %4580 = vmatmul.msk.bf16.gmra.mxu0 %vm1568_vm0, %v6559_v30  ;;  %v4316_v4 = vld [vmem:[#allocation2 + $0x438] sm:$0xf0] }
 0x2ea   :  { %2699 = vmatmul.bf16.gmra.mxu2 %v6561_v13  ;;  %2775 = vmatpush.bf16.msra.mxu0 %v4191_v58  ;;  %v4319_v51 = vor.u32 %v4909_v20, %v4316_v4  ;;  %v6564_v58 = vld [vmem:[#allocation19_spill] sm:$0xff] }
 0x2eb   :  { %2650 = vmatmul.bf16.gmra.mxu1 %v6560_v36 }
 0x2ec   :  { %2824 = vmatpush.bf16.msra.mxu1 %v4319_v51 }
 0x2ed   :  { %2748 = vmatmul.bf16.gmra.mxu3 %v5276_v27  ;;  %v2504_v8 = vpop.f32.mrf.mxu2 }
 0x2ee   :  { %v2505_v10 = vadd.f32 %v2504_v8, %v2456_v31  ;;  %v2408_v52 = vpop.f32.mrf.mxu0  ;;  %v6563_v8 = vld [vmem:[#allocation18_spill] sm:$0xff] }
 0x2ef   :  { %v2409_v32 = vadd.f32 %v2408_v52, %v5957_v15  ;;  %v6562_v15 = vld [vmem:[#allocation38_spill] sm:$0xff]  ;;  %v4873_v52 = vld [vmem:[#allocation2 + $0x30c] sm:$0xf] }
 0x2f0   :  { %v2553_v2 = vpop.f32.mrf.mxu3  ;;  %v2457_v29 = vpop.f32.mrf.mxu1 }
 0x2f1   :  { %v6051_v7 = vadd.f32 %v2553_v2, %v2505_v10  ;;  %v2458_v27 = vadd.f32 %v2457_v29, %v2409_v32  ;;  %v4937_v10 = vld [vmem:[#allocation2 + $0x50c] sm:$0xf]  ;;  %v4428_v2 = vld [vmem:[#allocation2 + $0x518] sm:$0xf0] }
 0x2f2   :  { %v4431_v32 = vor.u32 %v4937_v10, %v4428_v2  ;;  %v4172_v29 = vld [vmem:[#allocation2 + $0x318] sm:$0xf0] }
 0x2f4   :  { %2874 = vmatpush.bf16.msra.mxu2 %v4431_v32 }
 0x2f5   :  { %v2506_v36 = vpop.f32.mrf.mxu2 }
 0x2f6   :  { %v2507_v13 = vadd.f32 %v2506_v36, %v2458_v27  ;;  %v2411_v41 = vpop.f32.mrf.mxu0 }
 0x2f7   :  { %v2412_v31 = vadd.f32 %v2411_v41, %v5965_v39  ;;  %v4175_v39 = vor.u32 %v4873_v52, %v4172_v29  ;;  %v4905_v41 = vld [vmem:[#allocation2 + $0x40c] sm:$0xf] }
 0x2f8   :  { %v2555_v54 = vpop.f32.mrf.mxu3  ;;  %v2460_v63 = vpop.f32.mrf.mxu1 }
 0x2f9   :  { %v6054_v59 = vadd.f32 %v2555_v54, %v2507_v13  ;;  %v2461_v37 = vadd.f32 %v2460_v63, %v2412_v31  ;;  %4581 = vmatmul.msk.bf16.gmra.mxu0 %vm1568_vm0, %v6562_v15  ;;  %v4300_v31 = vld [vmem:[#allocation2 + $0x418] sm:$0xf0] }
 0x2fa   :  { %2704 = vmatmul.bf16.gmra.mxu2 %v6564_v58  ;;  %2776 = vmatpush.bf16.msra.mxu0 %v4175_v39  ;;  %v4303_v63 = vor.u32 %v4905_v41, %v4300_v31  ;;  %v6567_v39 = vld [vmem:[#allocation21_spill] sm:$0xff] }
 0x2fb   :  { %2655 = vmatmul.bf16.gmra.mxu1 %v6563_v8 }
 0x2fc   :  { %2825 = vmatpush.bf16.msra.mxu1 %v4303_v63 }
 0x2fd   :  { %2753 = vmatmul.bf16.gmra.mxu3 %v5312_v56  ;;  %v2509_v20 = vpop.f32.mrf.mxu2 }
 0x2fe   :  { %v2510_v4 = vadd.f32 %v2509_v20, %v2461_v37  ;;  %v2413_v51 = vpop.f32.mrf.mxu0  ;;  %v6566_v20 = vld [vmem:[#allocation20_spill] sm:$0xff] }
 0x2ff   :  { %v2414_v36 = vadd.f32 %v2413_v51, %v5971_v14  ;;  %v6565_v14 = vld [vmem:[#allocation41_spill] sm:$0xff] }
 0x300   :  { %v2558_v27 = vpop.f32.mrf.mxu3  ;;  %v2462_v13 = vpop.f32.mrf.mxu1 }
 0x301   :  { %v6062_v54 = vadd.f32 %v2558_v27, %v2510_v4  ;;  %v2463_v56 = vadd.f32 %v2462_v13, %v2414_v36 }
 0x305   :  { %v2511_v8 = vpop.f32.mrf.mxu2 }
 0x306   :  { %v2512_v58 = vadd.f32 %v2511_v8, %v2463_v56  ;;  %v2416_v2 = vpop.f32.mrf.mxu0 }
 0x307   :  { %v2417_v37 = vadd.f32 %v2416_v2, %v5979_v33 }
 0x308   :  { %v2560_v10 = vpop.f32.mrf.mxu3  ;;  %v2465_v52 = vpop.f32.mrf.mxu1 }
 0x309   :  { %v6065_v29 = vadd.f32 %v2560_v10, %v2512_v58  ;;  %v2466_v32 = vadd.f32 %v2465_v52, %v2417_v37  ;;  %4582 = vmatmul.msk.bf16.gmra.mxu0 %vm1568_vm0, %v6565_v14  ;;  %v6568_v52 = vld [vmem:[#allocation44_spill] sm:$0xff] }
 0x30a   :  { %2709 = vmatmul.bf16.gmra.mxu2 %v6567_v39 }
 0x30b   :  { %2660 = vmatmul.bf16.gmra.mxu1 %v6566_v20  ;;  %v4995_v20 = vld [vmem:[%s6388_s3 + $0xb8] sm:$0xff] }
 0x30c   :  { %3419 = vmatpush.bf16.msrb.mxu2 %v4995_v20 }
 0x30d   :  { %2758 = vmatmul.bf16.gmra.mxu3 %v5348_v17  ;;  %v2514_v4 = vpop.f32.mrf.mxu2 }
 0x30e   :  { %v2515_v27 = vadd.f32 %v2514_v4, %v2466_v32  ;;  %v2418_v36 = vpop.f32.mrf.mxu0  ;;  %v6569_v32 = vld [vmem:[#allocation23_spill] sm:$0xff] }
 0x30f   :  { %v2419_v13 = vadd.f32 %v2418_v36, %v5985_v22  ;;  %v6570_v22 = vld [vmem:[#allocation24_spill] sm:$0xff] }
 0x310   :  { %v2563_v51 = vpop.f32.mrf.mxu3  ;;  %v2467_v33 = vpop.f32.mrf.mxu1 }
 0x311   :  { %v6073_v41 = vadd.f32 %v2563_v51, %v2515_v27  ;;  %v2468_v31 = vadd.f32 %v2467_v33, %v2419_v13  ;;  %v4979_v33 = vld [vmem:[%s6388_s3 + $0x38] sm:$0xff] }
 0x312   :  { %3321 = vmatpush.bf16.msrb.mxu0 %v4979_v33 }
 0x315   :  { %v2516_v56 = vpop.f32.mrf.mxu2 }
 0x316   :  { %v2517_v63 = vadd.f32 %v2516_v56, %v2468_v31  ;;  %v2421_v58 = vpop.f32.mrf.mxu0  ;;  %v4987_v56 = vld [vmem:[%s6388_s3 + $0x78] sm:$0xff] }
 0x317   :  { %v2422_v10 = vadd.f32 %v2421_v58, %v5993_v1  ;;  %3370 = vmatpush.bf16.msrb.mxu1 %v4987_v56 }
 0x318   :  { %v2565_v8 = vpop.f32.mrf.mxu3  ;;  %v2470_v2 = vpop.f32.mrf.mxu1 }
 0x319   :  { %v6076_v37 = vadd.f32 %v2565_v8, %v2517_v63  ;;  %v2471_v17 = vadd.f32 %v2470_v2, %v2422_v10  ;;  %4583 = vmatmul.msk.bf16.gmra.mxu0 %vm1568_vm0, %v6568_v52  ;;  %v5012_v10 = vld [vmem:[%s6387_s2] sm:$0xf] }
 0x31a   :  { %2714 = vmatmul.bf16.gmra.mxu2 %v6570_v22  ;;  %v6101_v2 = vperm.slane %v5012_v10, 3 }
 0x31b   :  { %2665 = vmatmul.bf16.gmra.mxu1 %v6569_v32 }
 0x31d   :  { %2763 = vmatmul.bf16.gmra.mxu3 %v6543_v46  ;;  %v2519_v39 = vpop.f32.mrf.mxu2  ;;  %v5003_v46 = vld [vmem:[%s6388_s3 + $0xf8] sm:$0xff] }
 0x31e   :  { %v2520_v1 = vadd.f32 %v2519_v39, %v2471_v17  ;;  %v2423_v27 = vpop.f32.mrf.mxu0  ;;  %3468 = vmatpush.bf16.msrb.mxu3 %v5003_v46  ;;  %v4994_v39 = vld [vmem:[%s6388_s3 + $0xb0] sm:$0xff] }
 0x31f   :  { %v2424_v51 = vadd.f32 %v2423_v27, %v5999_v60  ;;  %3420 = vmatpush.bf16.msrb.mxu2 %v4994_v39  ;;  %v4986_v46 = vld [vmem:[%s6388_s3 + $0x70] sm:$0xff] }
 0x320   :  { %v2568_v4 = vpop.f32.mrf.mxu3  ;;  %v2472_v36 = vpop.f32.mrf.mxu1  ;;  %3371 = vmatpush.bf16.msrb.mxu1 %v4986_v46 }
 0x321   :  { %v6087_v13 = vadd.f32 %v2568_v4, %v2520_v1  ;;  %v2473_v31 = vadd.f32 %v2472_v36, %v2424_v51 }
 0x325   :  { %v2521_v60 = vpop.f32.mrf.mxu2 }
 0x326   :  { %v2522_v63 = vadd.f32 %v2521_v60, %v2473_v31  ;;  %v2582_v58 = vpop.f32.mrf.mxu0 }
 0x327   :  { %v2583_v17 = vadd.f32 %v2582_v58, %v6007_v23 }
 0x328   :  { %v2570_v8 = vpop.f32.mrf.mxu3  ;;  %v2631_v32 = vpop.f32.mrf.mxu1 }
 0x329   :  { %v6104_v22 = vadd.f32 %v2570_v8, %v2522_v63  ;;  %2777 = vmatmul.bf16.vlgmr.msra.gmra.mxu0 %v5134_v55  ;;  %v2632_v20 = vadd.f32 %v2631_v32, %v6101_v2 }
 0x32a   :  { %2875 = vmatmul.bf16.vlgmr.msra.gmra.mxu2 %v6509_v12  ;;  %v5002_v12 = vld [vmem:[%s6388_s3 + $0xf0] sm:$0xff] }
 0x32b   :  { %2826 = vmatmul.bf16.vlgmr.msra.gmra.mxu1 %v5415_v35  ;;  %v4978_v35 = vld [vmem:[%s6388_s3 + $0x30] sm:$0xff]  ;;  %3469 = vmatpush.bf16.msrb.mxu3 %v5002_v12 }
 0x32c   :  { %3322 = vmatpush.bf16.msrb.mxu0 %v4978_v35 }
 0x32d   :  { %4584 = vmatmul.msk.bf16.vlgmr.msra.gmra.mxu3 %vm1568_vm0, %v6547_v53  ;;  %v2680_v1 = vpop.f32.mrf.mxu2  ;;  %v2967_v53 = vmax.f32 %v2583_v17, 0.0 }
 0x32e   :  { %v2681_v23 = vadd.f32 %v2680_v1, %v2632_v20  ;;  %v2584_v27 = vpop.f32.mrf.mxu0  ;;  %v4993_v20 = vld [vmem:[%s6388_s3 + $0xa8] sm:$0xff] }
 0x32f   :  { %v2585_v55 = vadd.f32 %v2584_v27, %v6010_v43  ;;  %3421 = vmatpush.bf16.msrb.mxu2 %v4993_v20 }
 0x330   :  { %v2729_v4 = vpop.f32.mrf.mxu3  ;;  %v2633_v51 = vpop.f32.mrf.mxu1 }
 0x331   :  { %v6116_v36 = vadd.f32 %v2729_v4, %v2681_v23  ;;  %v2971_v33 = vmax.f32 %v2585_v55, 0.0  ;;  %v2634_v31 = vadd.f32 %v2633_v51, %v6101_v2  ;;  %v4985_v51 = vld [vmem:[%s6388_s3 + $0x68] sm:$0xff] }
 0x332   :  { %3372 = vmatpush.bf16.msrb.mxu1 %v4985_v51 }
 0x333   :  { %v6127_v43 = vpack.c.bf16 %v2971_v33, %v2967_v53 }
 0x335   :  { %v2682_v56 = vpop.f32.mrf.mxu2 }
 0x336   :  { %v2683_v60 = vadd.f32 %v2682_v56, %v2634_v31  ;;  %v2587_v8 = vpop.f32.mrf.mxu0 }
 0x337   :  { %v2588_v58 = vadd.f32 %v2587_v8, %v6018_v5  ;;  %v4992_v8 = vld [vmem:[%s6388_s3 + $0xa0] sm:$0xff] }
 0x338   :  { %v2731_v63 = vpop.f32.mrf.mxu3  ;;  %v2636_v10 = vpop.f32.mrf.mxu1  ;;  %3422 = vmatpush.bf16.msrb.mxu2 %v4992_v8  ;;  %v4983_v8 = vld [vmem:[%s6388_s3 + $0x58] sm:$0xff] }
 0x339   :  { %v6131_v17 = vadd.f32 %v2731_v63, %v2683_v60  ;;  %2782 = vmatmul.bf16.gmra.mxu0 %v5170_v21  ;;  %v2637_v32 = vadd.f32 %v2636_v10, %v6101_v2 }
 0x33a   :  { %2880 = vmatmul.bf16.gmra.mxu2 %v6513_v25  ;;  %v5001_v25 = vld [vmem:[%s6388_s3 + $0xe8] sm:$0xff] }
 0x33b   :  { %2831 = vmatmul.bf16.gmra.mxu1 %v5448_v45  ;;  %v4977_v45 = vld [vmem:[%s6388_s3 + $0x28] sm:$0xff]  ;;  %3470 = vmatpush.bf16.msrb.mxu3 %v5001_v25 }
 0x33c   :  { %3323 = vmatpush.bf16.msrb.mxu0 %v4977_v45 }
 0x33d   :  { %4585 = vmatmul.msk.bf16.gmra.mxu3 %vm1568_vm0, %v6550_v50  ;;  %v2685_v39 = vpop.f32.mrf.mxu2  ;;  %v2975_v50 = vmax.f32 %v2588_v58, 0.0 }
 0x33e   :  { %v2686_v5 = vadd.f32 %v2685_v39, %v2637_v32  ;;  %v2589_v23 = vpop.f32.mrf.mxu0 }
 0x33f   :  { %v2590_v21 = vadd.f32 %v2589_v23, %v6021_v40 }
 0x340   :  { %v2734_v1 = vpop.f32.mrf.mxu3  ;;  %v2638_v4 = vpop.f32.mrf.mxu1 }
 0x341   :  { %v6143_v27 = vadd.f32 %v2734_v1, %v2686_v5  ;;  %v2979_v55 = vmax.f32 %v2590_v21, 0.0  ;;  %v2639_v35 = vadd.f32 %v2638_v4, %v6101_v2  ;;  %v4984_v1 = vld [vmem:[%s6388_s3 + $0x60] sm:$0xff] }
 0x342   :  { %3373 = vmatpush.bf16.msrb.mxu1 %v4984_v1 }
 0x343   :  { %v6154_v40 = vpack.c.bf16 %v2979_v55, %v2975_v50 }
 0x345   :  { %v2687_v12 = vpop.f32.mrf.mxu2 }
 0x346   :  { %v2688_v53 = vadd.f32 %v2687_v12, %v2639_v35  ;;  %v2592_v46 = vpop.f32.mrf.mxu0  ;;  %v4991_v12 = vld [vmem:[%s6388_s3 + $0x98] sm:$0xff]  ;;  %3374 = vmatpush.bf16.msrb.mxu1 %v4983_v8 }
 0x347   :  { %v2593_v31 = vadd.f32 %v2592_v46, %v6029_v16  ;;  %3423 = vmatpush.bf16.msrb.mxu2 %v4991_v12 }
 0x348   :  { %v2736_v33 = vpop.f32.mrf.mxu3  ;;  %v2641_v56 = vpop.f32.mrf.mxu1 }
 0x349   :  { %v6158_v60 = vadd.f32 %v2736_v33, %v2688_v53  ;;  %2787 = vmatmul.bf16.gmra.mxu0 %v5206_v42  ;;  %v2642_v63 = vadd.f32 %v2641_v56, %v6101_v2 }
 0x34a   :  { %2885 = vmatmul.bf16.gmra.mxu2 %v6516_v44  ;;  %v5000_v44 = vld [vmem:[%s6388_s3 + $0xe0] sm:$0xff] }
 0x34b   :  { %2836 = vmatmul.bf16.gmra.mxu1 %v5483_v11  ;;  %v4976_v11 = vld [vmem:[%s6388_s3 + $0x20] sm:$0xff]  ;;  %3471 = vmatpush.bf16.msrb.mxu3 %v5000_v44 }
 0x34c   :  { %3324 = vmatpush.bf16.msrb.mxu0 %v4976_v11 }
 0x34d   :  { %4586 = vmatmul.msk.bf16.gmra.mxu3 %vm1568_vm0, %v6553_v9  ;;  %v2690_v58 = vpop.f32.mrf.mxu2  ;;  %v2983_v9 = vmax.f32 %v2593_v31, 0.0 }
 0x34e   :  { %v2691_v16 = vadd.f32 %v2690_v58, %v2642_v63  ;;  %v2594_v32 = vpop.f32.mrf.mxu0 }
 0x34f   :  { %v2595_v42 = vadd.f32 %v2594_v32, %v6032_v18 }
 0x350   :  { %v2739_v10 = vpop.f32.mrf.mxu3  ;;  %v2643_v20 = vpop.f32.mrf.mxu1 }
 0x351   :  { %v6170_v39 = vadd.f32 %v2739_v10, %v2691_v16  ;;  %v2987_v5 = vmax.f32 %v2595_v42, 0.0  ;;  %v2644_v23 = vadd.f32 %v2643_v20, %v6101_v2 }
 0x353   :  { %v6181_v18 = vpack.c.bf16 %v2987_v5, %v2983_v9  ;;  %v4990_v5 = vld [vmem:[%s6388_s3 + $0x90] sm:$0xff] }
 0x354   :  { %3424 = vmatpush.bf16.msrb.mxu2 %v4990_v5  ;;  %v4980_v5 = vld [vmem:[%s6388_s3 + $0x40] sm:$0xff] }
 0x355   :  { %v2692_v21 = vpop.f32.mrf.mxu2 }
 0x356   :  { %v2693_v4 = vadd.f32 %v2692_v21, %v2644_v23  ;;  %v2597_v25 = vpop.f32.mrf.mxu0 }
 0x357   :  { %v2598_v50 = vadd.f32 %v2597_v25, %v6040_v38 }
 0x358   :  { %v2741_v45 = vpop.f32.mrf.mxu3  ;;  %v2646_v55 = vpop.f32.mrf.mxu1 }
 0x359   :  { %v6185_v51 = vadd.f32 %v2741_v45, %v2693_v4  ;;  %2792 = vmatmul.bf16.gmra.mxu0 %v5242_v3  ;;  %v2647_v35 = vadd.f32 %v2646_v55, %v6101_v2 }
 0x35a   :  { %2890 = vmatmul.bf16.gmra.mxu2 %v6519_v62  ;;  %v4999_v62 = vld [vmem:[%s6388_s3 + $0xd8] sm:$0xff] }
 0x35b   :  { %2841 = vmatmul.bf16.gmra.mxu1 %v5518_v6  ;;  %v4975_v6 = vld [vmem:[%s6388_s3 + $0x18] sm:$0xff]  ;;  %3472 = vmatpush.bf16.msrb.mxu3 %v4999_v62 }
 0x35c   :  { %3325 = vmatpush.bf16.msrb.mxu0 %v4975_v6 }
 0x35d   :  { %4587 = vmatmul.msk.bf16.gmra.mxu3 %vm1568_vm0, %v6556_v24  ;;  %v2695_v53 = vpop.f32.mrf.mxu2  ;;  %v2991_v24 = vmax.f32 %v2598_v50, 0.0  ;;  %v4982_v50 = vld [vmem:[%s6388_s3 + $0x50] sm:$0xff] }
 0x35e   :  { %v2696_v38 = vadd.f32 %v2695_v53, %v2647_v35  ;;  %v2599_v46 = vpop.f32.mrf.mxu0  ;;  %3375 = vmatpush.bf16.msrb.mxu1 %v4982_v50 }
 0x35f   :  { %v2600_v3 = vadd.f32 %v2599_v46, %v6043_v0 }
 0x360   :  { %v2744_v33 = vpop.f32.mrf.mxu3  ;;  %v2648_v31 = vpop.f32.mrf.mxu1 }
 0x361   :  { %v6197_v56 = vadd.f32 %v2744_v33, %v2696_v38  ;;  %v2995_v63 = vmax.f32 %v2600_v3, 0.0  ;;  %v2649_v58 = vadd.f32 %v2648_v31, %v6101_v2  ;;  %v4989_v31 = vld [vmem:[%s6388_s3 + $0x88] sm:$0xff] }
 0x362   :  { %3425 = vmatpush.bf16.msrb.mxu2 %v4989_v31 }
 0x363   :  { %v6208_v0 = vpack.c.bf16 %v2995_v63, %v2991_v24 }
 0x365   :  { %v2697_v16 = vpop.f32.mrf.mxu2 }
 0x366   :  { %v2698_v10 = vadd.f32 %v2697_v16, %v2649_v58  ;;  %v2602_v42 = vpop.f32.mrf.mxu0  ;;  %v4981_v16 = vld [vmem:[%s6388_s3 + $0x48] sm:$0xff] }
 0x367   :  { %v2603_v20 = vadd.f32 %v2602_v42, %v6051_v7  ;;  %3376 = vmatpush.bf16.msrb.mxu1 %v4981_v16 }
 0x368   :  { %v2746_v32 = vpop.f32.mrf.mxu3  ;;  %v2651_v11 = vpop.f32.mrf.mxu1 }
 0x369   :  { %v6212_v44 = vadd.f32 %v2746_v32, %v2698_v10  ;;  %2797 = vmatmul.bf16.gmra.mxu0 %v5278_v28  ;;  %v2652_v9 = vadd.f32 %v2651_v11, %v6101_v2 }
 0x36a   :  { %2895 = vmatmul.bf16.gmra.mxu2 %v6522_v61  ;;  %v4998_v61 = vld [vmem:[%s6388_s3 + $0xd0] sm:$0xff] }
 0x36b   :  { %2846 = vmatmul.bf16.gmra.mxu1 %v5553_v49  ;;  %v4974_v49 = vld [vmem:[%s6388_s3 + $0x10] sm:$0xff]  ;;  %3473 = vmatpush.bf16.msrb.mxu3 %v4998_v61 }
 0x36c   :  { %3326 = vmatpush.bf16.msrb.mxu0 %v4974_v49  ;;  %3377 = vmatpush.bf16.msrb.mxu1 %v4980_v5 }
 0x36d   :  { %4588 = vmatmul.msk.bf16.gmra.mxu3 %vm1568_vm0, %v6559_v30  ;;  %v2700_v1 = vpop.f32.mrf.mxu2  ;;  %v2999_v30 = vmax.f32 %v2603_v20, 0.0 }
 0x36e   :  { %v2701_v7 = vadd.f32 %v2700_v1, %v2652_v9  ;;  %v2604_v21 = vpop.f32.mrf.mxu0  ;;  %v4972_v9 = vld [vmem:[%s6388_s3] sm:$0xff] }
 0x36f   :  { %v2605_v28 = vadd.f32 %v2604_v21, %v6054_v59  ;;  %v4988_v1 = vld [vmem:[%s6388_s3 + $0x80] sm:$0xff] }
 0x370   :  { %v2749_v23 = vpop.f32.mrf.mxu3  ;;  %v2653_v4 = vpop.f32.mrf.mxu1  ;;  %3426 = vmatpush.bf16.msrb.mxu2 %v4988_v1  ;;  %v6574_v1 = vld [vmem:[#allocation45_spill] sm:$0xff] }
 0x371   :  { %v6224_v45 = vadd.f32 %v2749_v23, %v2701_v7  ;;  %v3003_v25 = vmax.f32 %v2605_v28, 0.0  ;;  %v2654_v55 = vadd.f32 %v2653_v4, %v6101_v2  ;;  %v6571_v28 = vld [vmem:[#allocation40_spill] sm:$0xff] }
 0x373   :  { %v6235_v59 = vpack.c.bf16 %v3003_v25, %v2999_v30 }
 0x375   :  { %v2702_v35 = vpop.f32.mrf.mxu2 }
 0x376   :  { %v6238_v12 = vadd.f32 %v2702_v35, %v2654_v55  ;;  %v2607_v38 = vpop.f32.mrf.mxu0 }
 0x377   :  { %v2608_v33 = vadd.f32 %v2607_v38, %v6062_v54 }
 0x378   :  { %v6240_v53 = vpop.f32.mrf.mxu3  ;;  %v2656_v46 = vpop.f32.mrf.mxu1 }
 0x379   :  { %2802 = vmatmul.bf16.gmra.mxu0 %v5314_v57  ;;  %v2657_v3 = vadd.f32 %v2656_v46, %v6101_v2 }
 0x37a   :  { %2900 = vmatmul.bf16.gmra.mxu2 %v6525_v47  ;;  %v4997_v47 = vld [vmem:[%s6388_s3 + $0xc8] sm:$0xff] }
 0x37b   :  { %2851 = vmatmul.bf16.gmra.mxu1 %v5588_v48  ;;  %v4973_v48 = vld [vmem:[%s6388_s3 + $0x8] sm:$0xff]  ;;  %3474 = vmatpush.bf16.msrb.mxu3 %v4997_v47 }
 0x37c   :  { %3327 = vmatpush.bf16.msrb.mxu0 %v4973_v48 }
 0x37d   :  { %4589 = vmatmul.msk.bf16.gmra.mxu3 %vm1568_vm0, %v6562_v15  ;;  %v2705_v6 = vpop.f32.mrf.mxu2  ;;  %v3007_v15 = vmax.f32 %v2608_v33, 0.0 }
 0x37e   :  { %v2706_v62 = vadd.f32 %v2705_v6, %v2657_v3  ;;  %v2609_v24 = vpop.f32.mrf.mxu0 }
 0x37f   :  { %v2610_v57 = vadd.f32 %v2609_v24, %v6065_v29 }
 0x380   :  { %v2754_v54 = vpop.f32.mrf.mxu3  ;;  %v2658_v63 = vpop.f32.mrf.mxu1  ;;  %3328 = vmatpush.bf16.msrb.mxu0 %v4972_v9 }
 0x381   :  { %v6253_v8 = vadd.f32 %v2754_v54, %v2706_v62  ;;  %v3011_v58 = vmax.f32 %v2610_v57, 0.0  ;;  %v2659_v10 = vadd.f32 %v2658_v63, %v6101_v2  ;;  %v6572_v62 = vld [vmem:[#allocation42_spill] sm:$0xff]  ;;  %v6573_v54 = vld [vmem:[#allocation43_spill] sm:$0xff] }
 0x383   :  { %v6264_v29 = vpack.c.bf16 %v3011_v58, %v3007_v15 }
 0x385   :  { %v2707_v32 = vpop.f32.mrf.mxu2 }
 0x386   :  { %v6267_v42 = vadd.f32 %v2707_v32, %v2659_v10  ;;  %v2612_v11 = vpop.f32.mrf.mxu0 }
 0x387   :  { %v2613_v7 = vadd.f32 %v2612_v11, %v6073_v41 }
 0x388   :  { %v6269_v20 = vpop.f32.mrf.mxu3  ;;  %v2661_v23 = vpop.f32.mrf.mxu1 }
 0x389   :  { %2807 = vmatmul.bf16.gmra.mxu0 %v6540_v34  ;;  %v2662_v21 = vadd.f32 %v2661_v23, %v6101_v2  ;;  %v3015_v34 = vmax.f32 %v2613_v7, 0.0  ;;  %v6575_v7 = vld [vmem:[#allocation29_spill] sm:$0xff] }
 0x38a   :  { %2905 = vmatmul.bf16.gmra.mxu2 %v6571_v28 }
 0x38b   :  { %2856 = vmatmul.bf16.gmra.mxu1 %v6541_v26  ;;  %v4996_v26 = vld [vmem:[%s6388_s3 + $0xc0] sm:$0xff] }
 0x38c   :  { %3475 = vmatpush.bf16.msrb.mxu3 %v4996_v26 }
 0x38d   :  { %4590 = vmatmul.msk.bf16.gmra.mxu3 %vm1568_vm0, %v6565_v14  ;;  %v2710_v4 = vpop.f32.mrf.mxu2 }
 0x38e   :  { %v2711_v49 = vadd.f32 %v2710_v4, %v2662_v21  ;;  %v2614_v30 = vpop.f32.mrf.mxu0 }
 0x38f   :  { %v2615_v41 = vadd.f32 %v2614_v30, %v6076_v37 }
 0x390   :  { %v2759_v61 = vpop.f32.mrf.mxu3  ;;  %v2663_v25 = vpop.f32.mrf.mxu1 }
 0x391   :  { %v6288_v50 = vadd.f32 %v2759_v61, %v2711_v49  ;;  %v3019_v55 = vmax.f32 %v2615_v41, 0.0  ;;  %v2664_v38 = vadd.f32 %v2663_v25, %v6101_v2 }
 0x393   :  { %v6293_v35 = vpack.c.bf16 %v3019_v55, %v3015_v34 }
 0x395   :  { %v2712_v14 = vpop.f32.mrf.mxu2 }
 0x396   :  { %v6296_v33 = vadd.f32 %v2712_v14, %v2664_v38  ;;  %v2617_v37 = vpop.f32.mrf.mxu0 }
 0x397   :  { %v2618_v3 = vadd.f32 %v2617_v37, %v6087_v13  ;;  %v6576_v37 = vld [vmem:[#allocation46_spill] sm:$0xff] }
 0x398   :  { %v6298_v46 = vpop.f32.mrf.mxu3  ;;  %v2666_v31 = vpop.f32.mrf.mxu1 }
 0x399   :  { %2812 = vmatmul.bf16.gmra.mxu0 %v6544_v19  ;;  %v2667_v6 = vadd.f32 %v2666_v31, %v6101_v2  ;;  %v3023_v58 = vmax.f32 %v2618_v3, 0.0  ;;  %v6577_v3 = vld [vmem:[#allocation31_spill] sm:$0xff] }
 0x39a   :  { %2910 = vmatmul.bf16.gmra.mxu2 %v6573_v54 }
 0x39b   :  { %2861 = vmatmul.bf16.gmra.mxu1 %v6572_v62 }
 0x39d   :  { %4591 = vmatmul.msk.bf16.gmra.mxu3 %vm1568_vm0, %v6568_v52  ;;  %v2715_v24 = vpop.f32.mrf.mxu2 }
 0x39e   :  { %v2716_v57 = vadd.f32 %v2715_v24, %v2667_v6  ;;  %v2619_v48 = vpop.f32.mrf.mxu0 }
 0x39f   :  { %v2620_v47 = vadd.f32 %v2619_v48, %v6104_v22 }
 0x3a0   :  { %v2764_v63 = vpop.f32.mrf.mxu3  ;;  %v2668_v15 = vpop.f32.mrf.mxu1 }
 0x3a1   :  { %v6308_v13 = vadd.f32 %v2764_v63, %v2716_v57  ;;  %v3027_v19 = vmax.f32 %v2620_v47, 0.0  ;;  %v2669_v10 = vadd.f32 %v2668_v15, %v6101_v2 }
 0x3a3   :  { %v6310_v16 = vpack.c.bf16 %v3027_v19, %v3023_v58 }
 0x3a5   :  { %v2717_v32 = vpop.f32.mrf.mxu2 }
 0x3a6   :  { %v6313_v11 = vadd.f32 %v2717_v32, %v2669_v10  ;;  %v2778_v52 = vpop.f32.mrf.mxu0 }
 0x3a7   :  { %v2779_v22 = vadd.f32 %v2778_v52, %v6116_v36 }
 0x3a8   :  { %v6315_v9 = vpop.f32.mrf.mxu3  ;;  %v2827_v5 = vpop.f32.mrf.mxu1 }
 0x3a9   :  { %3329 = vmatmul.bf16.vlgmr.msrb.gmra.mxu0 %v6574_v1  ;;  %v2828_v2 = vadd.f32 %v2827_v5, %v2779_v22  ;;  %v6578_v5 = vld [vmem:[#allocation47_spill] sm:$0xff] }
 0x3aa   :  { %3427 = vmatmul.bf16.vlgmr.msrb.gmra.mxu2 %v6127_v43 }
 0x3ab   :  { %3378 = vmatmul.bf16.vlgmr.msrb.gmra.mxu1 %v6575_v7  ;;  %v6579_v7 = vld [vmem:[#allocation33_spill] sm:$0xff] }
 0x3ad   :  { %v2876_v23 = vpop.f32.mrf.mxu2 }
 0x3ae   :  { %v2780_v28 = vpop.f32.mrf.mxu0  ;;  %v2877_v61 = vadd.f32 %v2876_v23, %v2828_v2 }
 0x3af   :  { %v2781_v49 = vadd.f32 %v2780_v28, %v6131_v17 }
 0x3b0   :  { %v2925_v21 = vpop.f32.mrf.mxu3  ;;  %v2829_v4 = vpop.f32.mrf.mxu1 }
 0x3b1   :  { %v2830_v30 = vadd.f32 %v2829_v4, %v2781_v49  ;;  %v2926_v25 = vadd.f32 %v2925_v21, %v2877_v61 }
 0x3b3   :  { %v2968_v43 = vmax.f32 %v2926_v25, 0.0 }
 0x3b5   :  { %v2878_v41 = vpop.f32.mrf.mxu2 }
 0x3b6   :  { %v2879_v34 = vadd.f32 %v2878_v41, %v2830_v30  ;;  %v2783_v26 = vpop.f32.mrf.mxu0 }
 0x3b7   :  { %v2784_v17 = vadd.f32 %v2783_v26, %v6143_v27 }
 0x3b8   :  { %v2927_v55 = vpop.f32.mrf.mxu3  ;;  %v2832_v38 = vpop.f32.mrf.mxu1 }
 0x3b9   :  { %v2928_v14 = vadd.f32 %v2927_v55, %v2879_v34  ;;  %3334 = vmatmul.bf16.gmra.mxu0 %v6576_v37  ;;  %v2833_v57 = vadd.f32 %v2832_v38, %v2784_v17 }
 0x3ba   :  { %3432 = vmatmul.bf16.gmra.mxu2 %v6154_v40 }
 0x3bb   :  { %v2972_v36 = vmax.f32 %v2928_v14, 0.0  ;;  %3383 = vmatmul.bf16.gmra.mxu1 %v6577_v3  ;;  %v6580_v14 = vld [vmem:[#allocation48_spill] sm:$0xff] }
 0x3bd   :  { %v3032_v31 = vpack.c.bf16 %v2972_v36, %v2968_v43  ;;  %v2881_v6 = vpop.f32.mrf.mxu2  ;;  %v6581_v43 = vld [vmem:[#allocation35_spill] sm:$0xff] }
 0x3be   :  { %v2785_v54 = vpop.f32.mrf.mxu0  ;;  %v2882_v48 = vadd.f32 %v2881_v6, %v2833_v57 }
 0x3bf   :  { %3476 = vmatmul.bf16.vlgmr.msrb.gmra.mxu3 %v3032_v31  ;;  %v2786_v63 = vadd.f32 %v2785_v54, %v6158_v60 }
 0x3c0   :  { %v2930_v62 = vpop.f32.mrf.mxu3  ;;  %v2834_v24 = vpop.f32.mrf.mxu1 }
 0x3c1   :  { %v2835_v47 = vadd.f32 %v2834_v24, %v2786_v63  ;;  %v2931_v58 = vadd.f32 %v2930_v62, %v2882_v48 }
 0x3c3   :  { %v2976_v27 = vmax.f32 %v2931_v58, 0.0 }
 0x3c5   :  { %v2883_v15 = vpop.f32.mrf.mxu2 }
 0x3c6   :  { %v2884_v19 = vadd.f32 %v2883_v15, %v2835_v47  ;;  %v2788_v32 = vpop.f32.mrf.mxu0 }
 0x3c7   :  { %v2789_v22 = vadd.f32 %v2788_v32, %v6170_v39 }
 0x3c8   :  { %v2932_v10 = vpop.f32.mrf.mxu3  ;;  %v2837_v52 = vpop.f32.mrf.mxu1 }
 0x3c9   :  { %v2933_v40 = vadd.f32 %v2932_v10, %v2884_v19  ;;  %3339 = vmatmul.bf16.gmra.mxu0 %v6578_v5  ;;  %v2838_v2 = vadd.f32 %v2837_v52, %v2789_v22  ;;  %v6582_v10 = vld [vmem:[#allocation49_spill] sm:$0xff] }
 0x3ca   :  { %3437 = vmatmul.bf16.gmra.mxu2 %v6181_v18  ;;  %v6583_v52 = vld [vmem:[#allocation37_spill] sm:$0xff] }
 0x3cb   :  { %v2980_v1 = vmax.f32 %v2933_v40, 0.0  ;;  %3388 = vmatmul.bf16.gmra.mxu1 %v6579_v7 }
 0x3cd   :  { %v3036_v60 = vpack.c.bf16 %v2980_v1, %v2976_v27  ;;  %v2886_v23 = vpop.f32.mrf.mxu2  ;;  %v2752_v27 = vadd.f32 %v6240_v53, %v6238_v12  ;;  %v6585_v12 = vld [vmem:[#allocation52_spill] sm:$0xff] }
 0x3ce   :  { %v2790_v28 = vpop.f32.mrf.mxu0  ;;  %v2887_v61 = vadd.f32 %v2886_v23, %v2838_v2 }
 0x3cf   :  { %3481 = vmatmul.bf16.gmra.mxu3 %v3036_v60  ;;  %v2791_v49 = vadd.f32 %v2790_v28, %v6185_v51 }
 0x3d0   :  { %v2935_v21 = vpop.f32.mrf.mxu3  ;;  %v2839_v4 = vpop.f32.mrf.mxu1 }
 0x3d1   :  { %v2840_v30 = vadd.f32 %v2839_v4, %v2791_v49  ;;  %v2936_v25 = vadd.f32 %v2935_v21, %v2887_v61 }
 0x3d3   :  { %v2984_v39 = vmax.f32 %v2936_v25, 0.0 }
 0x3d5   :  { %v2888_v41 = vpop.f32.mrf.mxu2 }
 0x3d6   :  { %v2889_v34 = vadd.f32 %v2888_v41, %v2840_v30  ;;  %v2793_v26 = vpop.f32.mrf.mxu0  ;;  %v6584_v41 = vld [vmem:[#allocation50_spill] sm:$0xff] }
 0x3d7   :  { %v2794_v36 = vadd.f32 %v2793_v26, %v6197_v56 }
 0x3d8   :  { %v2937_v55 = vpop.f32.mrf.mxu3  ;;  %v2842_v38 = vpop.f32.mrf.mxu1 }
 0x3d9   :  { %v2938_v18 = vadd.f32 %v2937_v55, %v2889_v34  ;;  %3344 = vmatmul.bf16.gmra.mxu0 %v6580_v14  ;;  %v2843_v62 = vadd.f32 %v2842_v38, %v2794_v36  ;;  %v2757_v38 = vadd.f32 %v6269_v20, %v6267_v42  ;;  %v6587_v42 = vld [vmem:[#allocation22_spill] sm:$0xff] }
 0x3da   :  { %3442 = vmatmul.bf16.gmra.mxu2 %v6208_v0 }
 0x3db   :  { %v2988_v37 = vmax.f32 %v2938_v18, 0.0  ;;  %3393 = vmatmul.bf16.gmra.mxu1 %v6581_v43 }
 0x3dd   :  { %v3040_v51 = vpack.c.bf16 %v2988_v37, %v2984_v39  ;;  %v2891_v3 = vpop.f32.mrf.mxu2 }
 0x3de   :  { %v2795_v17 = vpop.f32.mrf.mxu0  ;;  %v2892_v24 = vadd.f32 %v2891_v3, %v2843_v62 }
 0x3df   :  { %3486 = vmatmul.bf16.gmra.mxu3 %v3040_v51  ;;  %v2796_v54 = vadd.f32 %v2795_v17, %v6212_v44 }
 0x3e0   :  { %v2940_v31 = vpop.f32.mrf.mxu3  ;;  %v2844_v6 = vpop.f32.mrf.mxu1 }
 0x3e1   :  { %v2845_v57 = vadd.f32 %v2844_v6, %v2796_v54  ;;  %v2941_v48 = vadd.f32 %v2940_v31, %v2892_v24 }
 0x3e3   :  { %v2992_v56 = vmax.f32 %v2941_v48, 0.0 }
 0x3e5   :  { %v2893_v63 = vpop.f32.mrf.mxu2 }
 0x3e6   :  { %v2894_v47 = vadd.f32 %v2893_v63, %v2845_v57  ;;  %v2798_v58 = vpop.f32.mrf.mxu0 }
 0x3e7   :  { %v2799_v40 = vadd.f32 %v2798_v58, %v6224_v45 }
 0x3e8   :  { %v2942_v15 = vpop.f32.mrf.mxu3  ;;  %v2847_v19 = vpop.f32.mrf.mxu1 }
 0x3e9   :  { %v2943_v0 = vadd.f32 %v2942_v15, %v2894_v47  ;;  %3349 = vmatmul.bf16.gmra.mxu0 %v6582_v10  ;;  %v2848_v60 = vadd.f32 %v2847_v19, %v2799_v40  ;;  %v2762_v47 = vadd.f32 %v6298_v46, %v6296_v33  ;;  %v6589_v33 = vld [vmem:[#allocation39_spill] sm:$0xff] }
 0x3ea   :  { %3447 = vmatmul.bf16.gmra.mxu2 %v6235_v59 }
 0x3eb   :  { %v2996_v32 = vmax.f32 %v2943_v0, 0.0  ;;  %3398 = vmatmul.bf16.gmra.mxu1 %v6583_v52 }
 0x3ed   :  { %v3044_v44 = vpack.c.bf16 %v2996_v32, %v2992_v56  ;;  %v2896_v5 = vpop.f32.mrf.mxu2 }
 0x3ee   :  { %v2800_v7 = vpop.f32.mrf.mxu0  ;;  %v2897_v21 = vadd.f32 %v2896_v5, %v2848_v60 }
 0x3ef   :  { %3491 = vmatmul.bf16.gmra.mxu3 %v3044_v44  ;;  %v2801_v23 = vadd.f32 %v2800_v7, %v2752_v27 }
 0x3f0   :  { %v2945_v1 = vpop.f32.mrf.mxu3  ;;  %v2849_v22 = vpop.f32.mrf.mxu1 }
 0x3f1   :  { %v2850_v28 = vadd.f32 %v2849_v22, %v2801_v23  ;;  %v2946_v2 = vadd.f32 %v2945_v1, %v2897_v21  ;;  %v2767_v21 = vadd.f32 %v6315_v9, %v6313_v11 }
 0x3f3   :  { %v3000_v25 = vmax.f32 %v2946_v2, 0.0 }
 0x3f5   :  { %v2898_v4 = vpop.f32.mrf.mxu2 }
 0x3f6   :  { %v2899_v49 = vadd.f32 %v2898_v4, %v2850_v28  ;;  %v2803_v59 = vpop.f32.mrf.mxu0 }
 0x3f7   :  { %v2804_v55 = vadd.f32 %v2803_v59, %v6253_v8  ;;  %v6586_v8 = vld [vmem:[#allocation51_spill] sm:$0xff] }
 0x3f8   :  { %v2947_v61 = vpop.f32.mrf.mxu3  ;;  %v2852_v30 = vpop.f32.mrf.mxu1 }
 0x3f9   :  { %v2948_v45 = vadd.f32 %v2947_v61, %v2899_v49  ;;  %3354 = vmatmul.bf16.gmra.mxu0 %v6584_v41  ;;  %v2853_v37 = vadd.f32 %v2852_v30, %v2804_v55 }
 0x3fa   :  { %3452 = vmatmul.bf16.gmra.mxu2 %v6264_v29 }
 0x3fb   :  { %v3004_v34 = vmax.f32 %v2948_v45, 0.0  ;;  %3403 = vmatmul.bf16.gmra.mxu1 %v6585_v12 }
 0x3fd   :  { %v3048_v53 = vpack.c.bf16 %v3004_v34, %v3000_v25  ;;  %v2901_v26 = vpop.f32.mrf.mxu2 }
 0x3fe   :  { %v2805_v14 = vpop.f32.mrf.mxu0  ;;  %v2902_v36 = vadd.f32 %v2901_v26, %v2853_v37 }
 0x3ff   :  { %3496 = vmatmul.bf16.gmra.mxu3 %v3048_v53  ;;  %v2806_v43 = vadd.f32 %v2805_v14, %v2757_v38  ;;  %v6364_v14 = vld [vmem:[%s6389_s4] ss:$0 sm:$0xff]  ;;  %s5068_s4 = smov [#allocation5]  }
 0x400   :  { %v2950_v18 = vpop.f32.mrf.mxu3  ;;  %v2854_v39 = vpop.f32.mrf.mxu1  ;;  %s3537_s2 = sshll.u32 %s5068_s4, 4  ;;  %s3538_s2 = int_to_ptr.vmem [resolvable:$true] %s3537_s2 }
 0x401   :  { %v2855_v51 = vadd.f32 %v2854_v39, %v2806_v43  ;;  %v2951_v31 = vadd.f32 %v2950_v18, %v2902_v36 }
 0x403   :  { %v3008_v24 = vmax.f32 %v2951_v31, 0.0 }
 0x405   :  { %v2903_v3 = vpop.f32.mrf.mxu2 }
 0x406   :  { %v2904_v17 = vadd.f32 %v2903_v3, %v2855_v51  ;;  %v2808_v29 = vpop.f32.mrf.mxu0 }
 0x407   :  { %v2809_v63 = vadd.f32 %v2808_v29, %v6288_v50  ;;  %v6588_v50 = vld [vmem:[#allocation27_spill] sm:$0xff] }
 0x408   :  { %v2952_v6 = vpop.f32.mrf.mxu3  ;;  %v2857_v62 = vpop.f32.mrf.mxu1 }
 0x409   :  { %v2953_v54 = vadd.f32 %v2952_v6, %v2904_v17  ;;  %3359 = vmatmul.bf16.gmra.mxu0 %v6586_v8  ;;  %v2858_v0 = vadd.f32 %v2857_v62, %v2809_v63 }
 0x40a   :  { %3457 = vmatmul.bf16.gmra.mxu2 %v6293_v35 }
 0x40b   :  { %v3012_v57 = vmax.f32 %v2953_v54, 0.0  ;;  %3408 = vmatmul.bf16.gmra.mxu1 %v6587_v42 }
 0x40d   :  { %v3052_v20 = vpack.c.bf16 %v3012_v57, %v3008_v24  ;;  %v2906_v48 = vpop.f32.mrf.mxu2 }
 0x40e   :  { %v2810_v58 = vpop.f32.mrf.mxu0  ;;  %v2907_v56 = vadd.f32 %v2906_v48, %v2858_v0 }
 0x40f   :  { %3501 = vmatmul.bf16.gmra.mxu3 %v3052_v20  ;;  %v2811_v10 = vadd.f32 %v2810_v58, %v2762_v47 }
 0x410   :  { %v2955_v15 = vpop.f32.mrf.mxu3  ;;  %v2859_v19 = vpop.f32.mrf.mxu1 }
 0x411   :  { %v2860_v32 = vadd.f32 %v2859_v19, %v2811_v10  ;;  %v2956_v40 = vadd.f32 %v2955_v15, %v2907_v56 }
 0x413   :  { %v3016_v7 = vmax.f32 %v2956_v40, 0.0 }
 0x415   :  { %v2908_v52 = vpop.f32.mrf.mxu2 }
 0x416   :  { %v2909_v44 = vadd.f32 %v2908_v52, %v2860_v32  ;;  %v2813_v35 = vpop.f32.mrf.mxu0 }
 0x417   :  { %v2814_v60 = vadd.f32 %v2813_v35, %v6308_v13 }
 0x418   :  { %v2957_v5 = vpop.f32.mrf.mxu3  ;;  %v2862_v27 = vpop.f32.mrf.mxu1 }
 0x419   :  { %v2958_v1 = vadd.f32 %v2957_v5, %v2909_v44  ;;  %3364 = vmatmul.bf16.gmra.mxu0 %v6588_v50  ;;  %v2863_v49 = vadd.f32 %v2862_v27, %v2814_v60 }
 0x41a   :  { %3462 = vmatmul.bf16.gmra.mxu2 %v6310_v16 }
 0x41b   :  { %v3020_v22 = vmax.f32 %v2958_v1, 0.0  ;;  %3413 = vmatmul.bf16.gmra.mxu1 %v6589_v33 }
 0x41d   :  { %v3056_v46 = vpack.c.bf16 %v3020_v22, %v3016_v7  ;;  %v2911_v23 = vpop.f32.mrf.mxu2 }
 0x41e   :  { %v2815_v4 = vpop.f32.mrf.mxu0  ;;  %v2912_v59 = vadd.f32 %v2911_v23, %v2863_v49 }
 0x41f   :  { %3506 = vmatmul.bf16.gmra.mxu3 %v3056_v46  ;;  %v2816_v61 = vadd.f32 %v2815_v4, %v2767_v21 }
 0x420   :  { %v2960_v28 = vpop.f32.mrf.mxu3  ;;  %v2864_v2 = vpop.f32.mrf.mxu1 }
 0x421   :  { %v2865_v30 = vadd.f32 %v2864_v2, %v2816_v61  ;;  %v2961_v41 = vadd.f32 %v2960_v28, %v2912_v59 }
 0x423   :  { %v3024_v13 = vmax.f32 %v2961_v41, 0.0 }
 0x425   :  { %v2913_v45 = vpop.f32.mrf.mxu2 }
 0x426   :  { %v2914_v25 = vadd.f32 %v2913_v45, %v2865_v30  ;;  %v3330_v34 = vpop.f32.mrf.mxu0 }
 0x427   :  { %v3331_v43 = vadd.f32 %v6364_v14, %v3330_v34 }
 0x428   :  { %v2962_v16 = vpop.f32.mrf.mxu3  ;;  %v3379_v12 = vpop.f32.mrf.mxu1 }
 0x429   :  { %v2963_v53 = vadd.f32 %v2962_v16, %v2914_v25  ;;  %v3380_v51 = vadd.f32 %v3379_v12, %v3331_v43 }
 0x42b   :  { %v3028_v55 = vmax.f32 %v2963_v53, 0.0 }
 0x42d   :  { %v3060_v26 = vpack.c.bf16 %v3028_v55, %v3024_v13  ;;  %v3428_v38 = vpop.f32.mrf.mxu2 }
 0x42e   :  { %v3332_v11 = vpop.f32.mrf.mxu0  ;;  %v3429_v17 = vadd.f32 %v3428_v38, %v3380_v51 }
 0x42f   :  { %3511 = vmatmul.bf16.gmra.mxu3 %v3060_v26  ;;  %v3333_v29 = vadd.f32 %v6364_v14, %v3332_v11 }
 0x430   :  { %v3381_v9 = vpop.f32.mrf.mxu1 }
 0x431   :  { %v3382_v8 = vadd.f32 %v3381_v9, %v3333_v29 }
 0x435   :  { %v3430_v18 = vpop.f32.mrf.mxu2 }
 0x436   :  { %v3335_v39 = vpop.f32.mrf.mxu0  ;;  %v3431_v42 = vadd.f32 %v3430_v18, %v3382_v8 }
 0x437   :  { %v3336_v63 = vadd.f32 %v6364_v14, %v3335_v39 }
 0x438   :  { %v3384_v37 = vpop.f32.mrf.mxu1 }
 0x439   :  { %v3385_v15 = vadd.f32 %v3384_v37, %v3336_v63 }
 0x43d   :  { %v3433_v36 = vpop.f32.mrf.mxu2 }
 0x43e   :  { %v3337_v3 = vpop.f32.mrf.mxu0  ;;  %v3434_v19 = vadd.f32 %v3433_v36, %v3385_v15 }
 0x43f   :  { %v3338_v56 = vadd.f32 %v6364_v14, %v3337_v3 }
 0x440   :  { %v3386_v31 = vpop.f32.mrf.mxu1 }
 0x441   :  { %v3387_v40 = vadd.f32 %v3386_v31, %v3338_v56 }
 0x442   :  { %v3477_v6 = vpop.f32.mrf.mxu3 }
 0x443   :  { %v3478_v62 = vadd.f32 %v3477_v6, %v3429_v17 }
 0x445   :  { %3517 = vst [vmem:[#allocation5] sm:$0xff] %v3478_v62  ;;  %v3435_v54 = vpop.f32.mrf.mxu2 }
 0x446   :  { %v3340_v24 = vpop.f32.mrf.mxu0  ;;  %v3436_v5 = vadd.f32 %v3435_v54, %v3387_v40 }
 0x447   :  { %v3341_v27 = vadd.f32 %v6364_v14, %v3340_v24 }
 0x448   :  { %v3389_v57 = vpop.f32.mrf.mxu1 }
 0x449   :  { %v3390_v22 = vadd.f32 %v3389_v57, %v3341_v27 }
 0x44a   :  { %v3479_v20 = vpop.f32.mrf.mxu3 }
 0x44b   :  { %v3480_v48 = vadd.f32 %v3479_v20, %v3431_v42 }
 0x44d   :  { %3518 = vst [vmem:[#allocation5 + $0x8] sm:$0xff] %v3480_v48  ;;  %v3438_v47 = vpop.f32.mrf.mxu2 }
 0x44e   :  { %v3342_v58 = vpop.f32.mrf.mxu0  ;;  %v3439_v46 = vadd.f32 %v3438_v47, %v3390_v22 }
 0x44f   :  { %v3343_v23 = vadd.f32 %v6364_v14, %v3342_v58 }
 0x450   :  { %v3391_v0 = vpop.f32.mrf.mxu1 }
 0x451   :  { %v3392_v2 = vadd.f32 %v3391_v0, %v3343_v23 }
 0x452   :  { %v3482_v10 = vpop.f32.mrf.mxu3 }
 0x453   :  { %v3483_v32 = vadd.f32 %v3482_v10, %v3434_v19 }
 0x455   :  { %3519 = vst [vmem:[#allocation5 + $0x10] sm:$0xff] %v3483_v32  ;;  %v3440_v52 = vpop.f32.mrf.mxu2 }
 0x456   :  { %v3345_v44 = vpop.f32.mrf.mxu0  ;;  %v3441_v49 = vadd.f32 %v3440_v52, %v3392_v2 }
 0x457   :  { %v3346_v30 = vadd.f32 %v6364_v14, %v3345_v44 }
 0x458   :  { %v3394_v1 = vpop.f32.mrf.mxu1 }
 0x459   :  { %v3395_v41 = vadd.f32 %v3394_v1, %v3346_v30 }
 0x45a   :  { %v3484_v35 = vpop.f32.mrf.mxu3 }
 0x45b   :  { %v3485_v50 = vadd.f32 %v3484_v35, %v3436_v5 }
 0x45d   :  { %3520 = vst [vmem:[#allocation5 + $0x18] sm:$0xff] %v3485_v50  ;;  %v3443_v7 = vpop.f32.mrf.mxu2 }
 0x45e   :  { %v3347_v33 = vpop.f32.mrf.mxu0  ;;  %v3444_v16 = vadd.f32 %v3443_v7, %v3395_v41 }
 0x45f   :  { %v3348_v53 = vadd.f32 %v6364_v14, %v3347_v33 }
 0x460   :  { %v3396_v28 = vpop.f32.mrf.mxu1 }
 0x461   :  { %v3397_v26 = vadd.f32 %v3396_v28, %v3348_v53 }
 0x462   :  { %v3487_v60 = vpop.f32.mrf.mxu3 }
 0x463   :  { %v3488_v21 = vadd.f32 %v3487_v60, %v3439_v46 }
 0x465   :  { %3521 = vst [vmem:[#allocation5 + $0x20] sm:$0xff] %v3488_v21  ;;  %v3445_v4 = vpop.f32.mrf.mxu2 }
 0x466   :  { %v3350_v61 = vpop.f32.mrf.mxu0  ;;  %v3446_v38 = vadd.f32 %v3445_v4, %v3397_v26 }
 0x467   :  { %v3351_v39 = vadd.f32 %v6364_v14, %v3350_v61 }
 0x468   :  { %v3399_v25 = vpop.f32.mrf.mxu1 }
 0x469   :  { %v3400_v36 = vadd.f32 %v3399_v25, %v3351_v39 }
 0x46a   :  { %v3489_v59 = vpop.f32.mrf.mxu3 }
 0x46b   :  { %v3490_v45 = vadd.f32 %v3489_v59, %v3441_v49 }
 0x46d   :  { %3522 = vst [vmem:[#allocation5 + $0x28] sm:$0xff] %v3490_v45  ;;  %v3448_v34 = vpop.f32.mrf.mxu2 }
 0x46e   :  { %v3352_v55 = vpop.f32.mrf.mxu0  ;;  %v3449_v51 = vadd.f32 %v3448_v34, %v3400_v36 }
 0x46f   :  { %v3353_v31 = vadd.f32 %v6364_v14, %v3352_v55 }
 0x470   :  { %v3401_v11 = vpop.f32.mrf.mxu1 }
 0x471   :  { %v3402_v62 = vadd.f32 %v3401_v11, %v3353_v31 }
 0x472   :  { %v3492_v12 = vpop.f32.mrf.mxu3 }
 0x473   :  { %v3493_v13 = vadd.f32 %v3492_v12, %v3444_v16 }
 0x475   :  { %3523 = vst [vmem:[#allocation5 + $0x30] sm:$0xff] %v3493_v13  ;;  %v3450_v9 = vpop.f32.mrf.mxu2 }
 0x476   :  { %v3355_v43 = vpop.f32.mrf.mxu0  ;;  %v3451_v8 = vadd.f32 %v3450_v9, %v3402_v62 }
 0x477   :  { %v3356_v57 = vadd.f32 %v6364_v14, %v3355_v43 }
 0x478   :  { %v3404_v17 = vpop.f32.mrf.mxu1 }
 0x479   :  { %v3405_v48 = vadd.f32 %v3404_v17, %v3356_v57 }
 0x47a   :  { %v3494_v18 = vpop.f32.mrf.mxu3 }
 0x47b   :  { %v3495_v37 = vadd.f32 %v3494_v18, %v3446_v38 }
 0x47d   :  { %3524 = vst [vmem:[#allocation5 + $0x38] sm:$0xff] %v3495_v37  ;;  %v3453_v29 = vpop.f32.mrf.mxu2 }
 0x47e   :  { %v3357_v54 = vpop.f32.mrf.mxu0  ;;  %v3454_v47 = vadd.f32 %v3453_v29, %v3405_v48 }
 0x47f   :  { %v3358_v19 = vadd.f32 %v6364_v14, %v3357_v54 }
 0x480   :  { %v3406_v20 = vpop.f32.mrf.mxu1 }
 0x481   :  { %v3407_v10 = vadd.f32 %v3406_v20, %v3358_v19 }
 0x482   :  { %v3497_v3 = vpop.f32.mrf.mxu3 }
 0x483   :  { %v3498_v6 = vadd.f32 %v3497_v3, %v3449_v51 }
 0x485   :  { %3525 = vst [vmem:[#allocation5 + $0x40] sm:$0xff] %v3498_v6  ;;  %v3455_v63 = vpop.f32.mrf.mxu2 }
 0x486   :  { %v3360_v15 = vpop.f32.mrf.mxu0  ;;  %v3456_v52 = vadd.f32 %v3455_v63, %v3407_v10 }
 0x487   :  { %v3361_v44 = vadd.f32 %v6364_v14, %v3360_v15 }
 0x488   :  { %v3409_v56 = vpop.f32.mrf.mxu1 }
 0x489   :  { %v3410_v27 = vadd.f32 %v3409_v56, %v3361_v44 }
 0x48a   :  { %v3499_v24 = vpop.f32.mrf.mxu3 }
 0x48b   :  { %v3500_v42 = vadd.f32 %v3499_v24, %v3451_v8 }
 0x48d   :  { %3526 = vst [vmem:[#allocation5 + $0x48] sm:$0xff] %v3500_v42  ;;  %v3458_v32 = vpop.f32.mrf.mxu2 }
 0x48e   :  { %v3362_v35 = vpop.f32.mrf.mxu0  ;;  %v3459_v1 = vadd.f32 %v3458_v32, %v3410_v27 }
 0x48f   :  { %v3363_v33 = vadd.f32 %v6364_v14, %v3362_v35 }
 0x490   :  { %v3411_v50 = vpop.f32.mrf.mxu1 }
 0x491   :  { %v3412_v23 = vadd.f32 %v3411_v50, %v3363_v33 }
 0x492   :  { %v3502_v58 = vpop.f32.mrf.mxu3 }
 0x493   :  { %v3503_v0 = vadd.f32 %v3502_v58, %v3454_v47 }
 0x495   :  { %3527 = vst [vmem:[#allocation5 + $0x50] sm:$0xff] %v3503_v0  ;;  %v3460_v7 = vpop.f32.mrf.mxu2 }
 0x496   :  { %v3365_v60 = vpop.f32.mrf.mxu0  ;;  %v3461_v21 = vadd.f32 %v3460_v7, %v3412_v23 }
 0x497   :  { %v3366_v4 = vadd.f32 %v6364_v14, %v3365_v60 }
 0x498   :  { %v3414_v49 = vpop.f32.mrf.mxu1 }
 0x499   :  { %v3415_v59 = vadd.f32 %v3414_v49, %v3366_v4 }
 0x49a   :  { %v3504_v40 = vpop.f32.mrf.mxu3 }
 0x49b   :  { %v3505_v5 = vadd.f32 %v3504_v40, %v3456_v52 }
 0x49d   :  { %3528 = vst [vmem:[#allocation5 + $0x58] sm:$0xff] %v3505_v5  ;;  %v3463_v61 = vpop.f32.mrf.mxu2 }
 0x49e   :  { %v3367_v30 = vpop.f32.mrf.mxu0  ;;  %v3464_v45 = vadd.f32 %v3463_v61, %v3415_v59 }
 0x49f   :  { %v3368_v25 = vadd.f32 %v6364_v14, %v3367_v30 }
 0x4a0   :  { %v3416_v16 = vpop.f32.mrf.mxu1 }
 0x4a1   :  { %v3417_v53 = vadd.f32 %v3416_v16, %v3368_v25 }
 0x4a2   :  { %v3507_v22 = vpop.f32.mrf.mxu3 }
 0x4a3   :  { %v3508_v46 = vadd.f32 %v3507_v22, %v3459_v1 }
 0x4a5   :  { %3529 = vst [vmem:[#allocation5 + $0x60] sm:$0xff] %v3508_v46  ;;  %v3465_v12 = vpop.f32.mrf.mxu2 }
 0x4a6   :  { %v3466_v13 = vadd.f32 %v3465_v12, %v3417_v53 }
 0x4aa   :  { %v3509_v28 = vpop.f32.mrf.mxu3 }
 0x4ab   :  { %v3510_v2 = vadd.f32 %v3509_v28, %v3461_v21 }
 0x4ad   :  { %3530 = vst [vmem:[#allocation5 + $0x68] sm:$0xff] %v3510_v2 }
 0x4b2   :  { %v3512_v41 = vpop.f32.mrf.mxu3 }
 0x4b3   :  { %v3513_v34 = vadd.f32 %v3512_v41, %v3464_v45 }
 0x4b5   :  { %3531 = vst [vmem:[#allocation5 + $0x70] sm:$0xff] %v3513_v34 }
 0x4ba   :  { %v3514_v55 = vpop.f32.mrf.mxu3 }
 0x4bb   :  { %v3515_v26 = vadd.f32 %v3514_v55, %v3466_v13 }
 0x4bd   :  { %3532 = vst [vmem:[#allocation5 + $0x78] sm:$0xff] %v3515_v26 }
 0x4be   :  { %3545 = dma.vmem_to_hbm [thread:$0]  %s3538_s2, 2048, %s3540_s30, [#allocation4], %s5069_s6, %s5069_s6, %s5070_s7  }
 0x4bf   :  { %5063 = dma.done.wait [#allocation4], 2048  }
 0x4c0   :  { %5064 = vsyncadd [#allocation4], 4294965248 }
 0x4c1   :  { %3550 = vsyncpa [#allocation3], 1 }
 0x4c2   :  { %3551 = vsyncpa [#allocation4], 1 }

</bundles_post_ra>
